<compile_context>
chip_gen: v5e
topology: v5e:2x2
jax: 0.10.0
libtpu: 0.0.40
codegen_flags: <defaults>
</compile_context>

<pallas_src>
import jax
import jax.numpy as jnp
from jax import lax
from jax.experimental import pallas as pl
from jax.experimental.pallas import tpu as pltpu


C_PAD = 128  # lane-dense label dimension (sliced back to C in the wrapper)


def _round_up(x, m):
    return ((x + m - 1) // m) * m


def _tpu_caps():
    """Per-generation VMEM budget / tile caps."""
    try:
        kind = jax.devices()[0].device_kind.lower()
    except Exception:
        kind = ""
    if "v7" in kind or "7x" in kind:
        # 64 MiB physical VMEM per TensorCore -> leave compiler headroom.
        return dict(vmem_budget=48 * 1024 * 1024, tk_cap=1024, tm_cap=512,
                    prefer_even_rows=True)
    # v5e / v6e: 128 MiB physical VMEM.
    return dict(vmem_budget=64 * 1024 * 1024, tk_cap=2048, tm_cap=512,
                prefer_even_rows=False)


def _pick_tiles(n_pad, caps, rhs_resident):
    """Largest multiple-of-128 divisors of n_pad (incl. n_pad) under the VMEM budget."""
    divs = [d for d in range(128, n_pad + 1, 128) if n_pad % d == 0]
    tk_opts = [d for d in divs if d <= caps["tk_cap"]] or [divs[0]]
    tm_opts = [d for d in divs if d <= caps["tm_cap"]] or [divs[0]]

    def footprint(tm, tk):
        edges = 2 * 2 * tm * tk * 2                                  # entail+contra, 2x buffered, bf16
        rhs = 2 * 2 * (n_pad if rhs_resident else tk) * C_PAD * 2    # onehot + anti
        out = tm * C_PAD * 4                                         # resident f32 vote accumulator
        temps = 4 * tm * tk * 2                                      # live masked bf16 intermediates + slack
        return edges + rhs + out + temps

    for tk in sorted(tk_opts, reverse=True):
        fitting = [tm for tm in sorted(tm_opts, reverse=True)
                   if footprint(tm, tk) <= caps["vmem_budget"]]
        if not fitting:
            continue
        if caps["prefer_even_rows"]:
            even = [tm for tm in fitting if (n_pad // tm) % 2 == 0]
            if even:
                return even[0], tk
        return fitting[0], tk
    return 128, 128


def _make_kernel(threshold, tk, rhs_resident):
    align = tk & (-tk)  # largest power-of-two divisor of tk (sublane alignment hint)

    def kernel(entail_ref, contra_ref, onehot_ref, anti_ref, votes_ref):
        k = pl.program_id(1)

        @pl.when(k == 0)
        def _init():
            votes_ref[...] = jnp.zeros_like(votes_ref)

        # Threshold gate natively in the edge dtype (bf16 fast path on v6e/v7x;
        # note: the threshold is rounded to bf16, shifting the strict-> gate by
        # at most one bf16 ulp relative to the f32 reference).
        e = entail_ref[...]
        c = contra_ref[...]
        thr = jnp.asarray(threshold, dtype=e.dtype)
        e_m = jnp.where(e > thr, e, jnp.zeros_like(e))
        c_m = jnp.where(c > thr, c, jnp.zeros_like(c))

        if rhs_resident:
            off = pl.multiple_of(k * tk, align)
            oh = onehot_ref[pl.ds(off, tk), :]
            an = anti_ref[pl.ds(off, tk), :]
        else:
            oh = onehot_ref[...]
            an = anti_ref[...]

        # Both vote terms on the MXU:
        #   entail edge (i,j):  +e_ij to label(j)             -> e_m @ onehot
        #   contra edge (i,j):  +c_ij to labels != label(j)   -> c_m @ (mask - onehot)
        votes_ref[...] += (
            jnp.dot(e_m, oh, preferred_element_type=jnp.float32)
            + jnp.dot(c_m, an, preferred_element_type=jnp.float32))

    return kernel


def consistency_infer(entail, contra, onehot, labeled_mask, threshold):
    """entail/contra: [N, N] edge scores; onehot: [N, C] seed one-hot labels
    (zero rows for unlabeled nodes); labeled_mask: [N] or [N, 1].
    Returns (final_labels [N] int32, votes [N, C] f32)."""
    N, C = onehot.shape
    assert C <= C_PAD
    labeled_mask = labeled_mask.reshape(N).astype(jnp.float32)

    N_pad = _round_up(N, 128)
    caps = _tpu_caps()
    # Keep the onehot/anti RHS resident in VMEM unless the graph is enormous.
    rhs_resident = (2 * 2 * N_pad * C_PAD * 2) <= caps["vmem_budget"] // 4
    TM, TK = _pick_tiles(N_pad, caps, rhs_resident)

    # Single fused prep pass per edge matrix: pad to the tile grid, zero the
    # diagonal (self-edges), cast to bf16 (halves kernel-side HBM traffic).
    # NOTE(review): if the producer can emit bf16, pre-padded, diagonal-free
    # edges directly, this pre-pass can be dropped entirely.
    def prep_edges(x):
        xp = jnp.pad(x, ((0, N_pad - N), (0, N_pad - N)))
        r = lax.broadcasted_iota(jnp.int32, (N_pad, N_pad), 0)
        col = lax.broadcasted_iota(jnp.int32, (N_pad, N_pad), 1)
        return jnp.where(r == col, jnp.zeros((), xp.dtype), xp).astype(jnp.bfloat16)

    entail_p = prep_edges(entail)
    contra_p = prep_edges(contra)

    onehot_f = onehot.astype(jnp.float32)
    onehot_p = jnp.pad(onehot_f, ((0, N_pad - N), (0, C_PAD - C))).astype(jnp.bfloat16)
    anti = labeled_mask[:, None] - onehot_f          # 1 for labels != label(j), 0 if unlabeled
    anti_p = jnp.pad(anti, ((0, N_pad - N), (0, C_PAD - C))).astype(jnp.bfloat16)

    kernel = _make_kernel(float(threshold), TK, rhs_resident)

    if rhs_resident:
        rhs_spec = pl.BlockSpec((N_pad, C_PAD), lambda i, k: (0, 0))
    else:
        rhs_spec = pl.BlockSpec((TK, C_PAD), lambda i, k: (k, 0))

    grid = (N_pad // TM, N_pad // TK)
    votes_p = pl.pallas_call(
        kernel,
        out_shape=jax.ShapeDtypeStruct((N_pad, C_PAD), jnp.float32),
        grid=grid,
        in_specs=[
            pl.BlockSpec((TM, TK), lambda i, k: (i, k)),   # entail tile
            pl.BlockSpec((TM, TK), lambda i, k: (i, k)),   # contra tile
            rhs_spec,                                      # one-hot seed labels
            rhs_spec,                                      # anti = mask - onehot
        ],
        out_specs=pl.BlockSpec((TM, C_PAD), lambda i, k: (i, 0)),
        compiler_params=pltpu.CompilerParams(
            dimension_semantics=("parallel", "arbitrary"),
            vmem_limit_bytes=caps["vmem_budget"],
        ),
    )(entail_p, contra_p, onehot_p, anti_p)

    votes = votes_p[:N, :C]

    # Glue: per-node label (keep seed label for already-labeled nodes, -1 for
    # nodes with no above-threshold labeled neighbors).
    pred = jnp.argmax(votes, axis=-1).astype(jnp.int32)
    has_votes = jnp.max(votes, axis=-1) > 0.0
    seed = jnp.argmax(onehot, axis=-1).astype(jnp.int32)
    is_labeled = labeled_mask > 0.5
    final = jnp.where(is_labeled, seed, jnp.where(has_votes, pred, -1))
    return final, votes


if __name__ == "__main__":
    N = 300   # number of graph nodes (pads to 384)
    C = 8     # number of candidate labels
    threshold = 0.6

    key = jax.random.PRNGKey(0)
    k_e, k_c, k_l, k_m = jax.random.split(key, 4)

    # Dense edge scores in [0, 1); no self edges (wrapper also zeroes the diagonal).
    entail = jax.random.uniform(k_e, (N, N), dtype=jnp.float32)
    contra = jax.random.uniform(k_c, (N, N), dtype=jnp.float32)
    eye = jnp.eye(N, dtype=jnp.float32)
    entail = entail * (1.0 - eye)
    contra = contra * (1.0 - eye)

    # Seed labels for roughly half the nodes (the node_labels dict in the torch API).
    seed_labels = jax.random.randint(k_l, (N,), 0, C, dtype=jnp.int32)
    labeled_mask = (jax.random.uniform(k_m, (N,)) > 0.5).astype(jnp.float32)[:, None]
    onehot = jax.nn.one_hot(seed_labels, C, dtype=jnp.float32) * labeled_mask

    final, votes = consistency_infer(entail, contra, onehot, labeled_mask, threshold)
    jax.block_until_ready((final, votes))

    # Package as the Dict[str, int] the torch forward signature promises.
    node_label_out = {f"n{i}": int(final[i]) for i in range(N)}
    assert len(node_label_out) == N
    assert votes.shape == (N, C)

    print("KERNEL_OK")
</pallas_src>

<mosaic_0001>
module attributes {stable_mosaic.version = 11 : i64} {
  func.func @kernel(%arg0: i32, %arg1: i32, %arg2: memref<384x384xbf16, #tpu.memory_space<vmem>>, %arg3: memref<384x384xbf16, #tpu.memory_space<vmem>>, %arg4: memref<384x128xbf16, #tpu.memory_space<vmem>>, %arg5: memref<384x128xbf16, #tpu.memory_space<vmem>>, %arg6: memref<384x128xf32, #tpu.memory_space<vmem>>) attributes {dimension_semantics = [#tpu.dimension_semantics<parallel>, #tpu.dimension_semantics<arbitrary>], iteration_bounds = array<i64: 1, 1>, scalar_prefetch = 0 : i64, scratch_operands = 0 : i64, tpu.core_type = #tpu.core_type<tc>, window_params = [{transform_indices = @transform_0, window_bounds = array<i64: 384, 384>}, {transform_indices = @transform_1, window_bounds = array<i64: 384, 384>}, {pipeline_mode = #tpu.pipeline_mode<synchronous>, transform_indices = @transform_2, window_bounds = array<i64: 384, 128>}, {pipeline_mode = #tpu.pipeline_mode<synchronous>, transform_indices = @transform_3, window_bounds = array<i64: 384, 128>}, {transform_indices = @transform_4, window_bounds = array<i64: 384, 128>}]} {
    %c0_i32 = arith.constant 0 : i32
    %0 = arith.cmpi eq, %arg1, %c0_i32 : i32
    %1 = arith.extui %0 : i1 to i32
    %c0_i32_0 = arith.constant 0 : i32
    %2 = arith.cmpi ne, %1, %c0_i32_0 : i32
    scf.if %2 {
      %cst_15 = arith.constant 0.000000e+00 : f32
      %25 = vector.broadcast %cst_15 : f32 to vector<384x128xf32>
      %c0_16 = arith.constant 0 : index
      %c0_17 = arith.constant 0 : index
      %26 = vector.load %arg6[%c0_16, %c0_17] : memref<384x128xf32, #tpu.memory_space<vmem>>, vector<384x128xf32>
      tpu.vector_store %arg6[%c0_16, %c0_17], %25 {strides = array<i32>} : memref<384x128xf32, #tpu.memory_space<vmem>>, vector<384x128xf32>,
    } else {
    }
    %c0 = arith.constant 0 : index
    %c0_1 = arith.constant 0 : index
    %3 = vector.load %arg2[%c0, %c0_1] : memref<384x384xbf16, #tpu.memory_space<vmem>>, vector<384x384xbf16>
    %c0_2 = arith.constant 0 : index
    %c0_3 = arith.constant 0 : index
    %4 = vector.load %arg3[%c0_2, %c0_3] : memref<384x384xbf16, #tpu.memory_space<vmem>>, vector<384x384xbf16>
    %cst = arith.constant 6.015630e-01 : bf16
    %5 = vector.broadcast %cst : bf16 to vector<384x384xbf16>
    %6 = arith.cmpf ogt, %3, %5 : vector<384x384xbf16>
    %cst_4 = arith.constant 0.000000e+00 : bf16
    %7 = vector.broadcast %cst_4 : bf16 to vector<384x384xbf16>
    %8 = arith.select %6, %3, %7 : vector<384x384xi1>, vector<384x384xbf16>
    %cst_5 = arith.constant 6.015630e-01 : bf16
    %9 = vector.broadcast %cst_5 : bf16 to vector<384x384xbf16>
    %10 = arith.cmpf ogt, %4, %9 : vector<384x384xbf16>
    %cst_6 = arith.constant 0.000000e+00 : bf16
    %11 = vector.broadcast %cst_6 : bf16 to vector<384x384xbf16>
    %12 = arith.select %10, %4, %11 : vector<384x384xi1>, vector<384x384xbf16>
    %c384_i32 = arith.constant 384 : i32
    %13 = arith.muli %arg1, %c384_i32 : i32
    %14 = tpu.assume_multiple %13, 128 : i32
    %15 = arith.index_cast %14 : i32 to index
    %c0_7 = arith.constant 0 : index
    %16 = vector.load %arg4[%15, %c0_7] : memref<384x128xbf16, #tpu.memory_space<vmem>>, vector<384x128xbf16>
    %17 = arith.index_cast %14 : i32 to index
    %c0_8 = arith.constant 0 : index
    %18 = vector.load %arg5[%17, %c0_8] : memref<384x128xbf16, #tpu.memory_space<vmem>>, vector<384x128xbf16>
    %c0_9 = arith.constant 0 : index
    %c0_10 = arith.constant 0 : index
    %19 = vector.load %arg6[%c0_9, %c0_10] : memref<384x128xf32, #tpu.memory_space<vmem>>, vector<384x128xf32>
    %cst_11 = arith.constant dense<0.000000e+00> : vector<384x128xf32>
    %20 = tpu.matmul %8, %16, %cst_11 {dimension_numbers = #tpu.dot_dimension_numbers<[1], [0], [0], [1], [0, 0, 1, 1], [], []>} : vector<384x384xbf16>, vector<384x128xbf16>, vector<384x128xf32> -> vector<384x128xf32>
    %cst_12 = arith.constant dense<0.000000e+00> : vector<384x128xf32>
    %21 = tpu.matmul %12, %18, %cst_12 {dimension_numbers = #tpu.dot_dimension_numbers<[1], [0], [0], [1], [0, 0, 1, 1], [], []>} : vector<384x384xbf16>, vector<384x128xbf16>, vector<384x128xf32> -> vector<384x128xf32>
    %22 = arith.addf %20, %21 : vector<384x128xf32>
    %23 = arith.addf %19, %22 : vector<384x128xf32>
    %c0_13 = arith.constant 0 : index
    %c0_14 = arith.constant 0 : index
    %24 = vector.load %arg6[%c0_13, %c0_14] : memref<384x128xf32, #tpu.memory_space<vmem>>, vector<384x128xf32>
    tpu.vector_store %arg6[%c0_13, %c0_14], %23 {strides = array<i32>} : memref<384x128xf32, #tpu.memory_space<vmem>>, vector<384x128xf32>,
    return
  }
  func.func @transform_0(%arg0: i32, %arg1: i32) -> (i32, i32) {
    %c0_i32 = arith.constant 0 : i32
    return %arg0, %arg1 : i32, i32
  }
  func.func @transform_1(%arg0: i32, %arg1: i32) -> (i32, i32) {
    %c0_i32 = arith.constant 0 : i32
    return %arg0, %arg1 : i32, i32
  }
  func.func @transform_2(%arg0: i32, %arg1: i32) -> (i32, i32) {
    %c0_i32 = arith.constant 0 : i32
    %c0_i32_0 = arith.constant 0 : i32
    %c0_i32_1 = arith.constant 0 : i32
    return %c0_i32, %c0_i32_0 : i32, i32
  }
  func.func @transform_3(%arg0: i32, %arg1: i32) -> (i32, i32) {
    %c0_i32 = arith.constant 0 : i32
    %c0_i32_0 = arith.constant 0 : i32
    %c0_i32_1 = arith.constant 0 : i32
    return %c0_i32, %c0_i32_0 : i32, i32
  }
  func.func @transform_4(%arg0: i32, %arg1: i32) -> (i32, i32) {
    %c0_i32 = arith.constant 0 : i32
    %c0_i32_0 = arith.constant 0 : i32
    return %arg0, %c0_i32 : i32, i32
  }
}

</mosaic_0001>

<bundles_post_ra>
// kernel: tpu_custom_call.1
= control target key start
LH: loop header
LB: loop body
LE: loop exit
PB: predicated region body
PF: predicated region fallthrough
CT: control target
= control target key end

     0   :  { %9 = vsyncpa [#allocation3], 0  ;;  %s5961_s0 = inlined_call_operand.hbm [shape: bf16[384,384], index: 0, kind: input, shape index: {}]   ;;  %s5962_s1 = inlined_call_operand.hbm [shape: bf16[384,384], index: 1, kind: input, shape index: {}]   ;;  %s5963_s2 = inlined_call_operand.hbm [shape: bf16[384,128], index: 2, kind: input, shape index: {}]   ;;  %s5964_s3 = inlined_call_operand.hbm [shape: bf16[384,128], index: 3, kind: input, shape index: {}]   ;;  %s5965_s4 = inlined_call_operand.hbm [shape: f32[384,128], index: 4, kind: output, shape index: {}]  }
   0x1   :  { %10 = vsyncpa [#allocation6], 0 }
   0x2   :  { %11 = vsyncpa [#allocation9], 0 }
   0x3   :  { %12 = vsyncpa [#allocation4], 0  ;;  %s30_s17 = sshll.u32 %s5962_s1, 4  ;;  %s3784_s18 = smov [#allocation5]   ;;  %s31_s17 = int_to_ptr.hbm [resolvable:$true] %s30_s17 }
   0x4   :  { %s32_s19 = sshll.u32 %s3784_s18, 4  ;;  %s17_s22 = sshll.u32 %s5961_s0, 4  ;;  %s33_s19 = int_to_ptr.vmem [resolvable:$true] %s32_s19  ;;  %s18_s22 = int_to_ptr.hbm [resolvable:$true] %s17_s22 }
   0x5   :  { %s3785_s23 = smov 192   ;;  %s3786_s24 = smov 12  }
   0x6   :  { %38 = dma.hbm_to_vmem [thread:$0]  %s31_s17, 9216, %s33_s19, [#allocation6], %s3785_s23, %s3785_s23, %s3786_s24  }
   0x7   :  { %s3787_s25 = smov [#allocation2]   ;;  %s43_s29 = sshll.u32 %s5963_s2, 4  ;;  %s44_s29 = int_to_ptr.hbm [resolvable:$true] %s43_s29 }
   0x8   :  { %s19_s26 = sshll.u32 %s3787_s25, 4  ;;  %s3788_s1 = smov [#allocation7]   ;;  %s20_s26 = int_to_ptr.vmem [resolvable:$true] %s19_s26 }
   0x9   :  { %25 = dma.hbm_to_vmem [thread:$0]  %s18_s22, 9216, %s20_s26, [#allocation3], %s3785_s23, %s3785_s23, %s3786_s24  }
   0xa   :  { %s45_s30 = sshll.u32 %s3788_s1, 4  ;;  %s56_s0 = sshll.u32 %s5964_s3, 4  ;;  %s46_s30 = int_to_ptr.vmem [resolvable:$true] %s45_s30  ;;  %s57_s0 = int_to_ptr.hbm [resolvable:$true] %s56_s0 }
   0xb   :  { %s3789_s7 = smov 64   ;;  %s3790_s8 = smov 4  }
   0xc   :  { %51 = dma.hbm_to_vmem [thread:$0]  %s44_s29, 3072, %s46_s30, [#allocation6], %s3789_s7, %s3789_s7, %s3790_s8  }
   0xd   :  { %s3791_s9 = smov [#allocation8]  }
   0xe   :  { %s58_s10 = sshll.u32 %s3791_s9, 4  ;;  %s59_s10 = int_to_ptr.vmem [resolvable:$true] %s58_s10 }
   0xf   :  { %64 = dma.hbm_to_vmem [thread:$0]  %s57_s0, 3072, %s59_s10, [#allocation9], %s3789_s7, %s3789_s7, %s3790_s8  }
  0x10   :  { %3776 = dma.done.wait [#allocation3], 9216  }
  0x11   :  { %3777 = vsyncadd [#allocation3], 4294958080 }
  0x12   :  { %3778 = dma.done.wait [#allocation6], 12288  }
  0x13   :  { %3779 = vsyncadd [#allocation6], 4294955008 }
  0x14   :  { %3780 = dma.done.wait [#allocation9], 3072  }
  0x15   :  { %3781 = vsyncadd [#allocation9], 4294964224  ;;  %v3611_v0 = vld [vmem:[#allocation8 + $0x38] sm:$0xff]  ;;  %v3610_v2 = vld [vmem:[#allocation8 + $0x30] sm:$0xff]  ;;  %s3792_s2 = smov [#allocation10]   ;;  %s3369_s13 = sshll.u32 %s5965_s4, 4  ;;  %s3370_s13 = int_to_ptr.hbm [resolvable:$true] %s3369_s13 }
  0x16   :  { %v3619_v1 = vld [vmem:[#allocation8 + $0x78] sm:$0xff]  ;;  %3628 = vmatpush.bf16.msra.mxu2 %v3611_v0  ;;  %v3618_v3 = vld [vmem:[#allocation8 + $0x70] sm:$0xff]  ;;  %1965 = vmatpush.bf16.msra.mxu0 %v3611_v0  ;;  %v3609_v4 = vld [vmem:[#allocation8 + $0x28] sm:$0xff]  ;;  %s3367_s3 = sshll.u32 %s3792_s2, 4  ;;  %s3793_s14 = smov 128   ;;  %s3368_s3 = int_to_ptr.vmem [resolvable:$true] %s3367_s3 }
  0x17   :  { %3636 = vmatpush.bf16.msra.mxu3 %v3619_v1  ;;  %2094 = vmatpush.bf16.msra.mxu1 %v3619_v1  ;;  %v3617_v5 = vld [vmem:[#allocation8 + $0x68] sm:$0xff]  ;;  %v278_v6 = vld [vmem:[#allocation5 + $0x120] sm:$0xff]  ;;  %v3607_v20 = vld [vmem:[#allocation8 + $0x18] sm:$0xff]  ;;  %s3794_s15 = smov 8  }
  0x18   :  { %v280_v7 = vld [vmem:[#allocation5 + $0x12c] sm:$0xff]  ;;  %v230_v8 = vld [vmem:[#allocation5] sm:$0xff]  ;;  %v878_v11 = vunpack.c.l.bf16 %v278_v6  ;;  %v879_v12 = vunpack.c.h.bf16 %v278_v6  ;;  %v3615_v21 = vld [vmem:[#allocation8 + $0x58] sm:$0xff] }
  0x19   :  { %v3608_v9 = vld [vmem:[#allocation8 + $0x20] sm:$0xff]  ;;  %v232_v13 = vld [vmem:[#allocation5 + $0xc] sm:$0xff]  ;;  %v881_v14 = vunpack.c.l.bf16 %v280_v7  ;;  %v882_v15 = vunpack.c.h.bf16 %v280_v7  ;;  %v806_v16 = vunpack.c.l.bf16 %v230_v8  ;;  %v807_v17 = vunpack.c.h.bf16 %v230_v8  ;;  %v3880_v32 = vld [vmem:[#allocation5 + $0x138] sm:$0xff] }
  0x1a   :  { %3629 = vmatpush.bf16.msra.mxu2 %v3610_v2  ;;  %1966 = vmatpush.bf16.msra.mxu0 %v3610_v2  ;;  %v3616_v10 = vld [vmem:[#allocation8 + $0x60] sm:$0xff]  ;;  %v809_v18 = vunpack.c.l.bf16 %v232_v13  ;;  %v810_v19 = vunpack.c.h.bf16 %v232_v13  ;;  %vm3832_vm0 = vcmp.gt.f32.partialorder %v878_v11, 0.6015625  ;;  %vm3836_vm1 = vcmp.gt.f32.partialorder %v879_v12, 0.6015625  ;;  %v3606_v30 = vld [vmem:[#allocation8 + $0x10] sm:$0xff]  ;;  %v3605_v33 = vld [vmem:[#allocation8 + $0x8] sm:$0xff] }
  0x1b   :  { %3637 = vmatpush.bf16.msra.mxu3 %v3618_v3  ;;  %2095 = vmatpush.bf16.msra.mxu1 %v3618_v3  ;;  %vm3840_vm2 = vcmp.gt.f32.partialorder %v881_v14, 0.6015625  ;;  %vm3844_vm3 = vcmp.gt.f32.partialorder %v882_v15, 0.6015625  ;;  %vm3848_vm4 = vcmp.gt.f32.partialorder %v806_v16, 0.6015625  ;;  %vm3852_vm5 = vcmp.gt.f32.partialorder %v807_v17, 0.6015625  ;;  %vm1142_vm6 = vmpackc.low %vm3836_vm1, %vm3832_vm0  ;;  %v3614_v31 = vld [vmem:[#allocation8 + $0x50] sm:$0xff]  ;;  %v3613_v34 = vld [vmem:[#allocation8 + $0x48] sm:$0xff] }
  0x1c   :  { %vm3860_vm7 = vcmp.gt.f32.partialorder %v809_v18, 0.6015625  ;;  %vm3864_vm8 = vcmp.gt.f32.partialorder %v810_v19, 0.6015625  ;;  %vm1144_vm9 = vmpackc.low %vm3844_vm3, %vm3840_vm2  ;;  %v1238_v35 = vsel %vm1142_vm6, %v278_v6, 0  ;;  %v3887_v39 = vld [vmem:[#allocation5 + $0x144] sm:$0xff]  ;;  %v884_v40 = vunpack.c.l.bf16 %v3880_v32  ;;  %v234_v46 = vld [vmem:[#allocation5 + $0x18] sm:$0xff] }
  0x1d   :  { %vm1094_vm10 = vmpackc.low %vm3852_vm5, %vm3848_vm4  ;;  %v1240_v36 = vsel %vm1144_vm9, %v280_v7, 0  ;;  %v885_v41 = vunpack.c.h.bf16 %v3880_v32  ;;  %v1605_v42 = vunpack.c.l.b16 %v1238_v35  ;;  %v1606_v44 = vunpack.c.h.b16 %v1238_v35  ;;  %v3604_v47 = vld [vmem:[#allocation8] sm:$0xff]  ;;  %v3627_v56 = vld [vmem:[#allocation8 + $0xb8] sm:$0xff] }
  0x1e   :  { %3630 = vmatpush.bf16.msra.mxu2 %v3609_v4  ;;  %1967 = vmatpush.bf16.msra.mxu0 %v3609_v4  ;;  %vm1096_vm11 = vmpackc.low %vm3864_vm8, %vm3860_vm7  ;;  %v1190_v37 = vsel %vm1094_vm10, %v230_v8, 0  ;;  %v1608_v43 = vunpack.c.l.b16 %v1240_v36  ;;  %v1609_v45 = vunpack.c.h.b16 %v1240_v36  ;;  %v3612_v48 = vld [vmem:[#allocation8 + $0x40] sm:$0xff]  ;;  %v887_v54 = vunpack.c.l.bf16 %v3887_v39  ;;  %v3587_v57 = vld [vmem:[#allocation7 + $0x38] sm:$0xff] }
  0x1f   :  { %3638 = vmatpush.bf16.msra.mxu3 %v3617_v5  ;;  %2096 = vmatpush.bf16.msra.mxu1 %v3617_v5  ;;  %v1192_v38 = vsel %vm1096_vm11, %v232_v13, 0  ;;  %v1533_v49 = vunpack.c.l.b16 %v1190_v37  ;;  %v1534_v51 = vunpack.c.h.b16 %v1190_v37  ;;  %v236_v53 = vld [vmem:[#allocation5 + $0x24] sm:$0xff]  ;;  %v888_v55 = vunpack.c.h.bf16 %v3887_v39  ;;  %v3595_v4 = vld [vmem:[#allocation7 + $0x78] sm:$0xff]  ;;  %v3586_v11 = vld [vmem:[#allocation7 + $0x30] sm:$0xff] }
  0x20   :  { %v1536_v50 = vunpack.c.l.b16 %v1192_v38  ;;  %v1537_v52 = vunpack.c.h.b16 %v1192_v38  ;;  %v812_v58 = vunpack.c.l.bf16 %v234_v46  ;;  %v813_v59 = vunpack.c.h.bf16 %v234_v46  ;;  %v3603_v5 = vld [vmem:[#allocation7 + $0xb8] sm:$0xff]  ;;  %v3594_v14 = vld [vmem:[#allocation7 + $0x70] sm:$0xff] }
  0x21   :  { %v1713_v60 = vpack.c.b16 %v1608_v43, %v1605_v42  ;;  %v1714_v61 = vpack.c.b16 %v1609_v45, %v1606_v44  ;;  %v815_v62 = vunpack.c.l.bf16 %v236_v53  ;;  %v816_v63 = vunpack.c.h.bf16 %v236_v53  ;;  %v3602_v15 = vld [vmem:[#allocation7 + $0xb0] sm:$0xff]  ;;  %v288_v19 = vld [vmem:[#allocation5 + $0x15c] sm:$0xff] }
  0x22   :  { %3631 = vmatpush.bf16.msra.mxu2 %v3608_v9  ;;  %1968 = vmatpush.bf16.msra.mxu0 %v3608_v9  ;;  %v1677_v0 = vpack.c.b16 %v1536_v50, %v1533_v49  ;;  %v1678_v1 = vpack.c.b16 %v1537_v52, %v1534_v51  ;;  %vm3893_vm12 = vcmp.gt.f32.partialorder %v884_v40, 0.6015625  ;;  %vm3897_vm13 = vcmp.gt.f32.partialorder %v885_v41, 0.6015625  ;;  %v286_v18 = vld [vmem:[#allocation5 + $0x150] sm:$0xff]  ;;  %v240_v35 = vld [vmem:[#allocation5 + $0x3c] sm:$0xff]  ;;  %v3625_v52 = vld [vmem:[#allocation8 + $0xa8] sm:$0xff] }
  0x23   :  { %3639 = vmatpush.bf16.msra.mxu3 %v3616_v10  ;;  %2097 = vmatpush.bf16.msra.mxu1 %v3616_v10  ;;  %vm3901_vm14 = vcmp.gt.f32.partialorder %v887_v54, 0.6015625  ;;  %vm3905_vm15 = vcmp.gt.f32.partialorder %v888_v55, 0.6015625  ;;  %vm3909_vm0 = vcmp.gt.f32.partialorder %v812_v58, 0.6015625  ;;  %vm3913_vm1 = vcmp.gt.f32.partialorder %v813_v59, 0.6015625  ;;  %v3626_v10 = vld [vmem:[#allocation8 + $0xb0] sm:$0xff]  ;;  %vm1146_vm2 = vmpackc.low %vm3897_vm13, %vm3893_vm12  ;;  %v3593_v54 = vld [vmem:[#allocation7 + $0x68] sm:$0xff] }
  0x24   :  { %vm3921_vm3 = vcmp.gt.f32.partialorder %v815_v62, 0.6015625  ;;  %vm3925_vm4 = vcmp.gt.f32.partialorder %v816_v63, 0.6015625  ;;  %vm1148_vm5 = vmpackc.low %vm3905_vm15, %vm3901_vm14  ;;  %v1242_v16 = vsel %vm1146_vm2, %v3880_v32, 0  ;;  %v890_v26 = vunpack.c.l.bf16 %v286_v18  ;;  %v3601_v55 = vld [vmem:[#allocation7 + $0xa8] sm:$0xff]  ;;  %v292_v63 = vld [vmem:[#allocation5 + $0x174] sm:$0xff] }
  0x25   :  { %vm1098_vm6 = vmpackc.low %vm3913_vm1, %vm3909_vm0  ;;  %v1244_v17 = vsel %vm1148_vm5, %v3887_v39, 0  ;;  %v1611_v22 = vunpack.c.l.b16 %v1242_v16  ;;  %v1612_v24 = vunpack.c.h.b16 %v1242_v16  ;;  %v891_v27 = vunpack.c.h.bf16 %v286_v18  ;;  %v244_v9 = vld [vmem:[#allocation5 + $0x54] sm:$0xff]  ;;  %v246_v40 = vld [vmem:[#allocation5 + $0x60] sm:$0xff] }
  0x26   :  { %3632 = vmatpush.bf16.msra.mxu2 %v3607_v20  ;;  %1969 = vmatpush.bf16.msra.mxu0 %v3607_v20  ;;  %vm1100_vm7 = vmpackc.low %vm3925_vm4, %vm3921_vm3  ;;  %v1194_v20 = vsel %vm1098_vm6, %v234_v46, 0  ;;  %v1614_v23 = vunpack.c.l.b16 %v1244_v17  ;;  %v1615_v25 = vunpack.c.h.b16 %v1244_v17  ;;  %v893_v28 = vunpack.c.l.bf16 %v288_v19 }
  0x27   :  { %3640 = vmatpush.bf16.msra.mxu3 %v3615_v21  ;;  %2098 = vmatpush.bf16.msra.mxu1 %v3615_v21  ;;  %v1196_v21 = vsel %vm1100_vm7, %v236_v53, 0  ;;  %v894_v29 = vunpack.c.h.bf16 %v288_v19  ;;  %v1540_v32 = vunpack.c.h.b16 %v1194_v20  ;;  %vm3943_vm8 = vcmp.gt.f32.partialorder %v890_v26, 0.6015625  ;;  %v3585_v53 = vld [vmem:[#allocation7 + $0x28] sm:$0xff]  ;;  %v3624_v26 = vld [vmem:[#allocation8 + $0xa0] sm:$0xff] }
  0x28   :  { %v1716_v36 = vpack.c.b16 %v1614_v23, %v1611_v22  ;;  %v1717_v37 = vpack.c.b16 %v1615_v25, %v1612_v24  ;;  %vm3947_vm9 = vcmp.gt.f32.partialorder %v891_v27, 0.6015625  ;;  %v821_v42 = vunpack.c.l.bf16 %v240_v35  ;;  %v3584_v27 = vld [vmem:[#allocation7 + $0x20] sm:$0xff]  ;;  %v258_v25 = vld [vmem:[#allocation5 + $0xa8] sm:$0xff] }
  0x29   :  { %v822_v43 = vunpack.c.h.bf16 %v240_v35  ;;  %vm3951_vm10 = vcmp.gt.f32.partialorder %v893_v28, 0.6015625  ;;  %vm3955_vm11 = vcmp.gt.f32.partialorder %v894_v29, 0.6015625  ;;  %vm1150_vm12 = vmpackc.low %vm3947_vm9, %vm3943_vm8  ;;  %v827_v16 = vunpack.c.l.bf16 %v244_v9 }
  0x2a   :  { %3633 = vmatpush.bf16.msra.mxu2 %v3606_v30  ;;  %1970 = vmatpush.bf16.msra.mxu0 %v3606_v30  ;;  %v238_v30 = vld [vmem:[#allocation5 + $0x30] sm:$0xff]  ;;  %vm1152_vm15 = vmpackc.low %vm3955_vm11, %vm3951_vm10  ;;  %vm3975_vm0 = vcmp.gt.f32.partialorder %v821_v42, 0.6015625  ;;  %v828_v17 = vunpack.c.h.bf16 %v244_v9  ;;  %v831_v49 = vunpack.c.h.bf16 %v246_v40 }
  0x2b   :  { %3641 = vmatpush.bf16.msra.mxu3 %v3614_v31  ;;  %2099 = vmatpush.bf16.msra.mxu1 %v3614_v31  ;;  %v1539_v31 = vunpack.c.l.b16 %v1194_v20  ;;  %v818_v38 = vunpack.c.l.bf16 %v238_v30  ;;  %v819_v39 = vunpack.c.h.bf16 %v238_v30  ;;  %vm3979_vm1 = vcmp.gt.f32.partialorder %v822_v43, 0.6015625  ;;  %v252_v20 = vld [vmem:[#allocation5 + $0x84] sm:$0xff] }
  0x2c   :  { %vm1104_vm3 = vmpackc.low %vm3979_vm1, %vm3975_vm0  ;;  %vm971_vm11 = vcmp.gt.f32.partialorder %v827_v16, 0.6015625 }
  0x2d   :  { %vm3963_vm13 = vcmp.gt.f32.partialorder %v818_v38, 0.6015625  ;;  %vm3967_vm14 = vcmp.gt.f32.partialorder %v819_v39, 0.6015625  ;;  %v1200_v59 = vsel %vm1104_vm3, %v240_v35, 0  ;;  %v296_v35 = vld [vmem:[#allocation5 + $0x18c] sm:$0xff] }
  0x2e   :  { %3634 = vmatpush.bf16.msra.mxu2 %v3605_v33  ;;  %1971 = vmatpush.bf16.msra.mxu0 %v3605_v33  ;;  %v1542_v33 = vunpack.c.l.b16 %v1196_v21  ;;  %vm1102_vm2 = vmpackc.low %vm3967_vm14, %vm3963_vm13  ;;  %v1549_v6 = vunpack.c.h.b16 %v1200_v59  ;;  %v905_v46 = vunpack.c.l.bf16 %v296_v35 }
  0x2f   :  { %3642 = vmatpush.bf16.msra.mxu3 %v3613_v34  ;;  %2100 = vmatpush.bf16.msra.mxu1 %v3613_v34  ;;  %v1543_v34 = vunpack.c.h.b16 %v1196_v21  ;;  %v1198_v58 = vsel %vm1102_vm2, %v238_v30, 0 }
  0x30   :  { %v1680_v44 = vpack.c.b16 %v1542_v33, %v1539_v31  ;;  %v1545_v2 = vunpack.c.l.b16 %v1198_v58  ;;  %v1546_v3 = vunpack.c.h.b16 %v1198_v58  ;;  %v294_v33 = vld [vmem:[#allocation5 + $0x180] sm:$0xff]  ;;  %vm4040_vm2 = vcmp.gt.f32.partialorder %v905_v46, 0.6015625 }
  0x31   :  { %v1681_v45 = vpack.c.b16 %v1543_v34, %v1540_v32  ;;  %v902_v43 = vunpack.c.l.bf16 %v294_v33  ;;  %v256_v58 = vld [vmem:[#allocation5 + $0x9c] sm:$0xff] }
  0x32   :  { %3635 = vmatpush.bf16.msra.mxu2 %v3604_v47  ;;  %1972 = vmatpush.bf16.msra.mxu0 %v3604_v47  ;;  %v906_v47 = vunpack.c.h.bf16 %v296_v35 }
  0x33   :  { %3643 = vmatpush.bf16.msra.mxu3 %v3612_v48  ;;  %2101 = vmatpush.bf16.msra.mxu1 %v3612_v48  ;;  %v830_v48 = vunpack.c.l.bf16 %v246_v40  ;;  %vm4032_vm0 = vcmp.gt.f32.partialorder %v902_v43, 0.6015625 }
  0x34   :  { %vm4044_vm3 = vcmp.gt.f32.partialorder %v906_v47, 0.6015625 }
  0x35   :  { %2033 = vmatmul.bf16.vlgmr.msra.gmra.mxu2 %v1713_v60  ;;  %1973 = vmatmul.bf16.vlgmr.msra.gmra.mxu0 %v1677_v0  ;;  %v290_v60 = vld [vmem:[#allocation5 + $0x168] sm:$0xff] }
  0x36   :  { %2223 = vmatpush.bf16.msrb.mxu2 %v3627_v56  ;;  %2162 = vmatmul.bf16.vlgmr.msra.gmra.mxu3 %v1714_v61  ;;  %v1246_v56 = vsel %vm1150_vm12, %v286_v18, 0  ;;  %v896_v7 = vunpack.c.l.bf16 %v290_v60  ;;  %v897_v8 = vunpack.c.h.bf16 %v290_v60  ;;  %vm972_vm12 = vcmp.gt.f32.partialorder %v828_v17, 0.6015625 }
  0x37   :  { %2880 = vmatpush.bf16.msrb.mxu3 %v3587_v57  ;;  %2102 = vmatmul.bf16.vlgmr.msra.gmra.mxu1 %v1678_v1  ;;  %v1248_v57 = vsel %vm1152_vm15, %v288_v19, 0  ;;  %v1617_v61 = vunpack.c.l.b16 %v1246_v56  ;;  %v1618_v0 = vunpack.c.h.b16 %v1246_v56  ;;  %v1684_v19 = vpack.c.b16 %v1549_v6, %v1546_v3  ;;  %vm1108_vm15 = vmpackc.low %vm972_vm12, %vm971_vm11  ;;  %v300_v6 = vld [vmem:[#allocation5 + $0x1a4] sm:$0xff] }
  0x38   :  { %3009 = vmatpush.bf16.msrb.mxu0 %v3595_v4  ;;  %3138 = vmatpush.bf16.msrb.mxu1 %v3603_v5  ;;  %v1620_v62 = vunpack.c.l.b16 %v1248_v57  ;;  %v1621_v1 = vunpack.c.h.b16 %v1248_v57  ;;  %v242_v4 = vld [vmem:[#allocation5 + $0x48] sm:$0xff]  ;;  %v1548_v5 = vunpack.c.l.b16 %v1200_v59  ;;  %vm3996_vm4 = vcmp.gt.f32.partialorder %v896_v7, 0.6015625 }
  0x39   :  { %v824_v12 = vunpack.c.l.bf16 %v242_v4  ;;  %v825_v13 = vunpack.c.h.bf16 %v242_v4  ;;  %vm4000_vm5 = vcmp.gt.f32.partialorder %v897_v8, 0.6015625  ;;  %v1204_v31 = vsel %vm1108_vm15, %v244_v9, 0 }
  0x3a   :  { %2224 = vmatpush.bf16.msrb.mxu2 %v3626_v10  ;;  %v899_v10 = vunpack.c.l.bf16 %v292_v63  ;;  %v1683_v18 = vpack.c.b16 %v1548_v5, %v1545_v2  ;;  %vm1154_vm10 = vmpackc.low %vm4000_vm5, %vm3996_vm4  ;;  %v1554_v41 = vunpack.c.l.b16 %v1204_v31  ;;  %v1555_v42 = vunpack.c.h.b16 %v1204_v31 }
  0x3b   :  { %2881 = vmatpush.bf16.msrb.mxu3 %v3586_v11  ;;  %v900_v11 = vunpack.c.h.bf16 %v292_v63  ;;  %vm4012_vm8 = vcmp.gt.f32.partialorder %v824_v12, 0.6015625  ;;  %vm4016_vm9 = vcmp.gt.f32.partialorder %v825_v13, 0.6015625  ;;  %v1250_v28 = vsel %vm1154_vm10, %v290_v60, 0 }
  0x3c   :  { %3010 = vmatpush.bf16.msrb.mxu0 %v3594_v14  ;;  %3139 = vmatpush.bf16.msrb.mxu1 %v3602_v15  ;;  %v1719_v14 = vpack.c.b16 %v1620_v62, %v1617_v61  ;;  %v1720_v15 = vpack.c.b16 %v1621_v1, %v1618_v0  ;;  %vm4004_vm6 = vcmp.gt.f32.partialorder %v899_v10, 0.6015625  ;;  %vm1106_vm14 = vmpackc.low %vm4016_vm9, %vm4012_vm8  ;;  %v1623_v32 = vunpack.c.l.b16 %v1250_v28  ;;  %v3600_v0 = vld [vmem:[#allocation7 + $0xa0] sm:$0xff] }
  0x3d   :  { %vm4008_vm7 = vcmp.gt.f32.partialorder %v900_v11, 0.6015625  ;;  %v1202_v30 = vsel %vm1106_vm14, %v242_v4, 0  ;;  %vm4048_vm4 = vcmp.gt.f32.partialorder %v830_v48, 0.6015625  ;;  %vm4052_vm5 = vcmp.gt.f32.partialorder %v831_v49, 0.6015625  ;;  %vm1160_vm9 = vmpackc.low %vm4044_vm3, %vm4040_vm2  ;;  %v298_v4 = vld [vmem:[#allocation5 + $0x198] sm:$0xff] }
  0x3e   :  { %2225 = vmatpush.bf16.msrb.mxu2 %v3625_v52  ;;  %vm1156_vm13 = vmpackc.low %vm4008_vm7, %vm4004_vm6  ;;  %v1551_v38 = vunpack.c.l.b16 %v1202_v30  ;;  %v1552_v39 = vunpack.c.h.b16 %v1202_v30  ;;  %v1256_v2 = vsel %vm1160_vm9, %v296_v35, 0  ;;  %v908_v13 = vunpack.c.l.bf16 %v298_v4  ;;  %v304_v48 = vld [vmem:[#allocation5 + $0x1bc] sm:$0xff] }
  0x3f   :  { %2882 = vmatpush.bf16.msrb.mxu3 %v3585_v53  ;;  %v1252_v29 = vsel %vm1156_vm13, %v292_v63, 0  ;;  %v3592_v63 = vld [vmem:[#allocation7 + $0x60] sm:$0xff]  ;;  %vm1110_vm10 = vmpackc.low %vm4052_vm5, %vm4048_vm4  ;;  %v1632_v8 = vunpack.c.l.b16 %v1256_v2  ;;  %v1633_v10 = vunpack.c.h.b16 %v1256_v2  ;;  %v917_v59 = vunpack.c.l.bf16 %v304_v48 }
  0x40   :  { %3011 = vmatpush.bf16.msrb.mxu0 %v3593_v54  ;;  %3140 = vmatpush.bf16.msrb.mxu1 %v3601_v55  ;;  %v1626_v34 = vunpack.c.l.b16 %v1252_v29  ;;  %v1686_v54 = vpack.c.b16 %v1554_v41, %v1551_v38  ;;  %v1687_v55 = vpack.c.b16 %v1555_v42, %v1552_v39  ;;  %v1206_v3 = vsel %vm1110_vm10, %v246_v40, 0  ;;  %v3583_v38 = vld [vmem:[#allocation7 + $0x18] sm:$0xff] }
  0x41   :  { %v1557_v11 = vunpack.c.l.b16 %v1206_v3  ;;  %v1558_v12 = vunpack.c.h.b16 %v1206_v3  ;;  %vm4074_vm12 = vcmp.gt.f32.partialorder %v908_v13, 0.6015625  ;;  %v3591_v39 = vld [vmem:[#allocation7 + $0x58] sm:$0xff]  ;;  %v918_v60 = vunpack.c.h.bf16 %v304_v48 }
  0x42   :  { %2226 = vmatpush.bf16.msrb.mxu2 %v3624_v26  ;;  %v1722_v50 = vpack.c.b16 %v1626_v34, %v1623_v32  ;;  %v3599_v40 = vld [vmem:[#allocation7 + $0x98] sm:$0xff]  ;;  %v846_v2 = vunpack.c.h.bf16 %v256_v58  ;;  %vm4135_vm10 = vcmp.gt.f32.partialorder %v917_v59, 0.6015625  ;;  %v848_v32 = vunpack.c.l.bf16 %v258_v25 }
  0x43   :  { %2883 = vmatpush.bf16.msrb.mxu3 %v3584_v27  ;;  %v839_v27 = vunpack.c.l.bf16 %v252_v20  ;;  %v849_v34 = vunpack.c.h.bf16 %v258_v25 }
  0x44   :  { %3012 = vmatpush.bf16.msrb.mxu0 %v3592_v63  ;;  %3141 = vmatpush.bf16.msrb.mxu1 %v3600_v0 }
  0x45   :  { %2038 = vmatmul.bf16.gmra.mxu2 %v1716_v36  ;;  %1978 = vmatmul.bf16.gmra.mxu0 %v1680_v44  ;;  %v1624_v36 = vunpack.c.h.b16 %v1250_v28  ;;  %v903_v44 = vunpack.c.h.bf16 %v294_v33  ;;  %v840_v28 = vunpack.c.h.bf16 %v252_v20  ;;  %vm4106_vm4 = vcmp.gt.f32.partialorder %v839_v27, 0.6015625 }
  0x46   :  { %2167 = vmatmul.bf16.gmra.mxu3 %v1717_v37  ;;  %v1627_v37 = vunpack.c.h.b16 %v1252_v29 }
  0x47   :  { %2107 = vmatmul.bf16.gmra.mxu1 %v1681_v45  ;;  %v248_v45 = vld [vmem:[#allocation5 + $0x6c] sm:$0xff]  ;;  %vm4036_vm1 = vcmp.gt.f32.partialorder %v903_v44, 0.6015625  ;;  %vm4110_vm5 = vcmp.gt.f32.partialorder %v840_v28, 0.6015625  ;;  %2884 = vmatpush.bf16.msrb.mxu3 %v3583_v38 }
  0x48   :  { %v1723_v51 = vpack.c.b16 %v1627_v37, %v1624_v36  ;;  %v833_v52 = vunpack.c.l.bf16 %v248_v45  ;;  %v834_v53 = vunpack.c.h.bf16 %v248_v45  ;;  %vm1158_vm6 = vmpackc.low %vm4036_vm1, %vm4032_vm0  ;;  %v3623_v37 = vld [vmem:[#allocation8 + $0x98] sm:$0xff]  ;;  %3013 = vmatpush.bf16.msrb.mxu0 %v3591_v39  ;;  %3142 = vmatpush.bf16.msrb.mxu1 %v3599_v40 }
  0x49   :  { %v1254_v1 = vsel %vm1158_vm6, %v294_v33, 0  ;;  %2227 = vmatpush.bf16.msrb.mxu2 %v3623_v37 }
  0x4a   :  { %vm4060_vm7 = vcmp.gt.f32.partialorder %v833_v52, 0.6015625  ;;  %vm978_vm8 = vcmp.gt.f32.partialorder %v834_v53, 0.6015625  ;;  %v1629_v7 = vunpack.c.l.b16 %v1254_v1  ;;  %v1630_v9 = vunpack.c.h.b16 %v1254_v1  ;;  %v254_v53 = vld [vmem:[#allocation5 + $0x90] sm:$0xff] }
  0x4b   :  { %vm1112_vm11 = vmpackc.low %vm978_vm8, %vm4060_vm7  ;;  %v842_v61 = vunpack.c.l.bf16 %v254_v53  ;;  %v843_v62 = vunpack.c.h.bf16 %v254_v53  ;;  %v845_v1 = vunpack.c.l.bf16 %v256_v58 }
  0x4c   :  { %v1208_v5 = vsel %vm1112_vm11, %v248_v45, 0  ;;  %v1725_v21 = vpack.c.b16 %v1632_v8, %v1629_v7  ;;  %v1726_v22 = vpack.c.b16 %v1633_v10, %v1630_v9  ;;  %vm1116_vm7 = vmpackc.low %vm4110_vm5, %vm4106_vm4  ;;  %v302_v45 = vld [vmem:[#allocation5 + $0x1b0] sm:$0xff]  ;;  %vm4139_vm11 = vcmp.gt.f32.partialorder %v918_v60, 0.6015625 }
  0x4d   :  { %v1560_v16 = vunpack.c.l.b16 %v1208_v5  ;;  %v1561_v17 = vunpack.c.h.b16 %v1208_v5  ;;  %v1212_v44 = vsel %vm1116_vm7, %v252_v20, 0  ;;  %v914_v56 = vunpack.c.l.bf16 %v302_v45  ;;  %v308_v20 = vld [vmem:[#allocation5 + $0x1d4] sm:$0xff] }
  0x4e   :  { %v915_v57 = vunpack.c.h.bf16 %v302_v45  ;;  %v923_v31 = vunpack.c.l.bf16 %v308_v20  ;;  %v924_v33 = vunpack.c.h.bf16 %v308_v20 }
  0x4f   :  { %v1689_v29 = vpack.c.b16 %v1560_v16, %v1557_v11  ;;  %v1690_v30 = vpack.c.b16 %v1561_v17, %v1558_v12  ;;  %vm4127_vm8 = vcmp.gt.f32.partialorder %v914_v56, 0.6015625  ;;  %v3622_v11 = vld [vmem:[#allocation8 + $0x90] sm:$0xff]  ;;  %v306_v17 = vld [vmem:[#allocation5 + $0x1c8] sm:$0xff] }
  0x50   :  { %vm4131_vm9 = vcmp.gt.f32.partialorder %v915_v57, 0.6015625  ;;  %v3582_v12 = vld [vmem:[#allocation7 + $0x10] sm:$0xff]  ;;  %2228 = vmatpush.bf16.msrb.mxu2 %v3622_v11  ;;  %v920_v28 = vunpack.c.l.bf16 %v306_v17  ;;  %vm4175_vm7 = vcmp.gt.f32.partialorder %v924_v33, 0.6015625 }
  0x51   :  { %2885 = vmatpush.bf16.msrb.mxu3 %v3582_v12  ;;  %v312_v56 = vld [vmem:[#allocation5 + $0x1ec] sm:$0xff] }
  0x52   :  { %vm4163_vm4 = vcmp.gt.f32.partialorder %v920_v28, 0.6015625  ;;  %v316_v28 = vld [vmem:[#allocation5 + $0x204] sm:$0xff] }
  0x55   :  { %2043 = vmatmul.bf16.gmra.mxu2 %v1719_v14  ;;  %1983 = vmatmul.bf16.gmra.mxu0 %v1683_v18  ;;  %v909_v14 = vunpack.c.h.bf16 %v298_v4  ;;  %v911_v18 = vunpack.c.l.bf16 %v300_v6 }
  0x56   :  { %2172 = vmatmul.bf16.gmra.mxu3 %v1720_v15  ;;  %v250_v15 = vld [vmem:[#allocation5 + $0x78] sm:$0xff] }
  0x57   :  { %2112 = vmatmul.bf16.gmra.mxu1 %v1684_v19  ;;  %v912_v19 = vunpack.c.h.bf16 %v300_v6  ;;  %v836_v23 = vunpack.c.l.bf16 %v250_v15  ;;  %v837_v24 = vunpack.c.h.bf16 %v250_v15  ;;  %vm4078_vm13 = vcmp.gt.f32.partialorder %v909_v14, 0.6015625 }
  0x58   :  { %vm4082_vm14 = vcmp.gt.f32.partialorder %v911_v18, 0.6015625  ;;  %vm1162_vm0 = vmpackc.low %vm4078_vm13, %vm4074_vm12  ;;  %vm4143_vm12 = vcmp.gt.f32.partialorder %v842_v61, 0.6015625  ;;  %vm4147_vm13 = vcmp.gt.f32.partialorder %v843_v62, 0.6015625  ;;  %v262_v61 = vld [vmem:[#allocation5 + $0xc0] sm:$0xff] }
  0x59   :  { %vm4086_vm15 = vcmp.gt.f32.partialorder %v912_v19, 0.6015625  ;;  %vm4094_vm1 = vcmp.gt.f32.partialorder %v836_v23, 0.6015625  ;;  %vm4098_vm2 = vcmp.gt.f32.partialorder %v837_v24, 0.6015625  ;;  %v1258_v41 = vsel %vm1162_vm0, %v298_v4, 0 }
  0x5a   :  { %vm1164_vm3 = vmpackc.low %vm4086_vm15, %vm4082_vm14  ;;  %v1635_v46 = vunpack.c.l.b16 %v1258_v41  ;;  %v1636_v49 = vunpack.c.h.b16 %v1258_v41  ;;  %vm989_vm15 = vcmp.gt.f32.partialorder %v845_v1, 0.6015625  ;;  %vm990_vm0 = vcmp.gt.f32.partialorder %v846_v2, 0.6015625  ;;  %v264_v2 = vld [vmem:[#allocation5 + $0xcc] sm:$0xff] }
  0x5b   :  { %vm1114_vm6 = vmpackc.low %vm4098_vm2, %vm4094_vm1  ;;  %v1260_v42 = vsel %vm1164_vm3, %v300_v6, 0  ;;  %v854_v5 = vunpack.c.l.bf16 %v262_v61  ;;  %v855_v6 = vunpack.c.h.bf16 %v262_v61  ;;  %v857_v9 = vunpack.c.l.bf16 %v264_v2 }
  0x5c   :  { %v1210_v43 = vsel %vm1114_vm6, %v250_v15, 0  ;;  %v1638_v47 = vunpack.c.l.b16 %v1260_v42  ;;  %vm1166_vm14 = vmpackc.low %vm4131_vm9, %vm4127_vm8  ;;  %vm4171_vm6 = vcmp.gt.f32.partialorder %v923_v31, 0.6015625  ;;  %vm4179_vm8 = vcmp.gt.f32.partialorder %v848_v32, 0.6015625 }
  0x5d   :  { %v1564_v52 = vunpack.c.h.b16 %v1210_v43  ;;  %vm1168_vm1 = vmpackc.low %vm4139_vm11, %vm4135_vm10  ;;  %v1262_v13 = vsel %vm1166_vm14, %v302_v45, 0  ;;  %vm4183_vm9 = vcmp.gt.f32.partialorder %v849_v34, 0.6015625  ;;  %v858_v10 = vunpack.c.h.bf16 %v264_v2  ;;  %v266_v34 = vld [vmem:[#allocation5 + $0xd8] sm:$0xff] }
  0x5e   :  { %v1728_v63 = vpack.c.b16 %v1638_v47, %v1635_v46  ;;  %vm1118_vm2 = vmpackc.low %vm4147_vm13, %vm4143_vm12  ;;  %v1264_v14 = vsel %vm1168_vm1, %v304_v48, 0  ;;  %v1641_v18 = vunpack.c.l.b16 %v1262_v13  ;;  %v3590_v47 = vld [vmem:[#allocation7 + $0x50] sm:$0xff]  ;;  %v936_v41 = vunpack.c.h.bf16 %v316_v28 }
  0x5f   :  { %vm1120_vm3 = vmpackc.low %vm990_vm0, %vm989_vm15  ;;  %v1214_v15 = vsel %vm1118_vm2, %v254_v53, 0  ;;  %v1644_v19 = vunpack.c.l.b16 %v1264_v14  ;;  %3014 = vmatpush.bf16.msrb.mxu0 %v3590_v47  ;;  %v310_v53 = vld [vmem:[#allocation5 + $0x1e0] sm:$0xff] }
  0x60   :  { %v1216_v16 = vsel %vm1120_vm3, %v256_v58, 0  ;;  %v1569_v23 = vunpack.c.l.b16 %v1214_v15  ;;  %v1570_v24 = vunpack.c.h.b16 %v1214_v15  ;;  %vm1172_vm13 = vmpackc.low %vm4175_vm7, %vm4171_vm6  ;;  %v927_v1 = vunpack.c.h.bf16 %v310_v53 }
  0x61   :  { %v1572_v26 = vunpack.c.l.b16 %v1216_v16  ;;  %v1573_v27 = vunpack.c.h.b16 %v1216_v16  ;;  %v1731_v35 = vpack.c.b16 %v1644_v19, %v1641_v18  ;;  %vm1122_vm14 = vmpackc.low %vm4183_vm9, %vm4179_vm8  ;;  %vm1001_vm7 = vcmp.gt.f32.partialorder %v857_v9, 0.6015625  ;;  %v3621_v19 = vld [vmem:[#allocation8 + $0x88] sm:$0xff] }
  0x62   :  { %vm4203_vm1 = vcmp.gt.f32.partialorder %v927_v1, 0.6015625  ;;  %vm1002_vm8 = vcmp.gt.f32.partialorder %v858_v10, 0.6015625  ;;  %2229 = vmatpush.bf16.msrb.mxu2 %v3621_v19  ;;  %v320_v10 = vld [vmem:[#allocation5 + $0x21c] sm:$0xff] }
  0x63   :  { %v1695_v39 = vpack.c.b16 %v1572_v26, %v1569_v23  ;;  %v1696_v40 = vpack.c.b16 %v1573_v27, %v1570_v24 }
  0x65   :  { %2048 = vmatmul.bf16.gmra.mxu2 %v1722_v50  ;;  %1988 = vmatmul.bf16.gmra.mxu0 %v1686_v54  ;;  %v1639_v50 = vunpack.c.h.b16 %v1260_v42  ;;  %v1566_v54 = vunpack.c.l.b16 %v1212_v44  ;;  %v860_v42 = vunpack.c.l.bf16 %v266_v34 }
  0x66   :  { %2177 = vmatmul.bf16.gmra.mxu3 %v1723_v51  ;;  %v1563_v51 = vunpack.c.l.b16 %v1210_v43  ;;  %v861_v43 = vunpack.c.h.bf16 %v266_v34 }
  0x67   :  { %2117 = vmatmul.bf16.gmra.mxu1 %v1687_v55  ;;  %v1567_v55 = vunpack.c.h.b16 %v1212_v44  ;;  %v1729_v0 = vpack.c.b16 %v1639_v50, %v1636_v49  ;;  %v1268_v49 = vsel %vm1172_vm13, %v308_v20, 0  ;;  %v3598_v50 = vld [vmem:[#allocation7 + $0x90] sm:$0xff]  ;;  %v3581_v20 = vld [vmem:[#allocation7 + $0x8] sm:$0xff] }
  0x68   :  { %v1692_v3 = vpack.c.b16 %v1566_v54, %v1563_v51  ;;  %v1218_v51 = vsel %vm1122_vm14, %v258_v25, 0  ;;  %3143 = vmatpush.bf16.msrb.mxu1 %v3598_v50  ;;  %v1651_v58 = vunpack.c.h.b16 %v1268_v49  ;;  %2886 = vmatpush.bf16.msrb.mxu3 %v3581_v20  ;;  %v314_v25 = vld [vmem:[#allocation5 + $0x1f8] sm:$0xff] }
  0x69   :  { %v1693_v4 = vpack.c.b16 %v1567_v55, %v1564_v52  ;;  %v1650_v55 = vunpack.c.l.b16 %v1268_v49  ;;  %v1575_v59 = vunpack.c.l.b16 %v1218_v51  ;;  %v1576_v60 = vunpack.c.h.b16 %v1218_v51 }
  0x75   :  { %2053 = vmatmul.bf16.gmra.mxu2 %v1725_v21  ;;  %1993 = vmatmul.bf16.gmra.mxu0 %v1689_v29  ;;  %v1642_v21 = vunpack.c.h.b16 %v1262_v13  ;;  %v921_v29 = vunpack.c.h.bf16 %v306_v17 }
  0x76   :  { %2182 = vmatmul.bf16.gmra.mxu3 %v1726_v22  ;;  %v1645_v22 = vunpack.c.h.b16 %v1264_v14 }
  0x77   :  { %2122 = vmatmul.bf16.gmra.mxu1 %v1690_v30  ;;  %v260_v30 = vld [vmem:[#allocation5 + $0xb4] sm:$0xff]  ;;  %vm4167_vm5 = vcmp.gt.f32.partialorder %v921_v29, 0.6015625  ;;  %v3589_v29 = vld [vmem:[#allocation7 + $0x48] sm:$0xff] }
  0x78   :  { %v1732_v36 = vpack.c.b16 %v1645_v22, %v1642_v21  ;;  %v851_v37 = vunpack.c.l.bf16 %v260_v30  ;;  %v852_v38 = vunpack.c.h.bf16 %v260_v30  ;;  %vm1170_vm10 = vmpackc.low %vm4167_vm5, %vm4163_vm4  ;;  %vm4215_vm4 = vcmp.gt.f32.partialorder %v854_v5, 0.6015625  ;;  %3015 = vmatpush.bf16.msrb.mxu0 %v3589_v29 }
  0x79   :  { %v1266_v48 = vsel %vm1170_vm10, %v306_v17, 0  ;;  %vm4219_vm5 = vcmp.gt.f32.partialorder %v855_v6, 0.6015625  ;;  %v318_v6 = vld [vmem:[#allocation5 + $0x210] sm:$0xff] }
  0x7a   :  { %vm995_vm11 = vcmp.gt.f32.partialorder %v851_v37, 0.6015625  ;;  %vm996_vm12 = vcmp.gt.f32.partialorder %v852_v38, 0.6015625  ;;  %v1647_v54 = vunpack.c.l.b16 %v1266_v48  ;;  %v1648_v57 = vunpack.c.h.b16 %v1266_v48  ;;  %vm1126_vm10 = vmpackc.low %vm4219_vm5, %vm4215_vm4  ;;  %v3597_v48 = vld [vmem:[#allocation7 + $0x88] sm:$0xff]  ;;  %v270_v17 = vld [vmem:[#allocation5 + $0xf0] sm:$0xff] }
  0x7b   :  { %vm1124_vm15 = vmpackc.low %vm996_vm12, %vm995_vm11  ;;  %v1222_v23 = vsel %vm1126_vm10, %v262_v61, 0  ;;  %v932_v37 = vunpack.c.l.bf16 %v314_v25  ;;  %v933_v38 = vunpack.c.h.bf16 %v314_v25  ;;  %3144 = vmatpush.bf16.msrb.mxu1 %v3597_v48  ;;  %v938_v20 = vunpack.c.l.bf16 %v318_v6 }
  0x7c   :  { %v1220_v52 = vsel %vm1124_vm15, %v260_v30, 0  ;;  %v1734_v7 = vpack.c.b16 %v1650_v55, %v1647_v54  ;;  %v1735_v8 = vpack.c.b16 %v1651_v58, %v1648_v57  ;;  %vm1128_vm11 = vmpackc.low %vm1002_vm8, %vm1001_vm7  ;;  %v1581_v33 = vunpack.c.l.b16 %v1222_v23 }
  0x7d   :  { %v1578_v62 = vunpack.c.l.b16 %v1220_v52  ;;  %v1224_v24 = vsel %vm1128_vm11, %v264_v2, 0  ;;  %v1582_v32 = vunpack.c.h.b16 %v1222_v23  ;;  %vm4235_vm12 = vcmp.gt.f32.partialorder %v932_v37, 0.6015625 }
  0x7e   :  { %vm4239_vm13 = vcmp.gt.f32.partialorder %v933_v38, 0.6015625  ;;  %vm4247_vm15 = vcmp.gt.f32.partialorder %v936_v41, 0.6015625  ;;  %v941_v23 = vunpack.c.l.bf16 %v320_v10  ;;  %v867_v29 = vunpack.c.h.bf16 %v270_v17 }
  0x7f   :  { %v1698_v11 = vpack.c.b16 %v1578_v62, %v1575_v59  ;;  %vm4285_vm8 = vcmp.gt.f32.partialorder %v938_v20, 0.6015625  ;;  %v322_v59 = vld [vmem:[#allocation5 + $0x228] sm:$0xff] }
  0x80   :  { %vm4293_vm10 = vcmp.gt.f32.partialorder %v941_v23, 0.6015625 }
  0x85   :  { %2058 = vmatmul.bf16.gmra.mxu2 %v1728_v63  ;;  %1998 = vmatmul.bf16.gmra.mxu0 %v1692_v3  ;;  %v1579_v63 = vunpack.c.h.b16 %v1220_v52  ;;  %v929_v3 = vunpack.c.l.bf16 %v312_v56 }
  0x86   :  { %2187 = vmatmul.bf16.gmra.mxu3 %v1729_v0  ;;  %v926_v0 = vunpack.c.l.bf16 %v310_v53 }
  0x87   :  { %2127 = vmatmul.bf16.gmra.mxu1 %v1693_v4  ;;  %v930_v4 = vunpack.c.h.bf16 %v312_v56  ;;  %v1699_v12 = vpack.c.b16 %v1579_v63, %v1576_v60  ;;  %vm4207_vm2 = vcmp.gt.f32.partialorder %v929_v3, 0.6015625 }
  0x88   :  { %vm4199_vm0 = vcmp.gt.f32.partialorder %v926_v0, 0.6015625 }
  0x89   :  { %vm4211_vm3 = vcmp.gt.f32.partialorder %v930_v4, 0.6015625  ;;  %vm1174_vm6 = vmpackc.low %vm4203_vm1, %vm4199_vm0  ;;  %vm4253_vm0 = vcmp.gt.f32.partialorder %v860_v42, 0.6015625  ;;  %vm4257_vm1 = vcmp.gt.f32.partialorder %v861_v43, 0.6015625  ;;  %v231_v43 = vld [vmem:[#allocation5 + $0x8] sm:$0xf] }
  0x8a   :  { %vm1176_vm9 = vmpackc.low %vm4211_vm3, %vm4207_vm2  ;;  %v1270_v21 = vsel %vm1174_vm6, %v310_v53, 0 }
  0x8b   :  { %v1272_v22 = vsel %vm1176_vm9, %v312_v56, 0  ;;  %v1653_v26 = vunpack.c.l.b16 %v1270_v21  ;;  %v1654_v27 = vunpack.c.h.b16 %v1270_v21  ;;  %vm1178_vm2 = vmpackc.low %vm4239_vm13, %vm4235_vm12  ;;  %v939_v21 = vunpack.c.h.bf16 %v318_v6 }
  0x8c   :  { %v1656_v30 = vunpack.c.l.b16 %v1272_v22  ;;  %v1657_v31 = vunpack.c.h.b16 %v1272_v22  ;;  %vm1130_vm6 = vmpackc.low %vm4257_vm1, %vm4253_vm0  ;;  %v1274_v0 = vsel %vm1178_vm2, %v314_v25, 0  ;;  %v272_v22 = vld [vmem:[#allocation5 + $0xfc] sm:$0xff]  ;;  %vm4307_vm13 = vcmp.gt.f32.partialorder %v867_v29, 0.6015625 }
  0x8d   :  { %v1226_v2 = vsel %vm1130_vm6, %v266_v34, 0  ;;  %v1660_v13 = vunpack.c.h.b16 %v1274_v0  ;;  %vm4289_vm9 = vcmp.gt.f32.partialorder %v939_v21, 0.6015625 }
  0x8e   :  { %v1737_v44 = vpack.c.b16 %v1656_v30, %v1653_v26  ;;  %v1738_v45 = vpack.c.b16 %v1657_v31, %v1654_v27  ;;  %v1587_v15 = vunpack.c.l.b16 %v1226_v2  ;;  %v1588_v16 = vunpack.c.h.b16 %v1226_v2 }
  0x95   :  { %2063 = vmatmul.bf16.gmra.mxu2 %v1731_v35  ;;  %2003 = vmatmul.bf16.gmra.mxu0 %v1695_v39  ;;  %v1584_v35 = vunpack.c.l.b16 %v1224_v24  ;;  %v268_v39 = vld [vmem:[#allocation5 + $0xe4] sm:$0xff] }
  0x96   :  { %2192 = vmatmul.bf16.gmra.mxu3 %v1732_v36  ;;  %v1585_v36 = vunpack.c.h.b16 %v1224_v24  ;;  %v863_v46 = vunpack.c.l.bf16 %v268_v39  ;;  %v864_v47 = vunpack.c.h.bf16 %v268_v39  ;;  %v942_v24 = vunpack.c.h.bf16 %v320_v10 }
  0x97   :  { %2132 = vmatmul.bf16.gmra.mxu1 %v1696_v40  ;;  %v935_v40 = vunpack.c.l.bf16 %v316_v28  ;;  %v1701_v49 = vpack.c.b16 %v1584_v35, %v1581_v33  ;;  %v869_v33 = vunpack.c.l.bf16 %v272_v22 }
  0x98   :  { %v1702_v50 = vpack.c.b16 %v1585_v36, %v1582_v32  ;;  %vm4265_vm3 = vcmp.gt.f32.partialorder %v863_v46, 0.6015625  ;;  %vm1008_vm4 = vcmp.gt.f32.partialorder %v864_v47, 0.6015625  ;;  %v870_v32 = vunpack.c.h.bf16 %v272_v22  ;;  %v3588_v47 = vld [vmem:[#allocation7 + $0x40] sm:$0xff] }
  0x99   :  { %vm4243_vm14 = vcmp.gt.f32.partialorder %v935_v40, 0.6015625  ;;  %vm1132_vm7 = vmpackc.low %vm1008_vm4, %vm4265_vm3  ;;  %vm4297_vm11 = vcmp.gt.f32.partialorder %v942_v24, 0.6015625  ;;  %3016 = vmatpush.bf16.msrb.mxu0 %v3588_v47 }
  0x9a   :  { %vm1180_vm5 = vmpackc.low %vm4247_vm15, %vm4243_vm14  ;;  %v1228_v5 = vsel %vm1132_vm7, %v268_v39, 0  ;;  %vm4315_vm15 = vcmp.gt.f32.partialorder %v869_v33, 0.6015625  ;;  %vm4319_vm0 = vcmp.gt.f32.partialorder %v870_v32, 0.6015625 }
  0x9b   :  { %v1276_v1 = vsel %vm1180_vm5, %v316_v28, 0  ;;  %v1590_v18 = vunpack.c.l.b16 %v1228_v5  ;;  %v1591_v19 = vunpack.c.h.b16 %v1228_v5  ;;  %v866_v28 = vunpack.c.l.bf16 %v270_v17  ;;  %vm1182_vm14 = vmpackc.low %vm4289_vm9, %vm4285_vm8  ;;  %v274_v5 = vld [vmem:[#allocation5 + $0x108] sm:$0xff] }
  0x9c   :  { %v1662_v9 = vunpack.c.l.b16 %v1276_v1  ;;  %v1663_v14 = vunpack.c.h.b16 %v1276_v1  ;;  %vm1184_vm1 = vmpackc.low %vm4297_vm11, %vm4293_vm10  ;;  %v1278_v51 = vsel %vm1182_vm14, %v318_v6, 0 }
  0x9d   :  { %v1704_v34 = vpack.c.b16 %v1590_v18, %v1587_v15  ;;  %v1705_v35 = vpack.c.b16 %v1591_v19, %v1588_v16  ;;  %vm4303_vm12 = vcmp.gt.f32.partialorder %v866_v28, 0.6015625  ;;  %vm1136_vm3 = vmpackc.low %vm4319_vm0, %vm4315_vm15  ;;  %v1280_v52 = vsel %vm1184_vm1, %v320_v10, 0 }
  0x9e   :  { %v1741_v31 = vpack.c.b16 %v1663_v14, %v1660_v13  ;;  %vm1134_vm2 = vmpackc.low %vm4307_vm13, %vm4303_vm12  ;;  %v1232_v58 = vsel %vm1136_vm3, %v272_v22, 0  ;;  %v1666_v1 = vunpack.c.h.b16 %v1278_v51  ;;  %v1669_v2 = vunpack.c.h.b16 %v1280_v52 }
  0x9f   :  { %v1597_v6 = vunpack.c.h.b16 %v1232_v58  ;;  %v945_v10 = vunpack.c.h.bf16 %v322_v59  ;;  %v873_v18 = vunpack.c.h.bf16 %v274_v5 }
  0xa0   :  { %v1744_v20 = vpack.c.b16 %v1669_v2, %v1666_v1  ;;  %v135_v1 = vld [vmem:[#allocation2 + $0x8] sm:$0xf] }
  0xa1   :  { %vm4345_vm5 = vcmp.gt.f32.partialorder %v945_v10, 0.6015625  ;;  %vm4363_vm9 = vcmp.gt.f32.partialorder %v873_v18, 0.6015625 }
  0xa5   :  { %2068 = vmatmul.bf16.gmra.mxu2 %v1734_v7  ;;  %2008 = vmatmul.bf16.gmra.mxu0 %v1698_v11  ;;  %v3620_v11 = vld [vmem:[#allocation8 + $0x80] sm:$0xff] }
  0xa6   :  { %2197 = vmatmul.bf16.gmra.mxu3 %v1735_v8  ;;  %v1659_v8 = vunpack.c.l.b16 %v1274_v0  ;;  %2230 = vmatpush.bf16.msrb.mxu2 %v3620_v11  ;;  %v324_v0 = vld [vmem:[#allocation5 + $0x234] sm:$0xff] }
  0xa7   :  { %2137 = vmatmul.bf16.gmra.mxu1 %v1699_v12  ;;  %v3580_v12 = vld [vmem:[#allocation7] sm:$0xff]  ;;  %v276_v11 = vld [vmem:[#allocation5 + $0x114] sm:$0xff]  ;;  %v948_v13 = vunpack.c.h.bf16 %v324_v0 }
  0xa8   :  { %2887 = vmatpush.bf16.msrb.mxu3 %v3580_v12  ;;  %v1740_v27 = vpack.c.b16 %v1662_v9, %v1659_v8  ;;  %v1596_v8 = vunpack.c.l.b16 %v1232_v58  ;;  %v944_v9 = vunpack.c.l.bf16 %v322_v59  ;;  %v947_v12 = vunpack.c.l.bf16 %v324_v0 }
  0xa9   :  { %v875_v21 = vunpack.c.l.bf16 %v276_v11  ;;  %v876_v22 = vunpack.c.h.bf16 %v276_v11  ;;  %vm4353_vm7 = vcmp.gt.f32.partialorder %v948_v13, 0.6015625  ;;  %v328_v13 = vunpack.c.l.bf16 %v135_v1 }
  0xaa   :  { %vm4341_vm4 = vcmp.gt.f32.partialorder %v944_v9, 0.6015625  ;;  %vm4349_vm6 = vcmp.gt.f32.partialorder %v947_v12, 0.6015625 }
  0xab   :  { %vm1186_vm10 = vmpackc.low %vm4345_vm5, %vm4341_vm4  ;;  %vm4371_vm11 = vcmp.gt.f32.partialorder %v875_v21, 0.6015625  ;;  %vm4375_vm12 = vcmp.gt.f32.partialorder %v876_v22, 0.6015625  ;;  %v149_v21 = vld [vmem:[#allocation2 + $0x5c] sm:$0xf] }
  0xac   :  { %vm1188_vm13 = vmpackc.low %vm4353_vm7, %vm4349_vm6 }
  0xad   :  { %vm1140_vm15 = vmpackc.low %vm4375_vm12, %vm4371_vm11  ;;  %v1284_v41 = vsel %vm1188_vm13, %v324_v0, 0 }
  0xae   :  { %v1675_v58 = vunpack.c.h.b16 %v1284_v41 }
  0xb2   :  { %v1974_v53 = vpop.f32.mrf.mxu0 }
  0xb4   :  { %v2103_v54 = vpop.f32.mrf.mxu1 }
  0xb5   :  { %v4251_v57 = vadd.f32 %v2103_v54, %v1974_v53  ;;  %2073 = vmatmul.bf16.gmra.mxu2 %v1737_v44  ;;  %2013 = vmatmul.bf16.gmra.mxu0 %v1701_v49  ;;  %v3596_v53 = vld [vmem:[#allocation7 + $0x80] sm:$0xff]  ;;  %v1230_v54 = vsel %vm1134_vm2, %v270_v17, 0  ;;  %v872_v17 = vunpack.c.l.bf16 %v274_v5 }
  0xb6   :  { %2202 = vmatmul.bf16.gmra.mxu3 %v1738_v45  ;;  %3145 = vmatpush.bf16.msrb.mxu1 %v3596_v53  ;;  %v233_v45 = vld [vmem:[#allocation5 + $0x14] sm:$0xf]  ;;  %v1674_v53 = vunpack.c.l.b16 %v1284_v41  ;;  %v237_v41 = vld [vmem:[#allocation5 + $0x2c] sm:$0xf] }
  0xb7   :  { %2142 = vmatmul.bf16.gmra.mxu1 %v1702_v50  ;;  %vm4359_vm8 = vcmp.gt.f32.partialorder %v872_v17, 0.6015625 }
  0xb8   :  { %v2034_v61 = vpop.f32.mrf.mxu2  ;;  %vm1138_vm14 = vmpackc.low %vm4363_vm9, %vm4359_vm8  ;;  %vm4429_vm8 = vcmp.gt.f32.partialorder %v328_v13, 0.6015625 }
  0xb9   :  { %v2163_v62 = vpop.f32.mrf.mxu3  ;;  %v1234_v44 = vsel %vm1138_vm14, %v274_v5, 0  ;;  %v137_v5 = vld [vmem:[#allocation2 + $0x14] sm:$0xf]  ;;  %vm615_vm12 = vmpackc.low %vm4429_vm8, %vm4429_vm8 }
  0xba   :  { %v4279_v63 = vadd.f32 %v2163_v62, %v2034_v61  ;;  %v1976_v3 = vpop.f32.mrf.mxu0  ;;  %v1665_v61 = vunpack.c.l.b16 %v1278_v51  ;;  %v1668_v62 = vunpack.c.l.b16 %v1280_v52  ;;  %v134_v51 = vld [vmem:[#allocation2] sm:$0xff]  ;;  %v331_v17 = vunpack.c.l.bf16 %v137_v5 }
  0xbc   :  { %v2105_v4 = vpop.f32.mrf.mxu1  ;;  %v1743_v16 = vpack.c.b16 %v1668_v62, %v1665_v61  ;;  %v1600_v61 = vunpack.c.h.b16 %v1234_v44  ;;  %v811_v62 = vunpack.c.l.bf16 %v233_v45 }
  0xbd   :  { %v4281_v7 = vadd.f32 %v2105_v4, %v1976_v3  ;;  %v1593_v3 = vunpack.c.l.b16 %v1230_v54  ;;  %v1594_v4 = vunpack.c.h.b16 %v1230_v54 }
  0xbe   :  { %vm4401_vm1 = vcmp.gt.f32.partialorder %v811_v62, 0.6015625 }
  0xbf   :  { %v1707_v23 = vpack.c.b16 %v1596_v8, %v1593_v3  ;;  %v1708_v24 = vpack.c.b16 %v1597_v6, %v1594_v4  ;;  %v326_v3 = vunpack.c.l.bf16 %v134_v51  ;;  %v327_v4 = vunpack.c.h.bf16 %v134_v51  ;;  %vm1097_vm7 = vmpackc.low %vm4401_vm1, %vm4401_vm1 }
  0xc0   :  { %v2036_v25 = vpop.f32.mrf.mxu2  ;;  %v1193_v36 = vsel %vm1097_vm7, %v233_v45, 0  ;;  %v817_v45 = vunpack.c.l.bf16 %v237_v41 }
  0xc1   :  { %v2165_v26 = vpop.f32.mrf.mxu3  ;;  %vm4405_vm2 = vcmp.gt.f32.partialorder %v326_v3, 0.6015625  ;;  %vm4409_vm3 = vcmp.gt.f32.partialorder %v327_v4, 0.6015625 }
  0xc2   :  { %v4283_v30 = vadd.f32 %v2165_v26, %v2036_v25  ;;  %v1979_v38 = vpop.f32.mrf.mxu0  ;;  %vm614_vm9 = vmpackc.low %vm4409_vm3, %vm4405_vm2  ;;  %v152_v25 = vld [vmem:[#allocation2 + $0x6c] sm:$0xff] }
  0xc4   :  { %v2108_v39 = vpop.f32.mrf.mxu1 }
  0xc5   :  { %v4301_v42 = vadd.f32 %v2108_v39, %v1979_v38  ;;  %2078 = vmatmul.bf16.gmra.mxu2 %v1740_v27  ;;  %2018 = vmatmul.bf16.gmra.mxu0 %v1704_v34  ;;  %v1282_v39 = vsel %vm1186_vm10, %v322_v59, 0  ;;  %v1599_v59 = vunpack.c.l.b16 %v1234_v44  ;;  %vm4437_vm10 = vcmp.gt.f32.partialorder %v331_v17, 0.6015625 }
  0xc6   :  { %2207 = vmatmul.bf16.gmra.mxu3 %v1741_v31  ;;  %v1672_v54 = vunpack.c.h.b16 %v1282_v39  ;;  %vm617_vm13 = vmpackc.low %vm4437_vm10, %vm4437_vm10 }
  0xc7   :  { %2147 = vmatmul.bf16.gmra.mxu1 %v1705_v35 }
  0xc8   :  { %v2039_v48 = vpop.f32.mrf.mxu2 }
  0xc9   :  { %v2168_v49 = vpop.f32.mrf.mxu3 }
  0xca   :  { %v4335_v50 = vadd.f32 %v2168_v49, %v2039_v48  ;;  %v1981_v55 = vpop.f32.mrf.mxu0  ;;  %v1671_v48 = vunpack.c.l.b16 %v1282_v39  ;;  %v1236_v49 = vsel %vm1140_vm15, %v276_v11, 0  ;;  %vm4466_vm15 = vcmp.gt.f32.partialorder %v817_v45, 0.6015625 }
  0xcb   :  { %v1602_v0 = vunpack.c.l.b16 %v1236_v49  ;;  %v1603_v2 = vunpack.c.h.b16 %v1236_v49  ;;  %v713_v49 = vsel %vm617_vm13, %v137_v5, 0 }
  0xcc   :  { %v2110_v56 = vpop.f32.mrf.mxu1  ;;  %v1746_v11 = vpack.c.b16 %v1674_v53, %v1671_v48  ;;  %v711_v48 = vsel %vm615_vm12, %v135_v1, 0  ;;  %v138_v53 = vld [vmem:[#allocation2 + $0x18] sm:$0xff] }
  0xcd   :  { %v4337_v60 = vadd.f32 %v2110_v56, %v1981_v55  ;;  %v808_v55 = vunpack.c.l.bf16 %v231_v43  ;;  %v136_v56 = vld [vmem:[#allocation2 + $0xc] sm:$0xff]  ;;  %v1710_v18 = vpack.c.b16 %v1602_v0, %v1599_v59  ;;  %v140_v59 = vld [vmem:[#allocation2 + $0x24] sm:$0xff]  ;;  %v332_v3 = vunpack.c.l.bf16 %v138_v53 }
  0xce   :  { %v329_v8 = vunpack.c.l.bf16 %v136_v56  ;;  %v330_v6 = vunpack.c.h.bf16 %v136_v56  ;;  %v333_v4 = vunpack.c.h.bf16 %v138_v53  ;;  %v336_v1 = vunpack.c.h.bf16 %v140_v59 }
  0xcf   :  { %vm4395_vm0 = vcmp.gt.f32.partialorder %v808_v55, 0.6015625 }
  0xd0   :  { %v2041_v14 = vpop.f32.mrf.mxu2  ;;  %vm1095_vm4 = vmpackc.low %vm4395_vm0, %vm4395_vm0  ;;  %vm4416_vm5 = vcmp.gt.f32.partialorder %v329_v8, 0.6015625  ;;  %vm4420_vm6 = vcmp.gt.f32.partialorder %v330_v6, 0.6015625  ;;  %v141_v8 = vld [vmem:[#allocation2 + $0x2c] sm:$0xf]  ;;  %v335_v6 = vunpack.c.l.bf16 %v140_v59  ;;  %vm4470_vm0 = vcmp.gt.f32.partialorder %v332_v3, 0.6015625 }
  0xd1   :  { %v2170_v15 = vpop.f32.mrf.mxu3  ;;  %vm616_vm11 = vmpackc.low %vm4420_vm6, %vm4416_vm5  ;;  %v1191_v34 = vsel %vm1095_vm4, %v231_v43, 0  ;;  %v1538_v43 = vunpack.c.l.b16 %v1193_v36  ;;  %v337_v17 = vunpack.c.l.bf16 %v141_v8  ;;  %vm4474_vm1 = vcmp.gt.f32.partialorder %v333_v4, 0.6015625 }
  0xd2   :  { %v4339_v19 = vadd.f32 %v2170_v15, %v2041_v14  ;;  %v1984_v27 = vpop.f32.mrf.mxu0  ;;  %v1747_v15 = vpack.c.b16 %v1675_v58, %v1672_v54  ;;  %v712_v39 = vsel %vm616_vm11, %v136_v56, 0  ;;  %v2453_v56 = vunpack.c.l.b16 %v713_v49  ;;  %vm1101_vm5 = vmpackc.low %vm4466_vm15, %vm4466_vm15 }
  0xd3   :  { %v2452_v0 = vunpack.c.h.b16 %v712_v39  ;;  %vm4481_vm3 = vcmp.gt.f32.partialorder %v335_v6, 0.6015625  ;;  %vm4485_vm4 = vcmp.gt.f32.partialorder %v336_v1, 0.6015625  ;;  %vm618_vm7 = vmpackc.low %vm4474_vm1, %vm4470_vm0  ;;  %vm4502_vm8 = vcmp.gt.f32.partialorder %v337_v17, 0.6015625 }
  0xd4   :  { %v2113_v28 = vpop.f32.mrf.mxu1  ;;  %vm621_vm11 = vmpackc.low %vm4502_vm8, %vm4502_vm8 }
  0xd5   :  { %v4357_v33 = vadd.f32 %v2113_v28, %v1984_v27  ;;  %2083 = vmatmul.bf16.gmra.mxu2 %v1743_v16  ;;  %2023 = vmatmul.bf16.gmra.mxu0 %v1707_v23 }
  0xd6   :  { %2212 = vmatmul.bf16.gmra.mxu3 %v1744_v20  ;;  %v1711_v20 = vpack.c.b16 %v1603_v2, %v1600_v61  ;;  %v2451_v61 = vunpack.c.l.b16 %v712_v39  ;;  %v2450_v2 = vunpack.c.l.b16 %v711_v48  ;;  %v1197_v39 = vsel %vm1101_vm5, %v237_v41, 0  ;;  %v241_v48 = vld [vmem:[#allocation5 + $0x44] sm:$0xf] }
  0xd7   :  { %2152 = vmatmul.bf16.gmra.mxu1 %v1708_v24  ;;  %v823_v41 = vunpack.c.l.bf16 %v241_v48 }
  0xd8   :  { %v2044_v37 = vpop.f32.mrf.mxu2 }
  0xd9   :  { %v2173_v38 = vpop.f32.mrf.mxu3  ;;  %vm4531_vm13 = vcmp.gt.f32.partialorder %v823_v41, 0.6015625 }
  0xda   :  { %v4391_v40 = vadd.f32 %v2173_v38, %v2044_v37  ;;  %v1986_v46 = vpop.f32.mrf.mxu0  ;;  %v710_v37 = vsel %vm614_vm9, %v134_v51, 0  ;;  %v235_v38 = vld [vmem:[#allocation5 + $0x20] sm:$0xf]  ;;  %vm620_vm9 = vmpackc.low %vm4485_vm4, %vm4481_vm3 }
  0xdb   :  { %v2448_v55 = vunpack.c.l.b16 %v710_v37  ;;  %v814_v58 = vunpack.c.l.bf16 %v235_v38  ;;  %v2449_v62 = vunpack.c.h.b16 %v710_v37  ;;  %v139_v51 = vld [vmem:[#allocation2 + $0x20] sm:$0xf]  ;;  %vm1105_vm3 = vmpackc.low %vm4531_vm13, %vm4531_vm13 }
  0xdc   :  { %v2115_v47 = vpop.f32.mrf.mxu1  ;;  %v334_v12 = vunpack.c.l.bf16 %v139_v51 }
  0xdd   :  { %v4393_v52 = vadd.f32 %v2115_v47, %v1986_v46  ;;  %v1535_v47 = vunpack.c.l.b16 %v1191_v34  ;;  %vm4460_vm14 = vcmp.gt.f32.partialorder %v814_v58, 0.6015625 }
  0xde   :  { %vm1099_vm2 = vmpackc.low %vm4460_vm14, %vm4460_vm14  ;;  %vm4494_vm6 = vcmp.gt.f32.partialorder %v334_v12, 0.6015625 }
  0xdf   :  { %vm619_vm10 = vmpackc.low %vm4494_vm6, %vm4494_vm6  ;;  %v1195_v36 = vsel %vm1099_vm2, %v235_v38, 0  ;;  %v1544_v38 = vunpack.c.l.b16 %v1197_v39 }
  0xe0   :  { %v2046_v9 = vpop.f32.mrf.mxu2  ;;  %v715_v58 = vsel %vm619_vm10, %v139_v51, 0 }
  0xe1   :  { %v2175_v10 = vpop.f32.mrf.mxu3  ;;  %v2456_v1 = vunpack.c.l.b16 %v715_v58  ;;  %v1201_v58 = vsel %vm1105_vm3, %v241_v48, 0 }
  0xe2   :  { %v4399_v14 = vadd.f32 %v2175_v10, %v2046_v9  ;;  %v1989_v23 = vpop.f32.mrf.mxu0  ;;  %v1679_v10 = vpack.c.b16 %v1538_v43, %v1535_v47  ;;  %v716_v47 = vsel %vm620_vm9, %v140_v59, 0 }
  0xe3   :  { %v2457_v3 = vunpack.c.l.b16 %v716_v47  ;;  %v2458_v6 = vunpack.c.h.b16 %v716_v47 }
  0xe4   :  { %6140 = vst [vmem:[#allocation15_spill] sm:$0xff] %v4399_v14  ;;  %v2118_v24 = vpop.f32.mrf.mxu1 }
  0xe5   :  { %v4424_v27 = vadd.f32 %v2118_v24, %v1989_v23  ;;  %2088 = vmatmul.bf16.gmra.mxu2 %v1746_v11  ;;  %2028 = vmatmul.bf16.gmra.mxu0 %v1710_v18  ;;  %v2593_v18 = vpack.c.b16 %v2452_v0, %v2449_v62  ;;  %v142_v62 = vld [vmem:[#allocation2 + $0x30] sm:$0xff] }
  0xe6   :  { %2217 = vmatmul.bf16.gmra.mxu3 %v1747_v15  ;;  %v2592_v15 = vpack.c.b16 %v2451_v61, %v2448_v55  ;;  %v1541_v55 = vunpack.c.l.b16 %v1195_v36  ;;  %v717_v61 = vsel %vm621_vm11, %v141_v8, 0 }
  0xe7   :  { %2157 = vmatmul.bf16.gmra.mxu1 %v1711_v20  ;;  %v2594_v20 = vpack.c.b16 %v2453_v56, %v2450_v2  ;;  %v144_v56 = vld [vmem:[#allocation2 + $0x3c] sm:$0xff]  ;;  %v2459_v59 = vunpack.c.l.b16 %v717_v61 }
  0xe8   :  { %v2049_v31 = vpop.f32.mrf.mxu2  ;;  %v341_v11 = vunpack.c.l.bf16 %v144_v56  ;;  %v342_v51 = vunpack.c.h.bf16 %v144_v56 }
  0xe9   :  { %v2178_v32 = vpop.f32.mrf.mxu3 }
  0xea   :  { %v4456_v35 = vadd.f32 %v2178_v32, %v2049_v31  ;;  %v1991_v44 = vpop.f32.mrf.mxu0  ;;  %vm4546_vm1 = vcmp.gt.f32.partialorder %v341_v11, 0.6015625  ;;  %vm4550_vm2 = vcmp.gt.f32.partialorder %v342_v51, 0.6015625  ;;  %v148_v51 = vld [vmem:[#allocation2 + $0x54] sm:$0xff] }
  0xec   :  { %6155 = vst [vmem:[#allocation16_spill] sm:$0xff] %v4456_v35  ;;  %v2120_v46 = vpop.f32.mrf.mxu1 }
  0xed   :  { %v4458_v54 = vadd.f32 %v2120_v46, %v1991_v44  ;;  %v714_v44 = vsel %vm618_vm7, %v138_v53, 0  ;;  %v239_v46 = vld [vmem:[#allocation5 + $0x38] sm:$0xf]  ;;  %vm624_vm7 = vmpackc.low %vm4550_vm2, %vm4546_vm1 }
  0xee   :  { %v2454_v45 = vunpack.c.l.b16 %v714_v44  ;;  %v820_v2 = vunpack.c.l.bf16 %v239_v46  ;;  %v2455_v4 = vunpack.c.h.b16 %v714_v44  ;;  %v143_v53 = vld [vmem:[#allocation2 + $0x38] sm:$0xf] }
  0xef   :  { %v340_v17 = vunpack.c.l.bf16 %v143_v53 }
  0xf0   :  { %v2051_v5 = vpop.f32.mrf.mxu2  ;;  %vm4525_vm12 = vcmp.gt.f32.partialorder %v820_v2, 0.6015625  ;;  %v245_v2 = vld [vmem:[#allocation5 + $0x5c] sm:$0xf] }
  0xf1   :  { %v2180_v9 = vpop.f32.mrf.mxu3  ;;  %vm1103_vm0 = vmpackc.low %vm4525_vm12, %vm4525_vm12  ;;  %vm4559_vm4 = vcmp.gt.f32.partialorder %v340_v17, 0.6015625  ;;  %v829_v48 = vunpack.c.l.bf16 %v245_v2 }
  0xf2   :  { %v4464_v13 = vadd.f32 %v2180_v9, %v2051_v5  ;;  %v1994_v23 = vpop.f32.mrf.mxu0  ;;  %v338_v5 = vunpack.c.l.bf16 %v142_v62  ;;  %v339_v9 = vunpack.c.h.bf16 %v142_v62  ;;  %vm623_vm8 = vmpackc.low %vm4559_vm4, %vm4559_vm4 }
  0xf3   :  { %v719_v41 = vsel %vm623_vm8, %v143_v53, 0  ;;  %v348_v53 = vunpack.c.h.bf16 %v148_v51  ;;  %vm4596_vm11 = vcmp.gt.f32.partialorder %v829_v48, 0.6015625  ;;  %v249_v48 = vld [vmem:[#allocation5 + $0x74] sm:$0xf] }
  0xf4   :  { %6158 = vst [vmem:[#allocation17_spill] sm:$0xff] %v4464_v13  ;;  %v2123_v24 = vpop.f32.mrf.mxu1  ;;  %vm4535_vm14 = vcmp.gt.f32.partialorder %v338_v5, 0.6015625  ;;  %vm4539_vm15 = vcmp.gt.f32.partialorder %v339_v9, 0.6015625  ;;  %v2462_v16 = vunpack.c.l.b16 %v719_v41  ;;  %vm1109_vm1 = vmpackc.low %vm4596_vm11, %vm4596_vm11 }
  0xf5   :  { %v4489_v28 = vadd.f32 %v2123_v24, %v1994_v23  ;;  %2231 = vmatmul.bf16.vlgmr.msrb.gmra.mxu2 %v1679_v10  ;;  %3017 = vmatmul.bf16.vlgmr.msrb.gmra.mxu0 %v2593_v18  ;;  %v145_v10 = vld [vmem:[#allocation2 + $0x44] sm:$0xf]  ;;  %v2596_v23 = vpack.c.b16 %v2458_v6, %v2455_v4  ;;  %v2597_v24 = vpack.c.b16 %v2459_v59, %v2456_v1  ;;  %vm622_vm5 = vmpackc.low %vm4539_vm15, %vm4535_vm14  ;;  %v146_v59 = vld [vmem:[#allocation2 + $0x48] sm:$0xff] }
  0xf6   :  { %2888 = vmatmul.bf16.vlgmr.msrb.gmra.mxu3 %v2592_v15  ;;  %v1682_v15 = vpack.c.b16 %v1544_v38, %v1541_v55  ;;  %v343_v22 = vunpack.c.l.bf16 %v145_v10  ;;  %v718_v61 = vsel %vm622_vm5, %v142_v62, 0  ;;  %v243_v38 = vld [vmem:[#allocation5 + $0x50] sm:$0xf]  ;;  %v344_v17 = vunpack.c.l.bf16 %v146_v59 }
  0xf7   :  { %3146 = vmatmul.bf16.vlgmr.msrb.gmra.mxu1 %v2594_v20  ;;  %v2595_v20 = vpack.c.b16 %v2457_v3, %v2454_v45  ;;  %v720_v45 = vsel %vm624_vm7, %v144_v56, 0  ;;  %v2460_v9 = vunpack.c.l.b16 %v718_v61  ;;  %v826_v11 = vunpack.c.l.bf16 %v243_v38  ;;  %v147_v62 = vld [vmem:[#allocation2 + $0x50] sm:$0xf] }
  0xf8   :  { %v2054_v32 = vpop.f32.mrf.mxu2  ;;  %vm4567_vm6 = vcmp.gt.f32.partialorder %v343_v22, 0.6015625  ;;  %v347_v22 = vunpack.c.l.bf16 %v148_v51  ;;  %v346_v26 = vunpack.c.l.bf16 %v147_v62  ;;  %vm4600_vm12 = vcmp.gt.f32.partialorder %v344_v17, 0.6015625 }
  0xf9   :  { %v2183_v34 = vpop.f32.mrf.mxu3  ;;  %vm625_vm9 = vmpackc.low %vm4567_vm6, %vm4567_vm6  ;;  %vm4590_vm10 = vcmp.gt.f32.partialorder %v826_v11, 0.6015625  ;;  %v1205_v11 = vsel %vm1109_vm1, %v245_v2, 0  ;;  %v835_v2 = vunpack.c.l.bf16 %v249_v48 }
  0xfa   :  { %v4521_v37 = vadd.f32 %v2183_v34, %v2054_v32  ;;  %v1996_v49 = vpop.f32.mrf.mxu0  ;;  %v721_v1 = vsel %vm625_vm9, %v145_v10, 0  ;;  %v349_v34 = vunpack.c.l.bf16 %v149_v21  ;;  %vm1107_vm14 = vmpackc.low %vm4590_vm10, %vm4590_vm10  ;;  %vm4611_vm15 = vcmp.gt.f32.partialorder %v347_v22, 0.6015625 }
  0xfb   :  { %v2465_v56 = vunpack.c.l.b16 %v721_v1  ;;  %vm4624_vm2 = vcmp.gt.f32.partialorder %v346_v26, 0.6015625  ;;  %vm4661_vm9 = vcmp.gt.f32.partialorder %v835_v2, 0.6015625 }
  0xfc   :  { %6173 = vst [vmem:[#allocation18_spill] sm:$0xff] %v4521_v37  ;;  %v2125_v43 = vpop.f32.mrf.mxu1  ;;  %vm4632_vm4 = vcmp.gt.f32.partialorder %v349_v34, 0.6015625  ;;  %vm627_vm6 = vmpackc.low %vm4624_vm2, %vm4624_vm2 }
  0xfd   :  { %v4523_v0 = vadd.f32 %v2125_v43, %v1996_v49  ;;  %v1199_v43 = vsel %vm1103_vm0, %v239_v46, 0  ;;  %v1550_v46 = vunpack.c.l.b16 %v1201_v58  ;;  %v2600_v44 = vpack.c.b16 %v2465_v56, %v2462_v16  ;;  %vm629_vm7 = vmpackc.low %vm4632_vm4, %vm4632_vm4 }
  0xfe   :  { %v1547_v6 = vunpack.c.l.b16 %v1199_v43  ;;  %vm4615_vm0 = vcmp.gt.f32.partialorder %v348_v53, 0.6015625  ;;  %v725_v22 = vsel %vm629_vm7, %v149_v21, 0  ;;  %v150_v53 = vld [vmem:[#allocation2 + $0x60] sm:$0xff] }
  0xff   :  { %vm628_vm5 = vmpackc.low %vm4615_vm0, %vm4611_vm15 }
 0x100   :  { %v2056_v8 = vpop.f32.mrf.mxu2  ;;  %vm1113_vm15 = vmpackc.low %vm4661_vm9, %vm4661_vm9 }
 0x101   :  { %v2185_v12 = vpop.f32.mrf.mxu3  ;;  %v1209_v2 = vsel %vm1113_vm15, %v249_v48, 0 }
 0x102   :  { %v4529_v18 = vadd.f32 %v2185_v12, %v2056_v8  ;;  %v1999_v29 = vpop.f32.mrf.mxu0  ;;  %v2463_v8 = vunpack.c.l.b16 %v720_v45  ;;  %v2461_v12 = vunpack.c.h.b16 %v718_v61 }
 0x104   :  { %6176 = vst [vmem:[#allocation19_spill] sm:$0xff] %v4529_v18  ;;  %v2128_v31 = vpop.f32.mrf.mxu1 }
 0x105   :  { %v4554_v36 = vadd.f32 %v2128_v31, %v1999_v29  ;;  %2236 = vmatmul.bf16.gmra.mxu2 %v1682_v15  ;;  %3022 = vmatmul.bf16.gmra.mxu0 %v2596_v23  ;;  %v2464_v15 = vunpack.c.h.b16 %v720_v45  ;;  %v2598_v31 = vpack.c.b16 %v2463_v8, %v2460_v9 }
 0x106   :  { %2893 = vmatmul.bf16.gmra.mxu3 %v2595_v20  ;;  %v345_v20 = vunpack.c.h.bf16 %v146_v59 }
 0x107   :  { %3151 = vmatmul.bf16.gmra.mxu1 %v2597_v24  ;;  %v1685_v24 = vpack.c.b16 %v1550_v46, %v1547_v6  ;;  %v2599_v39 = vpack.c.b16 %v2464_v15, %v2461_v12  ;;  %v1203_v46 = vsel %vm1107_vm14, %v243_v38, 0  ;;  %v247_v12 = vld [vmem:[#allocation5 + $0x68] sm:$0xf]  ;;  %v724_v15 = vsel %vm628_vm5, %v148_v51, 0 }
 0x108   :  { %v2059_v47 = vpop.f32.mrf.mxu2  ;;  %vm4604_vm13 = vcmp.gt.f32.partialorder %v345_v20, 0.6015625  ;;  %v1553_v17 = vunpack.c.l.b16 %v1203_v46  ;;  %v723_v20 = vsel %vm627_vm6, %v147_v62, 0  ;;  %v1556_v38 = vunpack.c.l.b16 %v1205_v11 }
 0x109   :  { %v2188_v49 = vpop.f32.mrf.mxu3  ;;  %vm626_vm3 = vmpackc.low %vm4604_vm13, %vm4600_vm12  ;;  %v2469_v26 = vunpack.c.l.b16 %v724_v15  ;;  %v2470_v32 = vunpack.c.h.b16 %v724_v15  ;;  %v2468_v34 = vunpack.c.l.b16 %v723_v20  ;;  %v2471_v51 = vunpack.c.l.b16 %v725_v22 }
 0x10a   :  { %v4586_v55 = vadd.f32 %v2188_v49, %v2059_v47  ;;  %v2001_v3 = vpop.f32.mrf.mxu0  ;;  %v722_v8 = vsel %vm626_vm3, %v146_v59, 0  ;;  %v151_v59 = vld [vmem:[#allocation2 + $0x68] sm:$0xf]  ;;  %v153_v47 = vld [vmem:[#allocation2 + $0x74] sm:$0xf]  ;;  %v353_v49 = vunpack.c.l.bf16 %v152_v25  ;;  %v354_v62 = vunpack.c.h.bf16 %v152_v25 }
 0x10b   :  { %v352_v45 = vunpack.c.l.bf16 %v151_v59  ;;  %v2603_v11 = vpack.c.b16 %v2471_v51, %v2468_v34  ;;  %v251_v51 = vld [vmem:[#allocation5 + $0x80] sm:$0xf] }
 0x10c   :  { %6191 = vst [vmem:[#allocation20_spill] sm:$0xff] %v4586_v55  ;;  %v2130_v4 = vpop.f32.mrf.mxu1  ;;  %vm4676_vm13 = vcmp.gt.f32.partialorder %v353_v49, 0.6015625  ;;  %vm4680_vm14 = vcmp.gt.f32.partialorder %v354_v62, 0.6015625 }
 0x10d   :  { %v4588_v5 = vadd.f32 %v2130_v4, %v2001_v3  ;;  %vm4689_vm0 = vcmp.gt.f32.partialorder %v352_v45, 0.6015625  ;;  %vm632_vm3 = vmpackc.low %vm4680_vm14, %vm4676_vm13  ;;  %v154_v45 = vld [vmem:[#allocation2 + $0x78] sm:$0xff] }
 0x10e   :  { %vm631_vm4 = vmpackc.low %vm4689_vm0, %vm4689_vm0 }
 0x110   :  { %v2061_v10 = vpop.f32.mrf.mxu2 }
 0x111   :  { %v2190_v23 = vpop.f32.mrf.mxu3 }
 0x112   :  { %v4594_v29 = vadd.f32 %v2190_v23, %v2061_v10  ;;  %v2004_v43 = vpop.f32.mrf.mxu0  ;;  %v2466_v23 = vunpack.c.l.b16 %v722_v8 }
 0x114   :  { %6194 = vst [vmem:[#allocation21_spill] sm:$0xff] %v4594_v29  ;;  %v2133_v58 = vpop.f32.mrf.mxu1  ;;  %v2601_v6 = vpack.c.b16 %v2469_v26, %v2466_v23 }
 0x115   :  { %v4619_v3 = vadd.f32 %v2133_v58, %v2004_v43  ;;  %2241 = vmatmul.bf16.gmra.mxu2 %v1685_v24  ;;  %3027 = vmatmul.bf16.gmra.mxu0 %v2599_v39  ;;  %v832_v24 = vunpack.c.l.bf16 %v247_v12  ;;  %v350_v39 = vunpack.c.l.bf16 %v150_v53  ;;  %v1688_v58 = vpack.c.b16 %v1556_v38, %v1553_v17  ;;  %v157_v17 = vld [vmem:[#allocation2 + $0x8c] sm:$0xf] }
 0x116   :  { %2898 = vmatmul.bf16.gmra.mxu3 %v2598_v31  ;;  %v2467_v31 = vunpack.c.h.b16 %v722_v8 }
 0x117   :  { %3156 = vmatmul.bf16.gmra.mxu1 %v2600_v44  ;;  %v351_v44 = vunpack.c.h.bf16 %v150_v53  ;;  %vm4655_vm8 = vcmp.gt.f32.partialorder %v832_v24, 0.6015625  ;;  %vm4665_vm10 = vcmp.gt.f32.partialorder %v350_v39, 0.6015625  ;;  %v728_v39 = vsel %vm632_vm3, %v152_v25, 0 }
 0x118   :  { %v2064_v41 = vpop.f32.mrf.mxu2  ;;  %v2602_v46 = vpack.c.b16 %v2470_v32, %v2467_v31  ;;  %vm1111_vm12 = vmpackc.low %vm4655_vm8, %vm4655_vm8  ;;  %v2476_v8 = vunpack.c.h.b16 %v728_v39 }
 0x119   :  { %v2193_v1 = vpop.f32.mrf.mxu3  ;;  %vm4669_vm11 = vcmp.gt.f32.partialorder %v351_v44, 0.6015625  ;;  %v1207_v31 = vsel %vm1111_vm12, %v247_v12, 0  ;;  %v253_v44 = vld [vmem:[#allocation5 + $0x8c] sm:$0xf]  ;;  %v1562_v12 = vunpack.c.l.b16 %v1209_v2 }
 0x11a   :  { %v4651_v9 = vadd.f32 %v2193_v1, %v2064_v41  ;;  %v2006_v16 = vpop.f32.mrf.mxu0  ;;  %v355_v1 = vunpack.c.l.bf16 %v153_v47  ;;  %vm630_vm1 = vmpackc.low %vm4669_vm11, %vm4665_vm10  ;;  %v838_v41 = vunpack.c.l.bf16 %v251_v51  ;;  %v841_v48 = vunpack.c.l.bf16 %v253_v44 }
 0x11b   :  { %v726_v34 = vsel %vm630_vm1, %v150_v53, 0  ;;  %v155_v53 = vld [vmem:[#allocation2 + $0x80] sm:$0xf] }
 0x11c   :  { %6209 = vst [vmem:[#allocation22_spill] sm:$0xff] %v4651_v9  ;;  %v2135_v56 = vpop.f32.mrf.mxu1  ;;  %vm4697_vm2 = vcmp.gt.f32.partialorder %v355_v1, 0.6015625  ;;  %v156_v1 = vld [vmem:[#allocation2 + $0x84] sm:$0xff]  ;;  %vm4720_vm6 = vcmp.gt.f32.partialorder %v838_v41, 0.6015625  ;;  %vm4726_vm7 = vcmp.gt.f32.partialorder %v841_v48, 0.6015625 }
 0x11d   :  { %v4653_v10 = vadd.f32 %v2135_v56, %v2006_v16  ;;  %vm633_vm5 = vmpackc.low %vm4697_vm2, %vm4697_vm2  ;;  %v359_v20 = vunpack.c.l.bf16 %v156_v1 }
 0x11e   :  { %vm1115_vm10 = vmpackc.low %vm4720_vm6, %vm4720_vm6 }
 0x11f   :  { %vm4741_vm11 = vcmp.gt.f32.partialorder %v359_v20, 0.6015625  ;;  %vm1117_vm13 = vmpackc.low %vm4726_vm7, %vm4726_vm7 }
 0x120   :  { %v2066_v21 = vpop.f32.mrf.mxu2 }
 0x121   :  { %v2195_v43 = vpop.f32.mrf.mxu3 }
 0x122   :  { %v4659_v4 = vadd.f32 %v2195_v43, %v2066_v21  ;;  %v2009_v16 = vpop.f32.mrf.mxu0  ;;  %v1559_v21 = vunpack.c.l.b16 %v1207_v31  ;;  %v727_v43 = vsel %vm631_vm4, %v151_v59, 0  ;;  %v360_v59 = vunpack.c.h.bf16 %v156_v1 }
 0x123   :  { %v2474_v15 = vunpack.c.l.b16 %v727_v43 }
 0x124   :  { %6212 = vst [vmem:[#allocation23_spill] sm:$0xff] %v4659_v4  ;;  %v2138_v56 = vpop.f32.mrf.mxu1  ;;  %v1691_v23 = vpack.c.b16 %v1562_v12, %v1559_v21  ;;  %vm4745_vm12 = vcmp.gt.f32.partialorder %v360_v59, 0.6015625  ;;  %v255_v59 = vld [vmem:[#allocation5 + $0x98] sm:$0xf]  ;;  %v160_v21 = vld [vmem:[#allocation2 + $0x9c] sm:$0xff] }
 0x125   :  { %v4684_v22 = vadd.f32 %v2138_v56, %v2009_v16  ;;  %2246 = vmatmul.bf16.gmra.mxu2 %v1688_v58  ;;  %3032 = vmatmul.bf16.gmra.mxu0 %v2602_v46  ;;  %v729_v58 = vsel %vm633_vm5, %v153_v47, 0  ;;  %v2475_v46 = vunpack.c.l.b16 %v728_v39  ;;  %v356_v16 = vunpack.c.l.bf16 %v154_v45  ;;  %vm636_vm1 = vmpackc.low %vm4745_vm12, %vm4741_vm11 }
 0x126   :  { %2903 = vmatmul.bf16.gmra.mxu3 %v2601_v6  ;;  %v2472_v6 = vunpack.c.l.b16 %v726_v34  ;;  %v2477_v25 = vunpack.c.l.b16 %v729_v58  ;;  %v357_v56 = vunpack.c.h.bf16 %v154_v45  ;;  %v361_v39 = vunpack.c.l.bf16 %v157_v17 }
 0x127   :  { %3161 = vmatmul.bf16.gmra.mxu1 %v2603_v11  ;;  %v2473_v11 = vunpack.c.h.b16 %v726_v34  ;;  %vm4730_vm8 = vcmp.gt.f32.partialorder %v356_v16, 0.6015625  ;;  %v844_v43 = vunpack.c.l.bf16 %v255_v59 }
 0x128   :  { %v2069_v24 = vpop.f32.mrf.mxu2  ;;  %v2604_v2 = vpack.c.b16 %v2475_v46, %v2472_v6  ;;  %vm4734_vm9 = vcmp.gt.f32.partialorder %v357_v56, 0.6015625  ;;  %vm4762_vm0 = vcmp.gt.f32.partialorder %v361_v39, 0.6015625  ;;  %v1213_v56 = vsel %vm1117_vm13, %v253_v44, 0 }
 0x129   :  { %v2198_v26 = vpop.f32.mrf.mxu3  ;;  %vm634_vm15 = vmpackc.low %vm4734_vm9, %vm4730_vm8  ;;  %vm4785_vm4 = vcmp.gt.f32.partialorder %v844_v43, 0.6015625 }
 0x12a   :  { %v4716_v32 = vadd.f32 %v2198_v26, %v2069_v24  ;;  %v2011_v49 = vpop.f32.mrf.mxu0  ;;  %v358_v26 = vunpack.c.l.bf16 %v155_v53  ;;  %vm637_vm3 = vmpackc.low %vm4762_vm0, %vm4762_vm0  ;;  %v730_v20 = vsel %vm634_vm15, %v154_v45, 0  ;;  %v159_v45 = vld [vmem:[#allocation2 + $0x98] sm:$0xf] }
 0x12b   :  { %v733_v39 = vsel %vm637_vm3, %v157_v17, 0  ;;  %vm1119_vm8 = vmpackc.low %vm4785_vm4, %vm4785_vm4 }
 0x12c   :  { %6227 = vst [vmem:[#allocation24_spill] sm:$0xff] %v4716_v32  ;;  %v2140_v62 = vpop.f32.mrf.mxu1  ;;  %vm4754_vm14 = vcmp.gt.f32.partialorder %v358_v26, 0.6015625 }
 0x12d   :  { %v4718_v61 = vadd.f32 %v2140_v62, %v2011_v49  ;;  %v2605_v49 = vpack.c.b16 %v2476_v8, %v2473_v11  ;;  %v2606_v62 = vpack.c.b16 %v2477_v25, %v2474_v15  ;;  %vm635_vm2 = vmpackc.low %vm4754_vm14, %vm4754_vm14  ;;  %v1211_v25 = vsel %vm1115_vm10, %v251_v51, 0 }
 0x12e   :  { %v731_v34 = vsel %vm635_vm2, %v155_v53, 0  ;;  %v1568_v51 = vunpack.c.l.b16 %v1213_v56  ;;  %v366_v53 = vunpack.c.h.bf16 %v160_v21 }
 0x12f   :  { %v2480_v41 = vunpack.c.l.b16 %v731_v34 }
 0x130   :  { %v2071_v47 = vpop.f32.mrf.mxu2  ;;  %vm4810_vm10 = vcmp.gt.f32.partialorder %v366_v53, 0.6015625 }
 0x131   :  { %v2200_v38 = vpop.f32.mrf.mxu3 }
 0x132   :  { %v4724_v31 = vadd.f32 %v2200_v38, %v2071_v47  ;;  %v2014_v58 = vpop.f32.mrf.mxu0  ;;  %v732_v47 = vsel %vm636_vm1, %v156_v1, 0  ;;  %v257_v38 = vld [vmem:[#allocation5 + $0xa4] sm:$0xf]  ;;  %v2483_v1 = vunpack.c.l.b16 %v733_v39 }
 0x133   :  { %v2482_v6 = vunpack.c.h.b16 %v732_v47  ;;  %v847_v44 = vunpack.c.l.bf16 %v257_v38 }
 0x134   :  { %6230 = vst [vmem:[#allocation25_spill] sm:$0xff] %v4724_v31  ;;  %v2143_v12 = vpop.f32.mrf.mxu1  ;;  %v2609_v31 = vpack.c.b16 %v2483_v1, %v2480_v41  ;;  %v1215_v1 = vsel %vm1119_vm8, %v255_v59, 0 }
 0x135   :  { %v4749_v46 = vadd.f32 %v2143_v12, %v2014_v58  ;;  %2251 = vmatmul.bf16.gmra.mxu2 %v1691_v23  ;;  %3037 = vmatmul.bf16.gmra.mxu0 %v2605_v49  ;;  %v158_v49 = vld [vmem:[#allocation2 + $0x90] sm:$0xff]  ;;  %v2481_v58 = vunpack.c.l.b16 %v732_v47  ;;  %v2479_v12 = vunpack.c.h.b16 %v730_v20  ;;  %vm4791_vm5 = vcmp.gt.f32.partialorder %v847_v44, 0.6015625 }
 0x136   :  { %2908 = vmatmul.bf16.gmra.mxu3 %v2604_v2  ;;  %v1565_v2 = vunpack.c.l.b16 %v1211_v25  ;;  %v362_v11 = vunpack.c.l.bf16 %v158_v49  ;;  %v363_v8 = vunpack.c.h.bf16 %v158_v49  ;;  %vm1121_vm11 = vmpackc.low %vm4791_vm5, %vm4791_vm5 }
 0x137   :  { %3166 = vmatmul.bf16.gmra.mxu1 %v2606_v62  ;;  %v2478_v62 = vunpack.c.l.b16 %v730_v20  ;;  %v2608_v39 = vpack.c.b16 %v2482_v6, %v2479_v12 }
 0x138   :  { %v2074_v48 = vpop.f32.mrf.mxu2  ;;  %vm4795_vm6 = vcmp.gt.f32.partialorder %v362_v11, 0.6015625  ;;  %vm4799_vm7 = vcmp.gt.f32.partialorder %v363_v8, 0.6015625  ;;  %v1217_v11 = vsel %vm1121_vm11, %v257_v38, 0 }
 0x139   :  { %v2203_v15 = vpop.f32.mrf.mxu3  ;;  %v2607_v20 = vpack.c.b16 %v2481_v58, %v2478_v62  ;;  %vm638_vm13 = vmpackc.low %vm4799_vm7, %vm4795_vm6  ;;  %v1574_v59 = vunpack.c.l.b16 %v1217_v11 }
 0x13a   :  { %v4781_v16 = vadd.f32 %v2203_v15, %v2074_v48  ;;  %v2016_v23 = vpop.f32.mrf.mxu0  ;;  %v161_v48 = vld [vmem:[#allocation2 + $0xa4] sm:$0xf]  ;;  %v365_v15 = vunpack.c.l.bf16 %v160_v21  ;;  %v734_v8 = vsel %vm638_vm13, %v158_v49, 0  ;;  %v163_v49 = vld [vmem:[#allocation2 + $0xb0] sm:$0xf] }
 0x13b   :  { %v367_v34 = vunpack.c.l.bf16 %v161_v48  ;;  %v2485_v62 = vunpack.c.h.b16 %v734_v8 }
 0x13c   :  { %6245 = vst [vmem:[#allocation26_spill] sm:$0xff] %v4781_v16  ;;  %v2145_v26 = vpop.f32.mrf.mxu1  ;;  %vm4806_vm9 = vcmp.gt.f32.partialorder %v365_v15, 0.6015625  ;;  %v259_v15 = vld [vmem:[#allocation5 + $0xb0] sm:$0xf] }
 0x13d   :  { %v4783_v24 = vadd.f32 %v2145_v26, %v2016_v23  ;;  %v1694_v23 = vpack.c.b16 %v1568_v51, %v1565_v2  ;;  %v364_v26 = vunpack.c.l.bf16 %v159_v45  ;;  %vm4827_vm14 = vcmp.gt.f32.partialorder %v367_v34, 0.6015625  ;;  %vm640_vm15 = vmpackc.low %vm4810_vm10, %vm4806_vm9  ;;  %v162_v34 = vld [vmem:[#allocation2 + $0xa8] sm:$0xff] }
 0x13e   :  { %vm641_vm1 = vmpackc.low %vm4827_vm14, %vm4827_vm14  ;;  %v736_v53 = vsel %vm640_vm15, %v160_v21, 0  ;;  %v850_v2 = vunpack.c.l.bf16 %v259_v15  ;;  %v368_v44 = vunpack.c.l.bf16 %v162_v34 }
 0x13f   :  { %vm4819_vm12 = vcmp.gt.f32.partialorder %v364_v26, 0.6015625  ;;  %v1571_v26 = vunpack.c.l.b16 %v1215_v1  ;;  %v737_v47 = vsel %vm641_vm1, %v161_v48, 0  ;;  %v2488_v58 = vunpack.c.h.b16 %v736_v53 }
 0x140   :  { %v2076_v17 = vpop.f32.mrf.mxu2  ;;  %vm639_vm0 = vmpackc.low %vm4819_vm12, %vm4819_vm12  ;;  %v2489_v21 = vunpack.c.l.b16 %v737_v47  ;;  %vm4850_vm2 = vcmp.gt.f32.partialorder %v850_v2, 0.6015625  ;;  %vm4860_vm4 = vcmp.gt.f32.partialorder %v368_v44, 0.6015625 }
 0x141   :  { %v2205_v25 = vpop.f32.mrf.mxu3  ;;  %v2611_v47 = vpack.c.b16 %v2488_v58, %v2485_v62  ;;  %vm1123_vm6 = vmpackc.low %vm4850_vm2, %vm4850_vm2 }
 0x142   :  { %v4789_v16 = vadd.f32 %v2205_v25, %v2076_v17  ;;  %v2019_v51 = vpop.f32.mrf.mxu0  ;;  %v261_v17 = vld [vmem:[#allocation5 + $0xbc] sm:$0xf] }
 0x143   :  { %v853_v38 = vunpack.c.l.bf16 %v261_v17 }
 0x144   :  { %6248 = vst [vmem:[#allocation27_spill] sm:$0xff] %v4789_v16  ;;  %v2148_v43 = vpop.f32.mrf.mxu1 }
 0x145   :  { %v4814_v12 = vadd.f32 %v2148_v43, %v2019_v51  ;;  %2256 = vmatmul.bf16.gmra.mxu2 %v1694_v23  ;;  %3042 = vmatmul.bf16.gmra.mxu0 %v2608_v39  ;;  %v2484_v39 = vunpack.c.l.b16 %v734_v8  ;;  %v164_v51 = vld [vmem:[#allocation2 + $0xb4] sm:$0xff]  ;;  %v2487_v43 = vunpack.c.l.b16 %v736_v53  ;;  %vm4856_vm3 = vcmp.gt.f32.partialorder %v853_v38, 0.6015625 }
 0x146   :  { %2913 = vmatmul.bf16.gmra.mxu3 %v2607_v20  ;;  %v735_v20 = vsel %vm639_vm0, %v159_v45, 0  ;;  %v371_v1 = vunpack.c.l.bf16 %v164_v51  ;;  %v372_v45 = vunpack.c.h.bf16 %v164_v51  ;;  %vm1125_vm9 = vmpackc.low %vm4856_vm3, %vm4856_vm3 }
 0x147   :  { %3171 = vmatmul.bf16.gmra.mxu1 %v2609_v31  ;;  %v2486_v6 = vunpack.c.l.b16 %v735_v20  ;;  %v2610_v8 = vpack.c.b16 %v2487_v43, %v2484_v39 }
 0x148   :  { %v2079_v41 = vpop.f32.mrf.mxu2  ;;  %vm4871_vm7 = vcmp.gt.f32.partialorder %v371_v1, 0.6015625  ;;  %vm4875_vm8 = vcmp.gt.f32.partialorder %v372_v45, 0.6015625  ;;  %v265_v45 = vld [vmem:[#allocation5 + $0xd4] sm:$0xf] }
 0x149   :  { %v2208_v32 = vpop.f32.mrf.mxu3  ;;  %v2612_v4 = vpack.c.b16 %v2489_v21, %v2486_v6  ;;  %vm644_vm13 = vmpackc.low %vm4875_vm8, %vm4871_vm7  ;;  %v1219_v6 = vsel %vm1123_vm6, %v259_v15, 0  ;;  %v1221_v21 = vsel %vm1125_vm9, %v261_v17, 0  ;;  %v859_v17 = vunpack.c.l.bf16 %v265_v45 }
 0x14a   :  { %v4846_v31 = vadd.f32 %v2208_v32, %v2079_v41  ;;  %v2021_v25 = vpop.f32.mrf.mxu0  ;;  %v369_v41 = vunpack.c.h.bf16 %v162_v34  ;;  %v165_v32 = vld [vmem:[#allocation2 + $0xbc] sm:$0xf]  ;;  %v740_v1 = vsel %vm644_vm13, %v164_v51, 0  ;;  %v1580_v15 = vunpack.c.l.b16 %v1221_v21 }
 0x14b   :  { %v373_v20 = vunpack.c.l.bf16 %v165_v32  ;;  %v2494_v39 = vunpack.c.h.b16 %v740_v1  ;;  %vm4921_vm1 = vcmp.gt.f32.partialorder %v859_v17, 0.6015625 }
 0x14c   :  { %6263 = vst [vmem:[#allocation28_spill] sm:$0xff] %v4846_v31  ;;  %v2150_v23 = vpop.f32.mrf.mxu1  ;;  %vm4864_vm5 = vcmp.gt.f32.partialorder %v369_v41, 0.6015625  ;;  %v263_v41 = vld [vmem:[#allocation5 + $0xc8] sm:$0xf]  ;;  %vm1129_vm7 = vmpackc.low %vm4921_vm1, %vm4921_vm1 }
 0x14d   :  { %v4848_v56 = vadd.f32 %v2150_v23, %v2021_v25  ;;  %v1697_v25 = vpack.c.b16 %v1574_v59, %v1571_v26  ;;  %v370_v23 = vunpack.c.l.bf16 %v163_v49  ;;  %vm642_vm11 = vmpackc.low %vm4864_vm5, %vm4860_vm4  ;;  %vm4892_vm12 = vcmp.gt.f32.partialorder %v373_v20, 0.6015625  ;;  %v166_v20 = vld [vmem:[#allocation2 + $0xc0] sm:$0xff] }
 0x14e   :  { %vm645_vm15 = vmpackc.low %vm4892_vm12, %vm4892_vm12  ;;  %v738_v44 = vsel %vm642_vm11, %v162_v34, 0  ;;  %v856_v26 = vunpack.c.l.bf16 %v263_v41  ;;  %v167_v34 = vld [vmem:[#allocation2 + $0xc8] sm:$0xf]  ;;  %v374_v58 = vunpack.c.l.bf16 %v166_v20 }
 0x14f   :  { %vm4884_vm10 = vcmp.gt.f32.partialorder %v370_v23, 0.6015625  ;;  %v1577_v23 = vunpack.c.l.b16 %v1219_v6  ;;  %v741_v53 = vsel %vm645_vm15, %v165_v32, 0 }
 0x150   :  { %v2081_v48 = vpop.f32.mrf.mxu2  ;;  %vm643_vm14 = vmpackc.low %vm4884_vm10, %vm4884_vm10  ;;  %v2495_v51 = vunpack.c.l.b16 %v741_v53  ;;  %vm4915_vm0 = vcmp.gt.f32.partialorder %v856_v26, 0.6015625  ;;  %vm4925_vm2 = vcmp.gt.f32.partialorder %v374_v58, 0.6015625 }
 0x151   :  { %v2210_v31 = vpop.f32.mrf.mxu3  ;;  %vm1127_vm4 = vmpackc.low %vm4915_vm0, %vm4915_vm0 }
 0x152   :  { %v4854_v16 = vadd.f32 %v2210_v31, %v2081_v48  ;;  %v2024_v59 = vpop.f32.mrf.mxu0  ;;  %v2491_v31 = vunpack.c.h.b16 %v738_v44 }
 0x154   :  { %6266 = vst [vmem:[#allocation29_spill] sm:$0xff] %v4854_v16  ;;  %v2153_v2 = vpop.f32.mrf.mxu1  ;;  %v2614_v53 = vpack.c.b16 %v2494_v39, %v2491_v31 }
 0x155   :  { %v4879_v43 = vadd.f32 %v2153_v2, %v2024_v59  ;;  %2261 = vmatmul.bf16.gmra.mxu2 %v1697_v25  ;;  %3047 = vmatmul.bf16.gmra.mxu0 %v2611_v47  ;;  %v2490_v47 = vunpack.c.l.b16 %v738_v44  ;;  %v168_v59 = vld [vmem:[#allocation2 + $0xcc] sm:$0xff]  ;;  %v2493_v2 = vunpack.c.l.b16 %v740_v1 }
 0x156   :  { %2918 = vmatmul.bf16.gmra.mxu3 %v2610_v8  ;;  %v739_v8 = vsel %vm643_vm14, %v163_v49, 0  ;;  %v377_v6 = vunpack.c.l.bf16 %v168_v59  ;;  %v378_v49 = vunpack.c.h.bf16 %v168_v59 }
 0x157   :  { %3176 = vmatmul.bf16.gmra.mxu1 %v2612_v4  ;;  %v2492_v62 = vunpack.c.l.b16 %v739_v8  ;;  %v2613_v44 = vpack.c.b16 %v2493_v2, %v2490_v47 }
 0x158   :  { %v2084_v38 = vpop.f32.mrf.mxu2  ;;  %vm4936_vm5 = vcmp.gt.f32.partialorder %v377_v6, 0.6015625  ;;  %vm4940_vm6 = vcmp.gt.f32.partialorder %v378_v49, 0.6015625  ;;  %v269_v49 = vld [vmem:[#allocation5 + $0xec] sm:$0xf] }
 0x159   :  { %v2213_v9 = vpop.f32.mrf.mxu3  ;;  %v2615_v29 = vpack.c.b16 %v2495_v51, %v2492_v62  ;;  %vm648_vm11 = vmpackc.low %vm4940_vm6, %vm4936_vm5  ;;  %v1223_v62 = vsel %vm1127_vm4, %v263_v41, 0  ;;  %v1225_v51 = vsel %vm1129_vm7, %v265_v45, 0  ;;  %v865_v45 = vunpack.c.l.bf16 %v269_v49 }
 0x15a   :  { %v4911_v4 = vadd.f32 %v2213_v9, %v2084_v38  ;;  %v2026_v48 = vpop.f32.mrf.mxu0  ;;  %v375_v38 = vunpack.c.h.bf16 %v166_v20  ;;  %v169_v9 = vld [vmem:[#allocation2 + $0xd4] sm:$0xf]  ;;  %v744_v6 = vsel %vm648_vm11, %v168_v59, 0  ;;  %v1586_v41 = vunpack.c.l.b16 %v1225_v51 }
 0x15b   :  { %v379_v8 = vunpack.c.l.bf16 %v169_v9  ;;  %v2500_v47 = vunpack.c.h.b16 %v744_v6  ;;  %vm4986_vm15 = vcmp.gt.f32.partialorder %v865_v45, 0.6015625 }
 0x15c   :  { %6281 = vst [vmem:[#allocation30_spill] sm:$0xff] %v4911_v4  ;;  %v2155_v25 = vpop.f32.mrf.mxu1  ;;  %vm4929_vm3 = vcmp.gt.f32.partialorder %v375_v38, 0.6015625  ;;  %v267_v38 = vld [vmem:[#allocation5 + $0xe0] sm:$0xf]  ;;  %vm1133_vm5 = vmpackc.low %vm4986_vm15, %vm4986_vm15 }
 0x15d   :  { %v4913_v11 = vadd.f32 %v2155_v25, %v2026_v48  ;;  %v1700_v48 = vpack.c.b16 %v1580_v15, %v1577_v23  ;;  %v376_v25 = vunpack.c.l.bf16 %v167_v34  ;;  %vm646_vm9 = vmpackc.low %vm4929_vm3, %vm4925_vm2  ;;  %vm4957_vm10 = vcmp.gt.f32.partialorder %v379_v8, 0.6015625  ;;  %v170_v8 = vld [vmem:[#allocation2 + $0xd8] sm:$0xff] }
 0x15e   :  { %vm649_vm13 = vmpackc.low %vm4957_vm10, %vm4957_vm10  ;;  %v742_v58 = vsel %vm646_vm9, %v166_v20, 0  ;;  %v862_v23 = vunpack.c.l.bf16 %v267_v38  ;;  %v171_v20 = vld [vmem:[#allocation2 + $0xe0] sm:$0xf]  ;;  %v380_v39 = vunpack.c.l.bf16 %v170_v8 }
 0x15f   :  { %vm4949_vm8 = vcmp.gt.f32.partialorder %v376_v25, 0.6015625  ;;  %v1583_v25 = vunpack.c.l.b16 %v1223_v62  ;;  %v745_v1 = vsel %vm649_vm13, %v169_v9, 0 }
 0x160   :  { %v2086_v32 = vpop.f32.mrf.mxu2  ;;  %vm647_vm12 = vmpackc.low %vm4949_vm8, %vm4949_vm8  ;;  %v2501_v59 = vunpack.c.l.b16 %v745_v1  ;;  %vm4980_vm14 = vcmp.gt.f32.partialorder %v862_v23, 0.6015625  ;;  %vm4990_vm0 = vcmp.gt.f32.partialorder %v380_v39, 0.6015625 }
 0x161   :  { %v2215_v4 = vpop.f32.mrf.mxu3  ;;  %vm1131_vm2 = vmpackc.low %vm4980_vm14, %vm4980_vm14 }
 0x162   :  { %v4919_v16 = vadd.f32 %v2215_v4, %v2086_v32  ;;  %v2029_v15 = vpop.f32.mrf.mxu0  ;;  %v2497_v4 = vunpack.c.h.b16 %v742_v58  ;;  %v1227_v45 = vsel %vm1131_vm2, %v267_v38, 0 }
 0x163   :  { %v1589_v51 = vunpack.c.l.b16 %v1227_v45 }
 0x164   :  { %6284 = vst [vmem:[#allocation31_spill] sm:$0xff] %v4919_v16  ;;  %v2158_v26 = vpop.f32.mrf.mxu1  ;;  %v2617_v1 = vpack.c.b16 %v2500_v47, %v2497_v4 }
 0x165   :  { %v4944_v2 = vadd.f32 %v2158_v26, %v2029_v15  ;;  %2266 = vmatmul.bf16.gmra.mxu2 %v1700_v48  ;;  %3052 = vmatmul.bf16.gmra.mxu0 %v2614_v53  ;;  %v2496_v53 = vunpack.c.l.b16 %v742_v58  ;;  %v172_v15 = vld [vmem:[#allocation2 + $0xe4] sm:$0xff]  ;;  %v2499_v26 = vunpack.c.l.b16 %v744_v6  ;;  %v174_v6 = vld [vmem:[#allocation2 + $0xf0] sm:$0xff] }
 0x166   :  { %2923 = vmatmul.bf16.gmra.mxu3 %v2613_v44  ;;  %v743_v44 = vsel %vm647_vm12, %v167_v34, 0  ;;  %v383_v62 = vunpack.c.l.bf16 %v172_v15  ;;  %v384_v34 = vunpack.c.h.bf16 %v172_v15 }
 0x167   :  { %3181 = vmatmul.bf16.gmra.mxu1 %v2615_v29  ;;  %v2498_v31 = vunpack.c.l.b16 %v743_v44  ;;  %v2616_v58 = vpack.c.b16 %v2499_v26, %v2496_v53 }
 0x168   :  { %v2089_v17 = vpop.f32.mrf.mxu2  ;;  %vm5001_vm3 = vcmp.gt.f32.partialorder %v383_v62, 0.6015625  ;;  %vm5005_vm4 = vcmp.gt.f32.partialorder %v384_v34, 0.6015625  ;;  %v273_v62 = vld [vmem:[#allocation5 + $0x104] sm:$0xf] }
 0x169   :  { %v2218_v55 = vpop.f32.mrf.mxu3  ;;  %v2618_v18 = vpack.c.b16 %v2501_v59, %v2498_v31  ;;  %vm652_vm9 = vmpackc.low %vm5005_vm4, %vm5001_vm3  ;;  %v1229_v59 = vsel %vm1133_vm5, %v269_v49, 0  ;;  %v871_v49 = vunpack.c.l.bf16 %v273_v62 }
 0x16a   :  { %v4976_v29 = vadd.f32 %v2218_v55, %v2089_v17  ;;  %v2031_v32 = vpop.f32.mrf.mxu0  ;;  %v381_v17 = vunpack.c.h.bf16 %v170_v8  ;;  %v173_v55 = vld [vmem:[#allocation2 + $0xec] sm:$0xf]  ;;  %v748_v39 = vsel %vm652_vm9, %v172_v15, 0 }
 0x16b   :  { %v385_v44 = vunpack.c.l.bf16 %v173_v55  ;;  %vm5040_vm13 = vcmp.gt.f32.partialorder %v871_v49, 0.6015625 }
 0x16c   :  { %6299 = vst [vmem:[#allocation32_spill] sm:$0xff] %v4976_v29  ;;  %v2160_v48 = vpop.f32.mrf.mxu1  ;;  %vm4994_vm1 = vcmp.gt.f32.partialorder %v381_v17, 0.6015625  ;;  %v271_v17 = vld [vmem:[#allocation5 + $0xf8] sm:$0xf]  ;;  %vm1137_vm3 = vmpackc.low %vm5040_vm13, %vm5040_vm13 }
 0x16d   :  { %v4978_v21 = vadd.f32 %v2160_v48, %v2031_v32  ;;  %v1703_v32 = vpack.c.b16 %v1586_v41, %v1583_v25  ;;  %v382_v48 = vunpack.c.l.bf16 %v171_v20  ;;  %vm650_vm7 = vmpackc.low %vm4994_vm1, %vm4990_vm0  ;;  %vm5020_vm8 = vcmp.gt.f32.partialorder %v385_v44, 0.6015625 }
 0x16e   :  { %vm653_vm11 = vmpackc.low %vm5020_vm8, %vm5020_vm8  ;;  %v1592_v44 = vunpack.c.l.b16 %v1229_v59  ;;  %v868_v25 = vunpack.c.l.bf16 %v271_v17  ;;  %v1233_v49 = vsel %vm1137_vm3, %v273_v62, 0  ;;  %v178_v62 = vld [vmem:[#allocation2 + $0x108] sm:$0xff] }
 0x16f   :  { %vm5012_vm6 = vcmp.gt.f32.partialorder %v382_v48, 0.6015625 }
 0x170   :  { %v2091_v9 = vpop.f32.mrf.mxu2  ;;  %vm651_vm10 = vmpackc.low %vm5012_vm6, %vm5012_vm6  ;;  %v1706_v59 = vpack.c.b16 %v1592_v44, %v1589_v51  ;;  %vm5035_vm12 = vcmp.gt.f32.partialorder %v868_v25, 0.6015625  ;;  %v393_v25 = vunpack.c.h.bf16 %v178_v62 }
 0x171   :  { %v2220_v29 = vpop.f32.mrf.mxu3  ;;  %v747_v48 = vsel %vm651_vm10, %v171_v20, 0  ;;  %vm1135_vm0 = vmpackc.low %vm5035_vm12, %vm5035_vm12 }
 0x172   :  { %v4984_v16 = vadd.f32 %v2220_v29, %v2091_v9  ;;  %v3018_v41 = vpop.f32.mrf.mxu0  ;;  %v176_v29 = vld [vmem:[#allocation2 + $0xfc] sm:$0xff]  ;;  %v2504_v15 = vunpack.c.l.b16 %v747_v48  ;;  %vm5112_vm13 = vcmp.gt.f32.partialorder %v393_v25, 0.6015625  ;;  %v279_v25 = vld [vmem:[#allocation5 + $0x128] sm:$0xf] }
 0x173   :  { %v389_v45 = vunpack.c.l.bf16 %v176_v29  ;;  %v390_v20 = vunpack.c.h.bf16 %v176_v29 }
 0x174   :  { %6302 = vst [vmem:[#allocation33_spill] sm:$0xff] %v4984_v16  ;;  %v3147_v23 = vpop.f32.mrf.mxu1 }
 0x175   :  { %2271 = vmatmul.bf16.gmra.mxu2 %v1703_v32  ;;  %3057 = vmatmul.bf16.gmra.mxu0 %v2617_v1  ;;  %v2505_v1 = vunpack.c.l.b16 %v748_v39  ;;  %vm5055_vm1 = vcmp.gt.f32.partialorder %v389_v45, 0.6015625  ;;  %vm5059_vm2 = vcmp.gt.f32.partialorder %v390_v20, 0.6015625 }
 0x176   :  { %2928 = vmatmul.bf16.gmra.mxu3 %v2616_v58  ;;  %v749_v58 = vsel %vm653_vm11, %v173_v55, 0 }
 0x177   :  { %3186 = vmatmul.bf16.gmra.mxu1 %v2618_v18  ;;  %v746_v18 = vsel %vm650_vm7, %v170_v8, 0  ;;  %v175_v8 = vld [vmem:[#allocation2 + $0xf8] sm:$0xf]  ;;  %v2507_v4 = vunpack.c.l.b16 %v749_v58  ;;  %vm656_vm7 = vmpackc.low %vm5059_vm2, %vm5055_vm1  ;;  %v179_v58 = vld [vmem:[#allocation2 + $0x110] sm:$0xf] }
 0x178   :  { %v2232_v47 = vpop.f32.mrf.mxu2  ;;  %v2502_v38 = vunpack.c.l.b16 %v746_v18  ;;  %v2503_v26 = vunpack.c.h.b16 %v746_v18 }
 0x179   :  { %v2889_v37 = vpop.f32.mrf.mxu3  ;;  %v2233_v31 = vadd.f32 %v2232_v47, %v4251_v57  ;;  %v2506_v57 = vunpack.c.h.b16 %v748_v39  ;;  %v386_v47 = vunpack.c.l.bf16 %v174_v6 }
 0x17a   :  { %v3020_v9 = vpop.f32.mrf.mxu0  ;;  %v2619_v35 = vpack.c.b16 %v2505_v1, %v2502_v38 }
 0x17b   :  { %v2890_v34 = vadd.f32 %v2889_v37, %v2233_v31  ;;  %v387_v37 = vunpack.c.h.bf16 %v174_v6  ;;  %v177_v31 = vld [vmem:[#allocation2 + $0x104] sm:$0xf]  ;;  %v2620_v48 = vpack.c.b16 %v2506_v57, %v2503_v26  ;;  %vm5044_vm14 = vcmp.gt.f32.partialorder %v386_v47, 0.6015625  ;;  %v275_v47 = vld [vmem:[#allocation5 + $0x110] sm:$0xf] }
 0x17c   :  { %v3149_v32 = vpop.f32.mrf.mxu1  ;;  %v1231_v57 = vsel %vm1135_vm0, %v271_v17, 0 }
 0x17d   :  { %v3019_v53 = vadd.f32 %v3018_v41, %v2890_v34  ;;  %v388_v41 = vunpack.c.l.bf16 %v175_v8  ;;  %v391_v34 = vunpack.c.l.bf16 %v177_v31  ;;  %vm5048_vm15 = vcmp.gt.f32.partialorder %v387_v37, 0.6015625  ;;  %v277_v37 = vld [vmem:[#allocation5 + $0x11c] sm:$0xf] }
 0x17e   :  { %vm654_vm5 = vmpackc.low %vm5048_vm15, %vm5044_vm14 }
 0x17f   :  { %v3148_v16 = vadd.f32 %v3147_v23, %v3019_v53  ;;  %v2621_v23 = vpack.c.b16 %v2507_v4, %v2504_v15  ;;  %vm5066_vm4 = vcmp.gt.f32.partialorder %v388_v41, 0.6015625  ;;  %vm5074_vm6 = vcmp.gt.f32.partialorder %v391_v34, 0.6015625 }
 0x180   :  { %v2234_v55 = vpop.f32.mrf.mxu2  ;;  %vm655_vm8 = vmpackc.low %vm5066_vm4, %vm5066_vm4  ;;  %v752_v4 = vsel %vm656_vm7, %v176_v29, 0  ;;  %v1598_v41 = vunpack.c.l.b16 %v1233_v49  ;;  %v180_v29 = vld [vmem:[#allocation2 + $0x114] sm:$0xff] }
 0x181   :  { %v2891_v13 = vpop.f32.mrf.mxu3  ;;  %v2235_v18 = vadd.f32 %v2234_v55, %v4281_v7  ;;  %3315 = vst [vmem:[#allocation10] sm:$0xff] %v3148_v16  ;;  %vm657_vm9 = vmpackc.low %vm5074_vm6, %vm5074_vm6  ;;  %v751_v14 = vsel %vm655_vm8, %v175_v8, 0  ;;  %v392_v7 = vunpack.c.l.bf16 %v178_v62  ;;  %v395_v53 = vunpack.c.l.bf16 %v180_v29 }
 0x182   :  { %v3023_v38 = vpop.f32.mrf.mxu0  ;;  %v753_v17 = vsel %vm657_vm9, %v177_v31, 0  ;;  %v2510_v51 = vunpack.c.l.b16 %v751_v14  ;;  %v396_v8 = vunpack.c.h.bf16 %v180_v29 }
 0x183   :  { %v2892_v44 = vadd.f32 %v2891_v13, %v2235_v18  ;;  %vm5108_vm12 = vcmp.gt.f32.partialorder %v392_v7, 0.6015625  ;;  %vm5119_vm15 = vcmp.gt.f32.partialorder %v395_v53, 0.6015625 }
 0x184   :  { %v3152_v1 = vpop.f32.mrf.mxu1  ;;  %vm5123_vm0 = vcmp.gt.f32.partialorder %v396_v8, 0.6015625  ;;  %vm658_vm3 = vmpackc.low %vm5112_vm13, %vm5108_vm12 }
 0x185   :  { %v3021_v16 = vadd.f32 %v3020_v9, %v2892_v44  ;;  %2276 = vmatmul.bf16.gmra.mxu2 %v1706_v59  ;;  %3062 = vmatmul.bf16.gmra.mxu0 %v2620_v48  ;;  %v1595_v59 = vunpack.c.l.b16 %v1231_v57  ;;  %v2512_v48 = vunpack.c.h.b16 %v752_v4  ;;  %v2513_v44 = vunpack.c.l.b16 %v753_v17 }
 0x186   :  { %2933 = vmatmul.bf16.gmra.mxu3 %v2619_v35 }
 0x187   :  { %3191 = vmatmul.bf16.gmra.mxu1 %v2621_v23  ;;  %v3150_v26 = vadd.f32 %v3149_v32, %v3021_v16  ;;  %v750_v32 = vsel %vm654_vm5, %v174_v6, 0  ;;  %v874_v6 = vunpack.c.l.bf16 %v275_v47  ;;  %v877_v23 = vunpack.c.l.bf16 %v277_v37  ;;  %v181_v16 = vld [vmem:[#allocation2 + $0x11c] sm:$0xf]  ;;  %vm660_vm5 = vmpackc.low %vm5123_vm0, %vm5119_vm15 }
 0x188   :  { %v2237_v35 = vpop.f32.mrf.mxu2  ;;  %v2508_v18 = vunpack.c.l.b16 %v750_v32  ;;  %v2509_v34 = vunpack.c.h.b16 %v750_v32  ;;  %v397_v32 = vunpack.c.l.bf16 %v181_v16  ;;  %v756_v7 = vsel %vm660_vm5, %v180_v29, 0  ;;  %v184_v29 = vld [vmem:[#allocation2 + $0x12c] sm:$0xff] }
 0x189   :  { %v2894_v9 = vpop.f32.mrf.mxu3  ;;  %v2238_v15 = vadd.f32 %v2237_v35, %v4301_v42  ;;  %3316 = vst [vmem:[#allocation10 + $0x8] sm:$0xff] %v3150_v26  ;;  %v2511_v42 = vunpack.c.l.b16 %v752_v4  ;;  %v1709_v35 = vpack.c.b16 %v1598_v41, %v1595_v59  ;;  %vm5099_vm10 = vcmp.gt.f32.partialorder %v874_v6, 0.6015625 }
 0x18a   :  { %v3025_v20 = vpop.f32.mrf.mxu0  ;;  %vm5104_vm11 = vcmp.gt.f32.partialorder %v877_v23, 0.6015625  ;;  %v2623_v4 = vpack.c.b16 %v2512_v48, %v2509_v34  ;;  %vm1139_vm14 = vmpackc.low %vm5099_vm10, %vm5099_vm10  ;;  %vm5138_vm4 = vcmp.gt.f32.partialorder %v397_v32, 0.6015625 }
 0x18b   :  { %v2895_v45 = vadd.f32 %v2894_v9, %v2238_v15  ;;  %v2622_v9 = vpack.c.b16 %v2511_v42, %v2508_v18  ;;  %vm1141_vm1 = vmpackc.low %vm5104_vm11, %vm5104_vm11  ;;  %v1235_v23 = vsel %vm1139_vm14, %v275_v47, 0  ;;  %v2518_v15 = vunpack.c.h.b16 %v756_v7 }
 0x18c   :  { %v3154_v55 = vpop.f32.mrf.mxu1  ;;  %vm661_vm7 = vmpackc.low %vm5138_vm4, %vm5138_vm4  ;;  %v401_v42 = vunpack.c.l.bf16 %v184_v29 }
 0x18d   :  { %v3024_v39 = vadd.f32 %v3023_v38, %v2895_v45  ;;  %v394_v38 = vunpack.c.l.bf16 %v179_v58 }
 0x18e   :  { %vm5183_vm13 = vcmp.gt.f32.partialorder %v401_v42, 0.6015625 }
 0x18f   :  { %v3153_v13 = vadd.f32 %v3152_v1, %v3024_v39  ;;  %v2624_v1 = vpack.c.b16 %v2513_v44, %v2510_v51  ;;  %vm5130_vm2 = vcmp.gt.f32.partialorder %v394_v38, 0.6015625  ;;  %v1237_v51 = vsel %vm1141_vm1, %v277_v37, 0 }
 0x190   :  { %v2239_v31 = vpop.f32.mrf.mxu2  ;;  %vm659_vm6 = vmpackc.low %vm5130_vm2, %vm5130_vm2  ;;  %v757_v37 = vsel %vm661_vm7, %v181_v16, 0 }
 0x191   :  { %v2896_v26 = vpop.f32.mrf.mxu3  ;;  %v2240_v49 = vadd.f32 %v2239_v31, %v4337_v60  ;;  %3317 = vst [vmem:[#allocation10 + $0x10] sm:$0xff] %v3153_v13  ;;  %v281_v13 = vld [vmem:[#allocation5 + $0x134] sm:$0xf]  ;;  %v755_v47 = vsel %vm659_vm6, %v179_v58, 0  ;;  %v2519_v45 = vunpack.c.l.b16 %v757_v37  ;;  %v402_v58 = vunpack.c.h.bf16 %v184_v29 }
 0x192   :  { %v3028_v17 = vpop.f32.mrf.mxu0  ;;  %v883_v32 = vunpack.c.l.bf16 %v281_v13  ;;  %v185_v60 = vld [vmem:[#allocation2 + $0x134] sm:$0xf] }
 0x193   :  { %v2897_v14 = vadd.f32 %v2896_v26, %v2240_v49  ;;  %v1601_v26 = vunpack.c.l.b16 %v1235_v23  ;;  %vm5187_vm14 = vcmp.gt.f32.partialorder %v402_v58, 0.6015625  ;;  %v187_v23 = vld [vmem:[#allocation2 + $0x140] sm:$0xf] }
 0x194   :  { %v3157_v41 = vpop.f32.mrf.mxu1  ;;  %vm5168_vm9 = vcmp.gt.f32.partialorder %v883_v32, 0.6015625 }
 0x195   :  { %v3026_v6 = vadd.f32 %v3025_v20, %v2897_v14  ;;  %2281 = vmatmul.bf16.gmra.mxu2 %v1709_v35  ;;  %3067 = vmatmul.bf16.gmra.mxu0 %v2623_v4  ;;  %v182_v35 = vld [vmem:[#allocation2 + $0x120] sm:$0xff]  ;;  %v183_v4 = vld [vmem:[#allocation2 + $0x128] sm:$0xf]  ;;  %vm1145_vm15 = vmpackc.low %vm5168_vm9, %vm5168_vm9 }
 0x196   :  { %2938 = vmatmul.bf16.gmra.mxu3 %v2622_v9  ;;  %v1604_v9 = vunpack.c.l.b16 %v1237_v51  ;;  %v398_v59 = vunpack.c.l.bf16 %v182_v35  ;;  %v399_v14 = vunpack.c.h.bf16 %v182_v35  ;;  %v403_v51 = vunpack.c.l.bf16 %v185_v60 }
 0x197   :  { %3196 = vmatmul.bf16.gmra.mxu1 %v2624_v1  ;;  %v3155_v34 = vadd.f32 %v3154_v55, %v3026_v6  ;;  %v754_v55 = vsel %vm658_vm3, %v178_v62, 0  ;;  %v880_v62 = vunpack.c.l.bf16 %v279_v25  ;;  %v2516_v1 = vunpack.c.l.b16 %v755_v47  ;;  %vm664_vm3 = vmpackc.low %vm5187_vm14, %vm5183_vm13 }
 0x198   :  { %v2242_v20 = vpop.f32.mrf.mxu2  ;;  %v2514_v57 = vunpack.c.l.b16 %v754_v55  ;;  %v2515_v49 = vunpack.c.h.b16 %v754_v55  ;;  %v1712_v39 = vpack.c.b16 %v1604_v9, %v1601_v26  ;;  %vm5172_vm10 = vcmp.gt.f32.partialorder %v398_v59, 0.6015625  ;;  %v285_v59 = vld [vmem:[#allocation5 + $0x14c] sm:$0xf] }
 0x199   :  { %v2899_v48 = vpop.f32.mrf.mxu3  ;;  %v2243_v44 = vadd.f32 %v2242_v20, %v4357_v33  ;;  %3318 = vst [vmem:[#allocation10 + $0x18] sm:$0xff] %v3155_v34  ;;  %v2517_v33 = vunpack.c.l.b16 %v756_v7  ;;  %vm5163_vm8 = vcmp.gt.f32.partialorder %v880_v62, 0.6015625  ;;  %vm5176_vm11 = vcmp.gt.f32.partialorder %v399_v14, 0.6015625  ;;  %v189_v7 = vld [vmem:[#allocation2 + $0x14c] sm:$0xf] }
 0x19a   :  { %v3030_v8 = vpop.f32.mrf.mxu0  ;;  %vm1143_vm12 = vmpackc.low %vm5163_vm8, %vm5163_vm8  ;;  %vm5202_vm2 = vcmp.gt.f32.partialorder %v403_v51, 0.6015625 }
 0x19b   :  { %v2900_v53 = vadd.f32 %v2899_v48, %v2243_v44  ;;  %v2625_v34 = vpack.c.b16 %v2517_v33, %v2514_v57  ;;  %v2626_v44 = vpack.c.b16 %v2518_v15, %v2515_v49  ;;  %vm662_vm1 = vmpackc.low %vm5176_vm11, %vm5172_vm10  ;;  %v1239_v49 = vsel %vm1143_vm12, %v279_v25, 0 }
 0x19c   :  { %v3159_v31 = vpop.f32.mrf.mxu1  ;;  %v1241_v15 = vsel %vm1145_vm15, %v281_v13, 0  ;;  %vm665_vm5 = vmpackc.low %vm5202_vm2, %vm5202_vm2  ;;  %v1607_v58 = vunpack.c.l.b16 %v1239_v49 }
 0x19d   :  { %v3029_v38 = vadd.f32 %v3028_v17, %v2900_v53  ;;  %v400_v17 = vunpack.c.l.bf16 %v183_v4  ;;  %v761_v13 = vsel %vm665_vm5, %v185_v60, 0 }
 0x19f   :  { %v3158_v18 = vadd.f32 %v3157_v41, %v3029_v38  ;;  %v2627_v41 = vpack.c.b16 %v2519_v45, %v2516_v1  ;;  %vm5194_vm0 = vcmp.gt.f32.partialorder %v400_v17, 0.6015625  ;;  %v760_v1 = vsel %vm664_vm3, %v184_v29, 0  ;;  %v283_v45 = vld [vmem:[#allocation5 + $0x140] sm:$0xf]  ;;  %v188_v29 = vld [vmem:[#allocation2 + $0x144] sm:$0xff] }
 0x1a0   :  { %v2244_v16 = vpop.f32.mrf.mxu2  ;;  %vm663_vm4 = vmpackc.low %vm5194_vm0, %vm5194_vm0  ;;  %v2524_v17 = vunpack.c.h.b16 %v760_v1 }
 0x1a1   :  { %v2901_v6 = vpop.f32.mrf.mxu3  ;;  %v2245_v48 = vadd.f32 %v2244_v16, %v4393_v52  ;;  %3319 = vst [vmem:[#allocation10 + $0x20] sm:$0xff] %v3158_v18  ;;  %v759_v25 = vsel %vm663_vm4, %v183_v4, 0  ;;  %v186_v16 = vld [vmem:[#allocation2 + $0x138] sm:$0xff]  ;;  %v407_v52 = vunpack.c.l.bf16 %v188_v29  ;;  %v408_v4 = vunpack.c.h.bf16 %v188_v29 }
 0x1a2   :  { %v3033_v26 = vpop.f32.mrf.mxu0  ;;  %v2522_v51 = vunpack.c.l.b16 %v759_v25  ;;  %v405_v55 = vunpack.c.h.bf16 %v186_v16 }
 0x1a3   :  { %v2902_v53 = vadd.f32 %v2901_v6, %v2245_v48  ;;  %v1610_v6 = vunpack.c.l.b16 %v1241_v15  ;;  %v889_v48 = vunpack.c.l.bf16 %v285_v59  ;;  %vm5247_vm11 = vcmp.gt.f32.partialorder %v407_v52, 0.6015625  ;;  %v190_v52 = vld [vmem:[#allocation2 + $0x150] sm:$0xff] }
 0x1a4   :  { %v3162_v47 = vpop.f32.mrf.mxu1  ;;  %vm5240_vm9 = vcmp.gt.f32.partialorder %v405_v55, 0.6015625  ;;  %vm5251_vm12 = vcmp.gt.f32.partialorder %v408_v4, 0.6015625 }
 0x1a5   :  { %v3031_v57 = vadd.f32 %v3030_v8, %v2902_v53  ;;  %2286 = vmatmul.bf16.gmra.mxu2 %v1712_v39  ;;  %3072 = vmatmul.bf16.gmra.mxu0 %v2626_v44  ;;  %v2525_v44 = vunpack.c.l.b16 %v761_v13  ;;  %v1715_v9 = vpack.c.b16 %v1610_v6, %v1607_v58  ;;  %vm5232_vm7 = vcmp.gt.f32.partialorder %v889_v48, 0.6015625  ;;  %v287_v48 = vld [vmem:[#allocation5 + $0x158] sm:$0xf] }
 0x1a6   :  { %2943 = vmatmul.bf16.gmra.mxu3 %v2625_v34  ;;  %vm1149_vm13 = vmpackc.low %vm5232_vm7, %vm5232_vm7 }
 0x1a7   :  { %3201 = vmatmul.bf16.gmra.mxu1 %v2627_v41  ;;  %v3160_v62 = vadd.f32 %v3159_v31, %v3031_v57  ;;  %v758_v31 = vsel %vm662_vm1, %v182_v35, 0  ;;  %v886_v35 = vunpack.c.l.bf16 %v283_v45  ;;  %v404_v41 = vunpack.c.l.bf16 %v186_v16  ;;  %vm668_vm1 = vmpackc.low %vm5251_vm12, %vm5247_vm11 }
 0x1a8   :  { %v2247_v8 = vpop.f32.mrf.mxu2  ;;  %v2520_v39 = vunpack.c.l.b16 %v758_v31  ;;  %v2521_v20 = vunpack.c.h.b16 %v758_v31 }
 0x1a9   :  { %v2904_v38 = vpop.f32.mrf.mxu3  ;;  %v2248_v32 = vadd.f32 %v2247_v8, %v4424_v27  ;;  %3320 = vst [vmem:[#allocation10 + $0x28] sm:$0xff] %v3160_v62  ;;  %v2523_v27 = vunpack.c.l.b16 %v760_v1  ;;  %vm5227_vm6 = vcmp.gt.f32.partialorder %v886_v35, 0.6015625  ;;  %vm5236_vm8 = vcmp.gt.f32.partialorder %v404_v41, 0.6015625 }
 0x1aa   :  { %v3035_v18 = vpop.f32.mrf.mxu0  ;;  %v2629_v49 = vpack.c.b16 %v2524_v17, %v2521_v20  ;;  %vm1147_vm10 = vmpackc.low %vm5227_vm6, %vm5227_vm6  ;;  %v764_v17 = vsel %vm668_vm1, %v188_v29, 0  ;;  %v192_v29 = vld [vmem:[#allocation2 + $0x15c] sm:$0xff] }
 0x1ab   :  { %v2905_v14 = vadd.f32 %v2904_v38, %v2248_v32  ;;  %v2628_v57 = vpack.c.b16 %v2523_v27, %v2520_v39  ;;  %v409_v38 = vunpack.c.l.bf16 %v189_v7  ;;  %vm666_vm15 = vmpackc.low %vm5240_vm9, %vm5236_vm8  ;;  %v1243_v35 = vsel %vm1147_vm10, %v283_v45, 0 }
 0x1ac   :  { %v3164_v42 = vpop.f32.mrf.mxu1  ;;  %v413_v32 = vunpack.c.l.bf16 %v192_v29 }
 0x1ad   :  { %v3034_v34 = vadd.f32 %v3033_v26, %v2905_v14  ;;  %v406_v26 = vunpack.c.l.bf16 %v187_v23  ;;  %vm5266_vm0 = vcmp.gt.f32.partialorder %v409_v38, 0.6015625  ;;  %v410_v38 = vunpack.c.l.bf16 %v190_v52 }
 0x1ae   :  { %vm669_vm3 = vmpackc.low %vm5266_vm0, %vm5266_vm0  ;;  %vm5311_vm9 = vcmp.gt.f32.partialorder %v413_v32, 0.6015625 }
 0x1af   :  { %v3163_v53 = vadd.f32 %v3162_v47, %v3034_v34  ;;  %v2630_v47 = vpack.c.b16 %v2525_v44, %v2522_v51  ;;  %vm5258_vm14 = vcmp.gt.f32.partialorder %v406_v26, 0.6015625  ;;  %v1245_v34 = vsel %vm1149_vm13, %v285_v59, 0  ;;  %v289_v51 = vld [vmem:[#allocation5 + $0x164] sm:$0xf]  ;;  %v191_v26 = vld [vmem:[#allocation2 + $0x158] sm:$0xf] }
 0x1b0   :  { %v2249_v60 = vpop.f32.mrf.mxu2  ;;  %vm667_vm2 = vmpackc.low %vm5258_vm14, %vm5258_vm14  ;;  %v765_v59 = vsel %vm669_vm3, %v189_v7, 0  ;;  %v1616_v4 = vunpack.c.l.b16 %v1245_v34  ;;  %v895_v33 = vunpack.c.l.bf16 %v289_v51  ;;  %vm5300_vm6 = vcmp.gt.f32.partialorder %v410_v38, 0.6015625 }
 0x1b1   :  { %v2906_v37 = vpop.f32.mrf.mxu3  ;;  %v2250_v62 = vadd.f32 %v2249_v60, %v4458_v54  ;;  %3321 = vst [vmem:[#allocation10 + $0x30] sm:$0xff] %v3163_v53  ;;  %v1613_v53 = vunpack.c.l.b16 %v1243_v35  ;;  %v763_v45 = vsel %vm667_vm2, %v187_v23, 0  ;;  %v2531_v8 = vunpack.c.l.b16 %v765_v59 }
 0x1b2   :  { %v3038_v1 = vpop.f32.mrf.mxu0  ;;  %v414_v23 = vunpack.c.h.bf16 %v192_v29  ;;  %vm5296_vm5 = vcmp.gt.f32.partialorder %v895_v33, 0.6015625 }
 0x1b3   :  { %v2907_v31 = vadd.f32 %v2906_v37, %v2250_v62  ;;  %v2528_v62 = vunpack.c.l.b16 %v763_v45  ;;  %v1718_v54 = vpack.c.b16 %v1616_v4, %v1613_v53  ;;  %vm1153_vm11 = vmpackc.low %vm5296_vm5, %vm5296_vm5 }
 0x1b4   :  { %v3167_v14 = vpop.f32.mrf.mxu1  ;;  %vm5315_vm10 = vcmp.gt.f32.partialorder %v414_v23, 0.6015625 }
 0x1b5   :  { %v3036_v13 = vadd.f32 %v3035_v18, %v2907_v31  ;;  %2291 = vmatmul.bf16.gmra.mxu2 %v1715_v9  ;;  %3077 = vmatmul.bf16.gmra.mxu0 %v2629_v49  ;;  %v411_v49 = vunpack.c.h.bf16 %v190_v52 }
 0x1b6   :  { %2948 = vmatmul.bf16.gmra.mxu3 %v2628_v57  ;;  %v2530_v57 = vunpack.c.h.b16 %v764_v17 }
 0x1b7   :  { %3206 = vmatmul.bf16.gmra.mxu1 %v2630_v47  ;;  %v3165_v39 = vadd.f32 %v3164_v42, %v3036_v13  ;;  %v762_v42 = vsel %vm666_vm15, %v186_v16, 0  ;;  %v892_v16 = vunpack.c.l.bf16 %v287_v48  ;;  %v193_v47 = vld [vmem:[#allocation2 + $0x164] sm:$0xf]  ;;  %vm5304_vm7 = vcmp.gt.f32.partialorder %v411_v49, 0.6015625  ;;  %vm672_vm15 = vmpackc.low %vm5315_vm10, %vm5311_vm9  ;;  %v194_v49 = vld [vmem:[#allocation2 + $0x168] sm:$0xff] }
 0x1b8   :  { %v2252_v18 = vpop.f32.mrf.mxu2  ;;  %v2526_v60 = vunpack.c.l.b16 %v762_v42  ;;  %v2527_v9 = vunpack.c.h.b16 %v762_v42  ;;  %vm670_vm13 = vmpackc.low %vm5304_vm7, %vm5300_vm6  ;;  %v417_v6 = vunpack.c.h.bf16 %v194_v49 }
 0x1b9   :  { %v2909_v27 = vpop.f32.mrf.mxu3  ;;  %v2253_v20 = vadd.f32 %v2252_v18, %v4489_v28  ;;  %3322 = vst [vmem:[#allocation10 + $0x38] sm:$0xff] %v3165_v39  ;;  %v2529_v28 = vunpack.c.l.b16 %v764_v17  ;;  %vm5291_vm4 = vcmp.gt.f32.partialorder %v892_v16, 0.6015625  ;;  %v415_v39 = vunpack.c.l.bf16 %v193_v47 }
 0x1ba   :  { %v3040_v41 = vpop.f32.mrf.mxu0  ;;  %v2632_v18 = vpack.c.b16 %v2530_v57, %v2527_v9  ;;  %vm1151_vm8 = vmpackc.low %vm5291_vm4, %vm5291_vm4  ;;  %v291_v9 = vld [vmem:[#allocation5 + $0x170] sm:$0xf]  ;;  %v293_v57 = vld [vmem:[#allocation5 + $0x17c] sm:$0xf]  ;;  %vm5368_vm5 = vcmp.gt.f32.partialorder %v417_v6, 0.6015625 }
 0x1bb   :  { %v2910_v44 = vadd.f32 %v2909_v27, %v2253_v20  ;;  %v2631_v58 = vpack.c.b16 %v2529_v28, %v2526_v60  ;;  %vm5330_vm14 = vcmp.gt.f32.partialorder %v415_v39, 0.6015625  ;;  %v1247_v60 = vsel %vm1151_vm8, %v287_v48, 0  ;;  %v197_v39 = vld [vmem:[#allocation2 + $0x17c] sm:$0xf] }
 0x1bc   :  { %v3169_v55 = vpop.f32.mrf.mxu1  ;;  %v1249_v28 = vsel %vm1153_vm11, %v289_v51, 0  ;;  %vm673_vm1 = vmpackc.low %vm5330_vm14, %vm5330_vm14  ;;  %v1619_v38 = vunpack.c.l.b16 %v1247_v60 }
 0x1bd   :  { %v3039_v37 = vadd.f32 %v3038_v1, %v2910_v44  ;;  %v412_v1 = vunpack.c.l.bf16 %v191_v26  ;;  %v769_v51 = vsel %vm673_vm1, %v193_v47, 0 }
 0x1bf   :  { %v3168_v15 = vadd.f32 %v3167_v14, %v3039_v37  ;;  %v2633_v14 = vpack.c.b16 %v2531_v8, %v2528_v62  ;;  %vm5322_vm12 = vcmp.gt.f32.partialorder %v412_v1, 0.6015625  ;;  %v768_v37 = vsel %vm672_vm15, %v192_v29, 0  ;;  %v196_v29 = vld [vmem:[#allocation2 + $0x174] sm:$0xff] }
 0x1c0   :  { %v2254_v7 = vpop.f32.mrf.mxu2  ;;  %vm671_vm0 = vmpackc.low %vm5322_vm12, %vm5322_vm12  ;;  %v2537_v1 = vunpack.c.l.b16 %v769_v51 }
 0x1c1   :  { %v2911_v31 = vpop.f32.mrf.mxu3  ;;  %v2255_v13 = vadd.f32 %v2254_v7, %v4523_v0  ;;  %3323 = vst [vmem:[#allocation10 + $0x40] sm:$0xff] %v3168_v15  ;;  %v767_v48 = vsel %vm671_vm0, %v191_v26, 0  ;;  %v1622_v15 = vunpack.c.l.b16 %v1249_v28  ;;  %v420_v26 = vunpack.c.h.bf16 %v196_v29 }
 0x1c2   :  { %v3043_v20 = vpop.f32.mrf.mxu0  ;;  %v2534_v25 = vunpack.c.l.b16 %v767_v48 }
 0x1c3   :  { %v2912_v34 = vadd.f32 %v2911_v31, %v2255_v13  ;;  %v2536_v31 = vunpack.c.h.b16 %v768_v37  ;;  %v416_v13 = vunpack.c.l.bf16 %v194_v49  ;;  %v1721_v35 = vpack.c.b16 %v1622_v15, %v1619_v38 }
 0x1c4   :  { %v3172_v42 = vpop.f32.mrf.mxu1  ;;  %vm5379_vm8 = vcmp.gt.f32.partialorder %v420_v26, 0.6015625 }
 0x1c5   :  { %v3041_v53 = vadd.f32 %v3040_v41, %v2912_v34  ;;  %2296 = vmatmul.bf16.gmra.mxu2 %v1718_v54  ;;  %3082 = vmatmul.bf16.gmra.mxu0 %v2632_v18  ;;  %v901_v54 = vunpack.c.l.bf16 %v293_v57  ;;  %vm5364_vm4 = vcmp.gt.f32.partialorder %v416_v13, 0.6015625 }
 0x1c6   :  { %2953 = vmatmul.bf16.gmra.mxu3 %v2631_v58  ;;  %v195_v58 = vld [vmem:[#allocation2 + $0x170] sm:$0xf]  ;;  %vm674_vm11 = vmpackc.low %vm5368_vm5, %vm5364_vm4 }
 0x1c7   :  { %3211 = vmatmul.bf16.gmra.mxu1 %v2633_v14  ;;  %v3170_v59 = vadd.f32 %v3169_v55, %v3041_v53  ;;  %v766_v55 = vsel %vm670_vm13, %v190_v52, 0  ;;  %v898_v52 = vunpack.c.l.bf16 %v291_v9  ;;  %v419_v14 = vunpack.c.l.bf16 %v196_v29 }
 0x1c8   :  { %v2257_v41 = vpop.f32.mrf.mxu2  ;;  %v2532_v32 = vunpack.c.l.b16 %v766_v55  ;;  %v2533_v7 = vunpack.c.h.b16 %v766_v55  ;;  %vm5360_vm3 = vcmp.gt.f32.partialorder %v901_v54, 0.6015625  ;;  %v421_v53 = vunpack.c.l.bf16 %v197_v39 }
 0x1c9   :  { %v2914_v4 = vpop.f32.mrf.mxu3  ;;  %v2258_v16 = vadd.f32 %v2257_v41, %v4554_v36  ;;  %3324 = vst [vmem:[#allocation10 + $0x48] sm:$0xff] %v3170_v59  ;;  %v2535_v36 = vunpack.c.l.b16 %v768_v37  ;;  %vm5355_vm2 = vcmp.gt.f32.partialorder %v898_v52, 0.6015625  ;;  %vm5375_vm7 = vcmp.gt.f32.partialorder %v419_v14, 0.6015625  ;;  %vm1157_vm9 = vmpackc.low %vm5360_vm3, %vm5360_vm3  ;;  %v295_v52 = vld [vmem:[#allocation5 + $0x188] sm:$0xf] }
 0x1ca   :  { %v3045_v62 = vpop.f32.mrf.mxu0  ;;  %v2635_v45 = vpack.c.b16 %v2536_v31, %v2533_v7  ;;  %vm1155_vm6 = vmpackc.low %vm5355_vm2, %vm5355_vm2  ;;  %vm5394_vm12 = vcmp.gt.f32.partialorder %v421_v53, 0.6015625  ;;  %v1253_v15 = vsel %vm1157_vm9, %v293_v57, 0  ;;  %v205_v41 = vld [vmem:[#allocation2 + $0x1ac] sm:$0xf] }
 0x1cb   :  { %v2915_v33 = vadd.f32 %v2914_v4, %v2258_v16  ;;  %v2634_v34 = vpack.c.b16 %v2535_v36, %v2532_v32  ;;  %vm676_vm13 = vmpackc.low %vm5379_vm8, %vm5375_vm7  ;;  %v1251_v51 = vsel %vm1155_vm6, %v291_v9, 0  ;;  %v1628_v13 = vunpack.c.l.b16 %v1253_v15 }
 0x1cc   :  { %v3174_v8 = vpop.f32.mrf.mxu1  ;;  %vm677_vm15 = vmpackc.low %vm5394_vm12, %vm5394_vm12  ;;  %v772_v36 = vsel %vm676_vm13, %v196_v29, 0  ;;  %v200_v29 = vld [vmem:[#allocation2 + $0x18c] sm:$0xff] }
 0x1cd   :  { %v3044_v23 = vadd.f32 %v3043_v20, %v2915_v33  ;;  %v418_v20 = vunpack.c.l.bf16 %v195_v58  ;;  %v773_v57 = vsel %vm677_vm15, %v197_v39, 0  ;;  %v2542_v26 = vunpack.c.h.b16 %v772_v36 }
 0x1ce   :  { %v425_v53 = vunpack.c.l.bf16 %v200_v29 }
 0x1cf   :  { %v3173_v18 = vadd.f32 %v3172_v42, %v3044_v23  ;;  %v2636_v42 = vpack.c.b16 %v2537_v1, %v2534_v25  ;;  %vm5386_vm10 = vcmp.gt.f32.partialorder %v418_v20, 0.6015625  ;;  %v297_v23 = vld [vmem:[#allocation5 + $0x194] sm:$0xf]  ;;  %v1625_v25 = vunpack.c.l.b16 %v1251_v51  ;;  %v198_v1 = vld [vmem:[#allocation2 + $0x180] sm:$0xff] }
 0x1d0   :  { %v2259_v47 = vpop.f32.mrf.mxu2  ;;  %vm675_vm14 = vmpackc.low %vm5386_vm10, %vm5386_vm10  ;;  %v422_v0 = vunpack.c.l.bf16 %v198_v1  ;;  %v423_v20 = vunpack.c.h.bf16 %v198_v1  ;;  %vm5439_vm5 = vcmp.gt.f32.partialorder %v425_v53, 0.6015625 }
 0x1d1   :  { %v2916_v27 = vpop.f32.mrf.mxu3  ;;  %v2260_v17 = vadd.f32 %v2259_v47, %v4588_v5  ;;  %3325 = vst [vmem:[#allocation10 + $0x50] sm:$0xff] %v3173_v18  ;;  %v771_v9 = vsel %vm675_vm14, %v195_v58, 0  ;;  %v907_v47 = vunpack.c.l.bf16 %v297_v23  ;;  %v426_v58 = vunpack.c.h.bf16 %v200_v29 }
 0x1d2   :  { %v3048_v60 = vpop.f32.mrf.mxu0  ;;  %vm5428_vm2 = vcmp.gt.f32.partialorder %v422_v0, 0.6015625  ;;  %vm5432_vm3 = vcmp.gt.f32.partialorder %v423_v20, 0.6015625 }
 0x1d3   :  { %v2917_v4 = vadd.f32 %v2916_v27, %v2260_v17  ;;  %v199_v27 = vld [vmem:[#allocation2 + $0x188] sm:$0xf]  ;;  %v201_v17 = vld [vmem:[#allocation2 + $0x194] sm:$0xf]  ;;  %vm5424_vm1 = vcmp.gt.f32.partialorder %v907_v47, 0.6015625  ;;  %vm5443_vm6 = vcmp.gt.f32.partialorder %v426_v58, 0.6015625  ;;  %vm678_vm9 = vmpackc.low %vm5432_vm3, %vm5428_vm2 }
 0x1d4   :  { %v3177_v28 = vpop.f32.mrf.mxu1  ;;  %v427_v16 = vunpack.c.l.bf16 %v201_v17  ;;  %vm1161_vm7 = vmpackc.low %vm5424_vm1, %vm5424_vm1  ;;  %v202_v47 = vld [vmem:[#allocation2 + $0x198] sm:$0xff]  ;;  %v203_v58 = vld [vmem:[#allocation2 + $0x1a0] sm:$0xf] }
 0x1d5   :  { %v3046_v37 = vadd.f32 %v3045_v62, %v2917_v4  ;;  %2301 = vmatmul.bf16.gmra.mxu2 %v1721_v35  ;;  %3087 = vmatmul.bf16.gmra.mxu0 %v2635_v45  ;;  %v2540_v35 = vunpack.c.l.b16 %v771_v9  ;;  %v424_v4 = vunpack.c.l.bf16 %v199_v27  ;;  %v1257_v9 = vsel %vm1161_vm7, %v297_v23, 0 }
 0x1d6   :  { %2958 = vmatmul.bf16.gmra.mxu3 %v2634_v34  ;;  %v2543_v34 = vunpack.c.l.b16 %v773_v57  ;;  %vm5458_vm10 = vcmp.gt.f32.partialorder %v427_v16, 0.6015625 }
 0x1d7   :  { %3216 = vmatmul.bf16.gmra.mxu1 %v2636_v42  ;;  %v3175_v38 = vadd.f32 %v3174_v8, %v3046_v37  ;;  %v770_v8 = vsel %vm674_vm11, %v194_v49, 0  ;;  %v904_v49 = vunpack.c.l.bf16 %v295_v52  ;;  %v1724_v42 = vpack.c.b16 %v1628_v13, %v1625_v25  ;;  %vm680_vm11 = vmpackc.low %vm5443_vm6, %vm5439_vm5 }
 0x1d8   :  { %v2262_v62 = vpop.f32.mrf.mxu2  ;;  %v2538_v6 = vunpack.c.l.b16 %v770_v8  ;;  %v2539_v14 = vunpack.c.h.b16 %v770_v8  ;;  %vm5450_vm8 = vcmp.gt.f32.partialorder %v424_v4, 0.6015625  ;;  %vm681_vm13 = vmpackc.low %vm5458_vm10, %vm5458_vm10  ;;  %v776_v13 = vsel %vm680_vm11, %v200_v29, 0  ;;  %v204_v29 = vld [vmem:[#allocation2 + $0x1a4] sm:$0xff] }
 0x1d9   :  { %v2919_v48 = vpop.f32.mrf.mxu3  ;;  %v2263_v32 = vadd.f32 %v2262_v62, %v4619_v3  ;;  %3326 = vst [vmem:[#allocation10 + $0x58] sm:$0xff] %v3175_v38  ;;  %v2541_v3 = vunpack.c.l.b16 %v772_v36  ;;  %vm5419_vm0 = vcmp.gt.f32.partialorder %v904_v49, 0.6015625  ;;  %vm679_vm12 = vmpackc.low %vm5450_vm8, %vm5450_vm8  ;;  %v777_v23 = vsel %vm681_vm13, %v201_v17, 0 }
 0x1da   :  { %v3050_v31 = vpop.f32.mrf.mxu0  ;;  %v2638_v55 = vpack.c.b16 %v2542_v26, %v2539_v14  ;;  %vm1159_vm4 = vmpackc.low %vm5419_vm0, %vm5419_vm0  ;;  %v430_v37 = vunpack.c.l.bf16 %v203_v58 }
 0x1db   :  { %v2920_v7 = vadd.f32 %v2919_v48, %v2263_v32  ;;  %v2637_v59 = vpack.c.b16 %v2541_v3, %v2538_v6  ;;  %v1255_v25 = vsel %vm1159_vm4, %v295_v52, 0  ;;  %v299_v6 = vld [vmem:[#allocation5 + $0x1a0] sm:$0xf]  ;;  %v301_v3 = vld [vmem:[#allocation5 + $0x1ac] sm:$0xf]  ;;  %v775_v52 = vsel %vm679_vm12, %v199_v27, 0 }
 0x1dc   :  { %v3179_v54 = vpop.f32.mrf.mxu1  ;;  %v1631_v26 = vunpack.c.l.b16 %v1255_v25  ;;  %v913_v53 = vunpack.c.l.bf16 %v301_v3  ;;  %v432_v27 = vunpack.c.h.bf16 %v204_v29  ;;  %vm5514_vm6 = vcmp.gt.f32.partialorder %v430_v37, 0.6015625 }
 0x1dd   :  { %v3049_v18 = vadd.f32 %v3048_v60, %v2920_v7  ;;  %vm683_vm10 = vmpackc.low %vm5514_vm6, %vm5514_vm6 }
 0x1de   :  { %vm5488_vm15 = vcmp.gt.f32.partialorder %v913_v53, 0.6015625  ;;  %vm5507_vm4 = vcmp.gt.f32.partialorder %v432_v27, 0.6015625 }
 0x1df   :  { %v3178_v44 = vadd.f32 %v3177_v28, %v3049_v18  ;;  %v2639_v28 = vpack.c.b16 %v2543_v34, %v2540_v35  ;;  %v1634_v35 = vunpack.c.l.b16 %v1257_v9  ;;  %vm1165_vm5 = vmpackc.low %vm5488_vm15, %vm5488_vm15 }
 0x1e0   :  { %v2264_v39 = vpop.f32.mrf.mxu2 }
 0x1e1   :  { %v2921_v45 = vpop.f32.mrf.mxu3  ;;  %v2265_v60 = vadd.f32 %v2264_v39, %v4653_v10  ;;  %3327 = vst [vmem:[#allocation10 + $0x60] sm:$0xff] %v3178_v44  ;;  %v2548_v44 = vunpack.c.h.b16 %v776_v13  ;;  %v2546_v39 = vunpack.c.l.b16 %v775_v52  ;;  %v1727_v16 = vpack.c.b16 %v1634_v35, %v1631_v26  ;;  %v305_v35 = vld [vmem:[#allocation5 + $0x1c4] sm:$0xf] }
 0x1e2   :  { %v3053_v62 = vpop.f32.mrf.mxu0 }
 0x1e3   :  { %v2922_v38 = vadd.f32 %v2921_v45, %v2265_v60  ;;  %v2549_v45 = vunpack.c.l.b16 %v777_v23  ;;  %v431_v60 = vunpack.c.l.bf16 %v204_v29  ;;  %v303_v23 = vld [vmem:[#allocation5 + $0x1b8] sm:$0xf] }
 0x1e4   :  { %v3182_v48 = vpop.f32.mrf.mxu1 }
 0x1e5   :  { %v3051_v32 = vadd.f32 %v3050_v31, %v2922_v38  ;;  %2306 = vmatmul.bf16.gmra.mxu2 %v1724_v42  ;;  %3092 = vmatmul.bf16.gmra.mxu0 %v2638_v55  ;;  %v428_v42 = vunpack.c.l.bf16 %v202_v47  ;;  %vm5503_vm3 = vcmp.gt.f32.partialorder %v431_v60, 0.6015625 }
 0x1e6   :  { %2963 = vmatmul.bf16.gmra.mxu3 %v2637_v59  ;;  %v429_v59 = vunpack.c.h.bf16 %v202_v47 }
 0x1e7   :  { %3221 = vmatmul.bf16.gmra.mxu1 %v2639_v28  ;;  %v3180_v36 = vadd.f32 %v3179_v54, %v3051_v32  ;;  %v774_v54 = vsel %vm678_vm9, %v198_v1, 0  ;;  %v910_v1 = vunpack.c.l.bf16 %v299_v6  ;;  %vm5492_vm0 = vcmp.gt.f32.partialorder %v428_v42, 0.6015625  ;;  %vm684_vm9 = vmpackc.low %vm5507_vm4, %vm5503_vm3 }
 0x1e8   :  { %v2267_v7 = vpop.f32.mrf.mxu2  ;;  %v2544_v34 = vunpack.c.l.b16 %v774_v54  ;;  %v2545_v20 = vunpack.c.h.b16 %v774_v54  ;;  %vm5496_vm1 = vcmp.gt.f32.partialorder %v429_v59, 0.6015625  ;;  %v780_v52 = vsel %vm684_vm9, %v204_v29, 0  ;;  %v208_v29 = vld [vmem:[#allocation2 + $0x1bc] sm:$0xff] }
 0x1e9   :  { %v2924_v31 = vpop.f32.mrf.mxu3  ;;  %v2268_v57 = vadd.f32 %v2267_v7, %v4684_v22  ;;  %3328 = vst [vmem:[#allocation10 + $0x68] sm:$0xff] %v3180_v36  ;;  %v2547_v22 = vunpack.c.l.b16 %v776_v13  ;;  %vm5483_vm14 = vcmp.gt.f32.partialorder %v910_v1, 0.6015625  ;;  %vm682_vm7 = vmpackc.low %vm5496_vm1, %vm5492_vm0  ;;  %v2554_v42 = vunpack.c.h.b16 %v780_v52 }
 0x1ea   :  { %v3055_v18 = vpop.f32.mrf.mxu0  ;;  %v2641_v10 = vpack.c.b16 %v2548_v44, %v2545_v20  ;;  %vm1163_vm2 = vmpackc.low %vm5483_vm14, %vm5483_vm14  ;;  %v206_v20 = vld [vmem:[#allocation2 + $0x1b0] sm:$0xff]  ;;  %v919_v59 = vunpack.c.l.bf16 %v305_v35  ;;  %v437_v28 = vunpack.c.l.bf16 %v208_v29 }
 0x1eb   :  { %v2925_v49 = vadd.f32 %v2924_v31, %v2268_v57  ;;  %v2640_v55 = vpack.c.b16 %v2547_v22, %v2544_v34 }
 0x1ec   :  { %v3184_v14 = vpop.f32.mrf.mxu1  ;;  %vm5552_vm13 = vcmp.gt.f32.partialorder %v919_v59, 0.6015625  ;;  %vm5567_vm1 = vcmp.gt.f32.partialorder %v437_v28, 0.6015625 }
 0x1ed   :  { %v3054_v0 = vadd.f32 %v3053_v62, %v2925_v49  ;;  %v433_v62 = vunpack.c.l.bf16 %v205_v41  ;;  %v1259_v49 = vsel %vm1163_vm2, %v299_v6, 0  ;;  %v779_v6 = vsel %vm683_vm10, %v203_v58, 0  ;;  %vm1169_vm3 = vmpackc.low %vm5552_vm13, %vm5552_vm13 }
 0x1ee   :  { %v2552_v60 = vunpack.c.l.b16 %v779_v6  ;;  %v438_v58 = vunpack.c.h.bf16 %v208_v29  ;;  %v309_v6 = vld [vmem:[#allocation5 + $0x1dc] sm:$0xf] }
 0x1ef   :  { %v3183_v4 = vadd.f32 %v3182_v48, %v3054_v0  ;;  %v2642_v48 = vpack.c.b16 %v2549_v45, %v2546_v39  ;;  %vm5522_vm8 = vcmp.gt.f32.partialorder %v433_v62, 0.6015625  ;;  %v1637_v0 = vunpack.c.l.b16 %v1259_v49 }
 0x1f0   :  { %v2269_v17 = vpop.f32.mrf.mxu2  ;;  %vm685_vm11 = vmpackc.low %vm5522_vm8, %vm5522_vm8  ;;  %vm5571_vm2 = vcmp.gt.f32.partialorder %v438_v58, 0.6015625 }
 0x1f1   :  { %v2926_v5 = vpop.f32.mrf.mxu3  ;;  %v2270_v33 = vadd.f32 %v2269_v17, %v4718_v61  ;;  %3329 = vst [vmem:[#allocation10 + $0x70] sm:$0xff] %v3183_v4  ;;  %v207_v4 = vld [vmem:[#allocation2 + $0x1b8] sm:$0xf]  ;;  %v434_v17 = vunpack.c.l.bf16 %v206_v20 }
 0x1f2   :  { %v3058_v8 = vpop.f32.mrf.mxu0 }
 0x1f3   :  { %v2927_v32 = vadd.f32 %v2926_v5, %v2270_v33  ;;  %v435_v5 = vunpack.c.h.bf16 %v206_v20  ;;  %vm5556_vm14 = vcmp.gt.f32.partialorder %v434_v17, 0.6015625  ;;  %v211_v17 = vld [vmem:[#allocation2 + $0x1d0] sm:$0xf] }
 0x1f4   :  { %v3187_v36 = vpop.f32.mrf.mxu1  ;;  %v442_v51 = vunpack.c.l.bf16 %v211_v17 }
 0x1f5   :  { %v3056_v25 = vadd.f32 %v3055_v18, %v2927_v32  ;;  %2311 = vmatmul.bf16.gmra.mxu2 %v1727_v16  ;;  %3097 = vmatmul.bf16.gmra.mxu0 %v2641_v10  ;;  %v1261_v18 = vsel %vm1165_vm5, %v301_v3, 0  ;;  %v781_v3 = vsel %vm685_vm11, %v205_v41, 0  ;;  %v209_v16 = vld [vmem:[#allocation2 + $0x1c4] sm:$0xf]  ;;  %v436_v10 = vunpack.c.l.bf16 %v207_v4 }
 0x1f6   :  { %2968 = vmatmul.bf16.gmra.mxu3 %v2640_v55  ;;  %v1640_v44 = vunpack.c.l.b16 %v1261_v18  ;;  %v2555_v27 = vunpack.c.l.b16 %v781_v3  ;;  %v439_v15 = vunpack.c.l.bf16 %v209_v16  ;;  %vm5560_vm15 = vcmp.gt.f32.partialorder %v435_v5, 0.6015625 }
 0x1f7   :  { %3226 = vmatmul.bf16.gmra.mxu1 %v2642_v48  ;;  %v3185_v57 = vadd.f32 %v3184_v14, %v3056_v25  ;;  %v778_v14 = vsel %vm682_vm7, %v202_v47, 0  ;;  %v916_v47 = vunpack.c.l.bf16 %v303_v23  ;;  %vm5578_vm4 = vcmp.gt.f32.partialorder %v436_v10, 0.6015625  ;;  %vm686_vm5 = vmpackc.low %vm5560_vm15, %vm5556_vm14 }
 0x1f8   :  { %v2272_v54 = vpop.f32.mrf.mxu2  ;;  %v2550_v53 = vunpack.c.l.b16 %v778_v14  ;;  %v2551_v45 = vunpack.c.h.b16 %v778_v14  ;;  %v1730_v33 = vpack.c.b16 %v1640_v44, %v1637_v0  ;;  %vm5586_vm6 = vcmp.gt.f32.partialorder %v439_v15, 0.6015625  ;;  %vm688_vm7 = vmpackc.low %vm5571_vm2, %vm5567_vm1  ;;  %v307_v0 = vld [vmem:[#allocation5 + $0x1d0] sm:$0xf] }
 0x1f9   :  { %v2929_v13 = vpop.f32.mrf.mxu3  ;;  %v2273_v26 = vadd.f32 %v2272_v54, %v4749_v46  ;;  %3330 = vst [vmem:[#allocation10 + $0x78] sm:$0xff] %v3185_v57  ;;  %v2553_v46 = vunpack.c.l.b16 %v780_v52  ;;  %vm5547_vm12 = vcmp.gt.f32.partialorder %v916_v47, 0.6015625  ;;  %vm687_vm8 = vmpackc.low %vm5578_vm4, %vm5578_vm4  ;;  %v1265_v52 = vsel %vm1169_vm3, %v305_v35, 0  ;;  %v210_v47 = vld [vmem:[#allocation2 + $0x1c8] sm:$0xff] }
 0x1fa   :  { %v3060_v22 = vpop.f32.mrf.mxu0  ;;  %v2644_v32 = vpack.c.b16 %v2554_v42, %v2551_v45  ;;  %vm1167_vm0 = vmpackc.low %vm5547_vm12, %vm5547_vm12  ;;  %v440_v28 = vunpack.c.l.bf16 %v210_v47  ;;  %v441_v58 = vunpack.c.h.bf16 %v210_v47  ;;  %vm5642_vm2 = vcmp.gt.f32.partialorder %v442_v51, 0.6015625 }
 0x1fb   :  { %v2930_v34 = vadd.f32 %v2929_v13, %v2273_v26  ;;  %v2643_v38 = vpack.c.b16 %v2553_v46, %v2550_v53  ;;  %v1263_v14 = vsel %vm1167_vm0, %v303_v23, 0  ;;  %vm689_vm9 = vmpackc.low %vm5586_vm6, %vm5586_vm6  ;;  %v783_v23 = vsel %vm687_vm8, %v207_v4, 0 }
 0x1fc   :  { %v3189_v1 = vpop.f32.mrf.mxu1  ;;  %v1643_v46 = vunpack.c.l.b16 %v1263_v14  ;;  %v785_v35 = vsel %vm689_vm9, %v209_v16, 0  ;;  %v2558_v5 = vunpack.c.l.b16 %v783_v23  ;;  %vm5620_vm12 = vcmp.gt.f32.partialorder %v440_v28, 0.6015625  ;;  %vm691_vm6 = vmpackc.low %vm5642_vm2, %vm5642_vm2 }
 0x1fd   :  { %v3059_v39 = vadd.f32 %v3058_v8, %v2930_v34  ;;  %v2645_v8 = vpack.c.b16 %v2555_v27, %v2552_v60  ;;  %v925_v27 = vunpack.c.l.bf16 %v309_v6  ;;  %vm5624_vm13 = vcmp.gt.f32.partialorder %v441_v58, 0.6015625 }
 0x1fe   :  { %vm690_vm3 = vmpackc.low %vm5624_vm13, %vm5620_vm12 }
 0x1ff   :  { %v3188_v55 = vadd.f32 %v3187_v36, %v3059_v39  ;;  %v1646_v39 = vunpack.c.l.b16 %v1265_v52  ;;  %vm5616_vm11 = vcmp.gt.f32.partialorder %v925_v27, 0.6015625 }
 0x200   :  { %v2274_v41 = vpop.f32.mrf.mxu2  ;;  %vm1173_vm1 = vmpackc.low %vm5616_vm11, %vm5616_vm11 }
 0x201   :  { %v2931_v37 = vpop.f32.mrf.mxu3  ;;  %v2275_v48 = vadd.f32 %v2274_v41, %v4783_v24  ;;  %3331 = vst [vmem:[#allocation10 + $0x80] sm:$0xff] %v3188_v55  ;;  %v2561_v55 = vunpack.c.l.b16 %v785_v35  ;;  %v213_v41 = vld [vmem:[#allocation2 + $0x1dc] sm:$0xf]  ;;  %v1733_v62 = vpack.c.b16 %v1646_v39, %v1643_v46 }
 0x202   :  { %v3063_v31 = vpop.f32.mrf.mxu0 }
 0x203   :  { %v2932_v7 = vadd.f32 %v2931_v37, %v2275_v48  ;;  %v2648_v61 = vpack.c.b16 %v2561_v55, %v2558_v5  ;;  %v215_v5 = vld [vmem:[#allocation2 + $0x1e8] sm:$0xf] }
 0x204   :  { %v3192_v25 = vpop.f32.mrf.mxu1  ;;  %v448_v51 = vunpack.c.l.bf16 %v215_v5 }
 0x205   :  { %v3061_v54 = vadd.f32 %v3060_v22, %v2932_v7  ;;  %2316 = vmatmul.bf16.gmra.mxu2 %v1730_v33  ;;  %3102 = vmatmul.bf16.gmra.mxu0 %v2644_v32  ;;  %v782_v22 = vsel %vm686_vm5, %v206_v20, 0  ;;  %v922_v20 = vunpack.c.l.bf16 %v307_v0 }
 0x206   :  { %2973 = vmatmul.bf16.gmra.mxu3 %v2643_v38  ;;  %v2556_v45 = vunpack.c.l.b16 %v782_v22  ;;  %v2557_v59 = vunpack.c.h.b16 %v782_v22 }
 0x207   :  { %3231 = vmatmul.bf16.gmra.mxu1 %v2645_v8  ;;  %v3190_v49 = vadd.f32 %v3189_v1, %v3061_v54  ;;  %v784_v1 = vsel %vm688_vm7, %v208_v29, 0  ;;  %v212_v29 = vld [vmem:[#allocation2 + $0x1d4] sm:$0xff]  ;;  %vm5611_vm10 = vcmp.gt.f32.partialorder %v922_v20, 0.6015625  ;;  %v445_v8 = vunpack.c.l.bf16 %v213_v41 }
 0x208   :  { %v2277_v18 = vpop.f32.mrf.mxu2  ;;  %v2560_v60 = vunpack.c.h.b16 %v784_v1  ;;  %v443_v33 = vunpack.c.l.bf16 %v212_v29  ;;  %v444_v4 = vunpack.c.h.bf16 %v212_v29  ;;  %vm1171_vm14 = vmpackc.low %vm5611_vm10, %vm5611_vm10 }
 0x209   :  { %v2934_v26 = vpop.f32.mrf.mxu3  ;;  %v2278_v34 = vadd.f32 %v2277_v18, %v4814_v12  ;;  %3332 = vst [vmem:[#allocation10 + $0x88] sm:$0xff] %v3190_v49  ;;  %v2559_v12 = vunpack.c.l.b16 %v784_v1  ;;  %vm5650_vm4 = vcmp.gt.f32.partialorder %v445_v8, 0.6015625  ;;  %v1267_v52 = vsel %vm1171_vm14, %v307_v0, 0 }
 0x20a   :  { %v3065_v44 = vpop.f32.mrf.mxu0  ;;  %v2647_v36 = vpack.c.b16 %v2560_v60, %v2557_v59  ;;  %vm5631_vm15 = vcmp.gt.f32.partialorder %v443_v33, 0.6015625  ;;  %vm5635_vm0 = vcmp.gt.f32.partialorder %v444_v4, 0.6015625  ;;  %vm693_vm7 = vmpackc.low %vm5650_vm4, %vm5650_vm4  ;;  %v786_v1 = vsel %vm690_vm3, %v210_v47, 0  ;;  %v217_v33 = vld [vmem:[#allocation2 + $0x1f4] sm:$0xf] }
 0x20b   :  { %v2935_v3 = vadd.f32 %v2934_v26, %v2278_v34  ;;  %v2646_v10 = vpack.c.b16 %v2559_v12, %v2556_v45  ;;  %vm692_vm5 = vmpackc.low %vm5635_vm0, %vm5631_vm15  ;;  %v1269_v34 = vsel %vm1173_vm1, %v309_v6, 0  ;;  %v1649_v39 = vunpack.c.l.b16 %v1267_v52  ;;  %v214_v45 = vld [vmem:[#allocation2 + $0x1e0] sm:$0xff] }
 0x20c   :  { %v3194_v53 = vpop.f32.mrf.mxu1  ;;  %v787_v0 = vsel %vm691_vm6, %v211_v17, 0  ;;  %v789_v6 = vsel %vm693_vm7, %v213_v41, 0  ;;  %v1652_v12 = vunpack.c.l.b16 %v1269_v34  ;;  %v2562_v20 = vunpack.c.l.b16 %v786_v1 }
 0x20d   :  { %v3064_v42 = vadd.f32 %v3063_v31, %v2935_v3  ;;  %v788_v3 = vsel %vm692_vm5, %v212_v29, 0  ;;  %v216_v29 = vld [vmem:[#allocation2 + $0x1ec] sm:$0xff]  ;;  %v2563_v59 = vunpack.c.h.b16 %v786_v1  ;;  %v2564_v55 = vunpack.c.l.b16 %v787_v0 }
 0x20e   :  { %v2566_v60 = vunpack.c.h.b16 %v788_v3  ;;  %v2567_v28 = vunpack.c.l.b16 %v789_v6  ;;  %v446_v58 = vunpack.c.l.bf16 %v214_v45  ;;  %v450_v17 = vunpack.c.h.bf16 %v216_v29  ;;  %v218_v6 = vld [vmem:[#allocation2 + $0x1f8] sm:$0xff] }
 0x20f   :  { %v3193_v37 = vadd.f32 %v3192_v25, %v3064_v42  ;;  %v451_v8 = vunpack.c.l.bf16 %v217_v33  ;;  %vm5706_vm0 = vcmp.gt.f32.partialorder %v448_v51, 0.6015625 }
 0x210   :  { %v2279_v16 = vpop.f32.mrf.mxu2  ;;  %vm5684_vm10 = vcmp.gt.f32.partialorder %v446_v58, 0.6015625  ;;  %vm5699_vm14 = vcmp.gt.f32.partialorder %v450_v17, 0.6015625  ;;  %vm695_vm4 = vmpackc.low %vm5706_vm0, %vm5706_vm0  ;;  %v453_v58 = vunpack.c.h.bf16 %v218_v6 }
 0x211   :  { %v2936_v38 = vpop.f32.mrf.mxu3  ;;  %v2280_v15 = vadd.f32 %v2279_v16, %v4848_v56  ;;  %3333 = vst [vmem:[#allocation10 + $0x90] sm:$0xff] %v3193_v37  ;;  %v447_v37 = vunpack.c.h.bf16 %v214_v45  ;;  %v449_v16 = vunpack.c.l.bf16 %v216_v29  ;;  %vm5714_vm2 = vcmp.gt.f32.partialorder %v451_v8, 0.6015625 }
 0x212   :  { %v3068_v24 = vpop.f32.mrf.mxu0  ;;  %vm697_vm5 = vmpackc.low %vm5714_vm2, %vm5714_vm2 }
 0x213   :  { %v2937_v25 = vadd.f32 %v2936_v38, %v2280_v15  ;;  %vm5688_vm11 = vcmp.gt.f32.partialorder %v447_v37, 0.6015625  ;;  %vm5695_vm13 = vcmp.gt.f32.partialorder %v449_v16, 0.6015625  ;;  %v221_v37 = vld [vmem:[#allocation2 + $0x20c] sm:$0xf] }
 0x214   :  { %v3197_v9 = vpop.f32.mrf.mxu1  ;;  %vm694_vm1 = vmpackc.low %vm5688_vm11, %vm5684_vm10 }
 0x215   :  { %v3066_v13 = vadd.f32 %v3065_v44, %v2937_v25  ;;  %2321 = vmatmul.bf16.gmra.mxu2 %v1733_v62  ;;  %3107 = vmatmul.bf16.gmra.mxu0 %v2647_v36  ;;  %v311_v44 = vld [vmem:[#allocation5 + $0x1e8] sm:$0xf]  ;;  %v1736_v62 = vpack.c.b16 %v1652_v12, %v1649_v39  ;;  %v2650_v36 = vpack.c.b16 %v2566_v60, %v2563_v59  ;;  %vm696_vm3 = vmpackc.low %vm5699_vm14, %vm5695_vm13  ;;  %v219_v60 = vld [vmem:[#allocation2 + $0x200] sm:$0xf] }
 0x216   :  { %2978 = vmatmul.bf16.gmra.mxu3 %v2646_v10  ;;  %v928_v47 = vunpack.c.l.bf16 %v311_v44  ;;  %v792_v1 = vsel %vm696_vm3, %v216_v29, 0 }
 0x217   :  { %3236 = vmatmul.bf16.gmra.mxu1 %v2648_v61  ;;  %v3195_v18 = vadd.f32 %v3194_v53, %v3066_v13  ;;  %v313_v53 = vld [vmem:[#allocation5 + $0x1f4] sm:$0xf]  ;;  %v2651_v61 = vpack.c.b16 %v2567_v28, %v2564_v55  ;;  %v452_v28 = vunpack.c.l.bf16 %v218_v6 }
 0x218   :  { %v2282_v26 = vpop.f32.mrf.mxu2  ;;  %v931_v27 = vunpack.c.l.bf16 %v313_v53  ;;  %vm5675_vm8 = vcmp.gt.f32.partialorder %v928_v47, 0.6015625 }
 0x219   :  { %v2939_v14 = vpop.f32.mrf.mxu3  ;;  %v2283_v22 = vadd.f32 %v2282_v26, %v4879_v43  ;;  %3334 = vst [vmem:[#allocation10 + $0x98] sm:$0xff] %v3195_v18  ;;  %v2565_v43 = vunpack.c.l.b16 %v788_v3  ;;  %vm1175_vm12 = vmpackc.low %vm5675_vm8, %vm5675_vm8  ;;  %v315_v3 = vld [vmem:[#allocation5 + $0x200] sm:$0xf]  ;;  %vm5748_vm8 = vcmp.gt.f32.partialorder %v452_v28, 0.6015625 }
 0x21a   :  { %v3070_v23 = vpop.f32.mrf.mxu0  ;;  %vm5680_vm9 = vcmp.gt.f32.partialorder %v931_v27, 0.6015625 }
 0x21b   :  { %v2940_v46 = vadd.f32 %v2939_v14, %v2283_v22  ;;  %v2649_v10 = vpack.c.b16 %v2565_v43, %v2562_v20  ;;  %vm1177_vm15 = vmpackc.low %vm5680_vm9, %vm5680_vm9  ;;  %v1271_v14 = vsel %vm1175_vm12, %v311_v44, 0  ;;  %v790_v22 = vsel %vm694_vm1, %v214_v45, 0  ;;  %v220_v43 = vld [vmem:[#allocation2 + $0x204] sm:$0xff] }
 0x21c   :  { %v3199_v35 = vpop.f32.mrf.mxu1  ;;  %v1273_v52 = vsel %vm1177_vm15, %v313_v53, 0  ;;  %v1655_v0 = vunpack.c.l.b16 %v1271_v14  ;;  %v791_v44 = vsel %vm695_vm4, %v215_v5, 0  ;;  %v793_v53 = vsel %vm697_vm5, %v217_v33, 0 }
 0x21d   :  { %v3069_v42 = vadd.f32 %v3068_v24, %v2940_v46  ;;  %v317_v46 = vld [vmem:[#allocation5 + $0x20c] sm:$0xf]  ;;  %v1658_v12 = vunpack.c.l.b16 %v1273_v52  ;;  %v2568_v20 = vunpack.c.l.b16 %v790_v22  ;;  %v934_v45 = vunpack.c.l.bf16 %v315_v3 }
 0x21e   :  { %v2569_v29 = vunpack.c.h.b16 %v790_v22  ;;  %v937_v59 = vunpack.c.l.bf16 %v317_v46  ;;  %v2570_v27 = vunpack.c.l.b16 %v791_v44  ;;  %v2573_v55 = vunpack.c.l.b16 %v793_v53  ;;  %v321_v22 = vld [vmem:[#allocation5 + $0x224] sm:$0xf] }
 0x21f   :  { %v3198_v4 = vadd.f32 %v3197_v9, %v3069_v42  ;;  %v2572_v42 = vunpack.c.h.b16 %v792_v1  ;;  %v455_v16 = vunpack.c.l.bf16 %v220_v43  ;;  %v456_v5 = vunpack.c.h.bf16 %v220_v43 }
 0x220   :  { %v2284_v41 = vpop.f32.mrf.mxu2  ;;  %vm5739_vm6 = vcmp.gt.f32.partialorder %v934_v45, 0.6015625  ;;  %vm5744_vm7 = vcmp.gt.f32.partialorder %v937_v59, 0.6015625  ;;  %v2654_v8 = vpack.c.b16 %v2573_v55, %v2570_v27  ;;  %vm5752_vm9 = vcmp.gt.f32.partialorder %v453_v58, 0.6015625  ;;  %v225_v55 = vld [vmem:[#allocation2 + $0x224] sm:$0xf] }
 0x221   :  { %v2941_v38 = vpop.f32.mrf.mxu3  ;;  %v2285_v15 = vadd.f32 %v2284_v41, %v4913_v11  ;;  %3335 = vst [vmem:[#allocation10 + $0xa0] sm:$0xff] %v3198_v4  ;;  %v1739_v41 = vpack.c.b16 %v1658_v12, %v1655_v0  ;;  %v2653_v32 = vpack.c.b16 %v2572_v42, %v2569_v29  ;;  %vm1179_vm10 = vmpackc.low %vm5739_vm6, %vm5739_vm6  ;;  %vm5759_vm11 = vcmp.gt.f32.partialorder %v455_v16, 0.6015625  ;;  %v222_v0 = vld [vmem:[#allocation2 + $0x210] sm:$0xff]  ;;  %v224_v12 = vld [vmem:[#allocation2 + $0x21c] sm:$0xff] }
 0x222   :  { %v3073_v24 = vpop.f32.mrf.mxu0  ;;  %vm5763_vm12 = vcmp.gt.f32.partialorder %v456_v5, 0.6015625  ;;  %vm1181_vm13 = vmpackc.low %vm5744_vm7, %vm5744_vm7  ;;  %v458_v59 = vunpack.c.l.bf16 %v222_v0  ;;  %v459_v27 = vunpack.c.h.bf16 %v222_v0  ;;  %v461_v58 = vunpack.c.l.bf16 %v224_v12 }
 0x223   :  { %v2942_v25 = vadd.f32 %v2941_v38, %v2285_v15  ;;  %v457_v15 = vunpack.c.l.bf16 %v221_v37  ;;  %vm698_vm15 = vmpackc.low %vm5752_vm9, %vm5748_vm8 }
 0x224   :  { %v3202_v9 = vpop.f32.mrf.mxu1  ;;  %vm700_vm1 = vmpackc.low %vm5763_vm12, %vm5759_vm11  ;;  %v794_v14 = vsel %vm698_vm15, %v218_v6, 0  ;;  %vm5812_vm6 = vcmp.gt.f32.partialorder %v458_v59, 0.6015625  ;;  %vm5816_vm7 = vcmp.gt.f32.partialorder %v459_v27, 0.6015625  ;;  %vm5823_vm9 = vcmp.gt.f32.partialorder %v461_v58, 0.6015625  ;;  %v6543_v58 = vld [vmem:[#allocation17_spill] sm:$0xff] }
 0x225   :  { %v3071_v54 = vadd.f32 %v3070_v23, %v2942_v25  ;;  %2326 = vmatmul.bf16.gmra.mxu2 %v1736_v62  ;;  %3112 = vmatmul.bf16.gmra.mxu0 %v2650_v36  ;;  %vm5778_vm0 = vcmp.gt.f32.partialorder %v457_v15, 0.6015625  ;;  %v796_v52 = vsel %vm700_vm1, %v220_v43, 0  ;;  %v2574_v53 = vunpack.c.l.b16 %v794_v14 }
 0x226   :  { %2983 = vmatmul.bf16.gmra.mxu3 %v2649_v10  ;;  %v454_v10 = vunpack.c.l.bf16 %v219_v60  ;;  %vm701_vm3 = vmpackc.low %vm5778_vm0, %vm5778_vm0  ;;  %v2578_v45 = vunpack.c.h.b16 %v796_v52  ;;  %v943_v43 = vunpack.c.l.bf16 %v321_v22  ;;  %v463_v62 = vunpack.c.l.bf16 %v225_v55 }
 0x227   :  { %3241 = vmatmul.bf16.gmra.mxu1 %v2651_v61  ;;  %v3200_v49 = vadd.f32 %v3199_v35, %v3071_v54 }
 0x228   :  { %v2287_v18 = vpop.f32.mrf.mxu2  ;;  %vm5770_vm14 = vcmp.gt.f32.partialorder %v454_v10, 0.6015625  ;;  %vm5808_vm5 = vcmp.gt.f32.partialorder %v943_v43, 0.6015625  ;;  %v229_v43 = vld [vmem:[#allocation2 + $0x23c] sm:$0xf] }
 0x229   :  { %v2944_v26 = vpop.f32.mrf.mxu3  ;;  %v2288_v34 = vadd.f32 %v2287_v18, %v4944_v2  ;;  %3336 = vst [vmem:[#allocation10 + $0xa8] sm:$0xff] %v3200_v49  ;;  %v2571_v2 = vunpack.c.l.b16 %v792_v1  ;;  %vm699_vm2 = vmpackc.low %vm5770_vm14, %vm5770_vm14  ;;  %v1275_v49 = vsel %vm1179_vm10, %v315_v3, 0  ;;  %v1277_v18 = vsel %vm1181_vm13, %v317_v46, 0 }
 0x22a   :  { %v3075_v35 = vpop.f32.mrf.mxu0  ;;  %v795_v3 = vsel %vm699_vm2, %v219_v60, 0  ;;  %v797_v46 = vsel %vm701_vm3, %v221_v37, 0  ;;  %v1664_v44 = vunpack.c.l.b16 %v1277_v18  ;;  %v462_v60 = vunpack.c.h.bf16 %v224_v12  ;;  %vm1185_vm11 = vmpackc.low %vm5808_vm5, %vm5808_vm5  ;;  %v5864_v18 = vld [vmem:[#allocation5 + $0x23c] sm:$0xf] }
 0x22b   :  { %v2945_v23 = vadd.f32 %v2944_v26, %v2288_v34  ;;  %v2652_v38 = vpack.c.b16 %v2571_v2, %v2568_v20  ;;  %v319_v34 = vld [vmem:[#allocation5 + $0x218] sm:$0xf]  ;;  %v2575_v2 = vunpack.c.h.b16 %v794_v14  ;;  %v2576_v29 = vunpack.c.l.b16 %v795_v3  ;;  %vm702_vm13 = vmpackc.low %vm5816_vm7, %vm5812_vm6 }
 0x22c   :  { %v3204_v39 = vpop.f32.mrf.mxu1  ;;  %v940_v6 = vunpack.c.l.bf16 %v319_v34  ;;  %v2579_v42 = vunpack.c.l.b16 %v797_v46  ;;  %vm5827_vm10 = vcmp.gt.f32.partialorder %v462_v60, 0.6015625  ;;  %vm5842_vm14 = vcmp.gt.f32.partialorder %v463_v62, 0.6015625  ;;  %v228_v46 = vld [vmem:[#allocation2 + $0x234] sm:$0xff] }
 0x22d   :  { %v3074_v47 = vadd.f32 %v3073_v24, %v2945_v23  ;;  %v2656_v10 = vpack.c.b16 %v2578_v45, %v2575_v2  ;;  %vm704_vm15 = vmpackc.low %vm5827_vm10, %vm5823_vm9  ;;  %v1281_v56 = vsel %vm1185_vm11, %v321_v22, 0 }
 0x22e   :  { %vm5803_vm4 = vcmp.gt.f32.partialorder %v940_v6, 0.6015625  ;;  %vm705_vm1 = vmpackc.low %vm5842_vm14, %vm5842_vm14  ;;  %v227_v6 = vld [vmem:[#allocation2 + $0x230] sm:$0xf] }
 0x22f   :  { %v3203_v4 = vadd.f32 %v3202_v9, %v3074_v47  ;;  %v223_v47 = vld [vmem:[#allocation2 + $0x218] sm:$0xf]  ;;  %vm1183_vm8 = vmpackc.low %vm5803_vm4, %vm5803_vm4  ;;  %v801_v22 = vsel %vm705_vm1, %v225_v55, 0  ;;  %v466_v60 = vunpack.c.l.bf16 %v227_v6 }
 0x230   :  { %v2289_v33 = vpop.f32.mrf.mxu2 }
 0x231   :  { %v2946_v17 = vpop.f32.mrf.mxu3  ;;  %v2290_v48 = vadd.f32 %v2289_v33, %v4978_v21  ;;  %3337 = vst [vmem:[#allocation10 + $0xb0] sm:$0xff] %v3203_v4  ;;  %vm5904_vm10 = vcmp.gt.f32.partialorder %v466_v60, 0.6015625 }
 0x232   :  { %v3078_v31 = vpop.f32.mrf.mxu0  ;;  %vm707_vm14 = vmpackc.low %vm5904_vm10, %vm5904_vm10 }
 0x233   :  { %v2947_v7 = vadd.f32 %v2946_v17, %v2290_v48  ;;  %v460_v17 = vunpack.c.l.bf16 %v223_v47  ;;  %v2657_v48 = vpack.c.b16 %v2579_v42, %v2576_v29  ;;  %v467_v29 = vunpack.c.l.bf16 %v228_v46 }
 0x234   :  { %v3207_v25 = vpop.f32.mrf.mxu1  ;;  %v468_v42 = vunpack.c.h.bf16 %v228_v46 }
 0x235   :  { %v3076_v11 = vadd.f32 %v3075_v35, %v2947_v7  ;;  %2331 = vmatmul.bf16.gmra.mxu2 %v1739_v41  ;;  %3117 = vmatmul.bf16.gmra.mxu0 %v2653_v32  ;;  %vm5834_vm12 = vcmp.gt.f32.partialorder %v460_v17, 0.6015625  ;;  %vm5893_vm7 = vcmp.gt.f32.partialorder %v467_v29, 0.6015625 }
 0x236   :  { %2988 = vmatmul.bf16.gmra.mxu3 %v2652_v38  ;;  %vm703_vm0 = vmpackc.low %vm5834_vm12, %vm5834_vm12 }
 0x237   :  { %3246 = vmatmul.bf16.gmra.mxu1 %v2654_v8  ;;  %v3205_v57 = vadd.f32 %v3204_v39, %v3076_v11  ;;  %v1661_v39 = vunpack.c.l.b16 %v1275_v49  ;;  %v1279_v11 = vsel %vm1183_vm8, %v319_v34, 0  ;;  %v5862_v49 = vld [vmem:[#allocation5 + $0x230] sm:$0xf]  ;;  %v799_v34 = vsel %vm703_vm0, %v223_v47, 0 }
 0x238   :  { %v2292_v54 = vpop.f32.mrf.mxu2  ;;  %v946_v3 = vunpack.c.l.bf16 %v5862_v49  ;;  %vm5897_vm8 = vcmp.gt.f32.partialorder %v468_v42, 0.6015625 }
 0x239   :  { %v2949_v13 = vpop.f32.mrf.mxu3  ;;  %v2293_v26 = vadd.f32 %v2292_v54, %v4279_v63  ;;  %3338 = vst [vmem:[#allocation10 + $0xb8] sm:$0xff] %v3205_v57  ;;  %v2577_v63 = vunpack.c.l.b16 %v796_v52  ;;  %v1742_v16 = vpack.c.b16 %v1664_v44, %v1661_v39  ;;  %v798_v54 = vsel %vm702_vm13, %v222_v0, 0  ;;  %vm708_vm13 = vmpackc.low %vm5897_vm8, %vm5893_vm7 }
 0x23a   :  { %v3080_v23 = vpop.f32.mrf.mxu0  ;;  %v2581_v44 = vunpack.c.h.b16 %v798_v54  ;;  %vm5873_vm2 = vcmp.gt.f32.partialorder %v946_v3, 0.6015625 }
 0x23b   :  { %v2950_v1 = vadd.f32 %v2949_v13, %v2293_v26  ;;  %v2655_v5 = vpack.c.b16 %v2577_v63, %v2574_v53  ;;  %v800_v13 = vsel %vm704_vm15, %v224_v12, 0  ;;  %v949_v63 = vunpack.c.l.bf16 %v5864_v18  ;;  %vm1187_vm6 = vmpackc.low %vm5873_vm2, %vm5873_vm2 }
 0x23c   :  { %v3209_v35 = vpop.f32.mrf.mxu1  ;;  %v2583_v39 = vunpack.c.l.b16 %v800_v13  ;;  %v2584_v53 = vunpack.c.h.b16 %v800_v13  ;;  %v2582_v12 = vunpack.c.l.b16 %v799_v34  ;;  %v1283_v7 = vsel %vm1187_vm6, %v5862_v49, 0 }
 0x23d   :  { %v3079_v20 = vadd.f32 %v3078_v31, %v2950_v1  ;;  %v1667_v1 = vunpack.c.l.b16 %v1279_v11  ;;  %vm5878_vm3 = vcmp.gt.f32.partialorder %v949_v63, 0.6015625  ;;  %v803_v11 = vsel %vm707_vm14, %v227_v6, 0 }
 0x23e   :  { %vm1189_vm9 = vmpackc.low %vm5878_vm3, %vm5878_vm3 }
 0x23f   :  { %v3208_v28 = vadd.f32 %v3207_v25, %v3079_v20  ;;  %v2585_v20 = vunpack.c.l.b16 %v801_v22 }
 0x240   :  { %v2294_v37 = vpop.f32.mrf.mxu2 }
 0x241   :  { %v2951_v4 = vpop.f32.mrf.mxu3  ;;  %v2295_v41 = vadd.f32 %v2294_v37, %v4283_v30  ;;  %3339 = vst [vmem:[#allocation10 + $0xc0] sm:$0xff] %v3208_v28  ;;  %v2660_v33 = vpack.c.b16 %v2585_v20, %v2582_v12 }
 0x242   :  { %v3083_v8 = vpop.f32.mrf.mxu0 }
 0x243   :  { %v2952_v32 = vadd.f32 %v2951_v4, %v2295_v41 }
 0x244   :  { %v3212_v36 = vpop.f32.mrf.mxu1 }
 0x245   :  { %v3081_v31 = vadd.f32 %v3080_v23, %v2952_v32  ;;  %2336 = vmatmul.bf16.gmra.mxu2 %v1742_v16  ;;  %3122 = vmatmul.bf16.gmra.mxu0 %v2656_v10  ;;  %v226_v23 = vld [vmem:[#allocation2 + $0x228] sm:$0xff]  ;;  %v469_v16 = vunpack.c.l.bf16 %v229_v43 }
 0x246   :  { %2993 = vmatmul.bf16.gmra.mxu3 %v2655_v5  ;;  %v464_v2 = vunpack.c.l.bf16 %v226_v23  ;;  %v465_v45 = vunpack.c.h.bf16 %v226_v23  ;;  %v2659_v5 = vpack.c.b16 %v2584_v53, %v2581_v44 }
 0x247   :  { %3251 = vmatmul.bf16.gmra.mxu1 %v2657_v48  ;;  %v3210_v21 = vadd.f32 %v3209_v35, %v3081_v31  ;;  %v2580_v35 = vunpack.c.l.b16 %v798_v54  ;;  %vm5912_vm12 = vcmp.gt.f32.partialorder %v469_v16, 0.6015625  ;;  %v1285_v31 = vsel %vm1189_vm9, %v5864_v18, 0 }
 0x248   :  { %v2297_v24 = vpop.f32.mrf.mxu2  ;;  %vm5882_vm4 = vcmp.gt.f32.partialorder %v464_v2, 0.6015625  ;;  %vm5886_vm5 = vcmp.gt.f32.partialorder %v465_v45, 0.6015625  ;;  %vm709_vm15 = vmpackc.low %vm5912_vm12, %vm5912_vm12  ;;  %v1676_v13 = vunpack.c.l.b16 %v1285_v31  ;;  %v6542_v45 = vld [vmem:[#allocation16_spill] sm:$0xff] }
 0x249   :  { %v2954_v9 = vpop.f32.mrf.mxu3  ;;  %v2298_v57 = vadd.f32 %v2297_v24, %v4335_v50  ;;  %3340 = vst [vmem:[#allocation10 + $0xc8] sm:$0xff] %v3210_v21  ;;  %v1670_v50 = vunpack.c.l.b16 %v1281_v56  ;;  %v2658_v28 = vpack.c.b16 %v2583_v39, %v2580_v35  ;;  %vm706_vm11 = vmpackc.low %vm5886_vm5, %vm5882_vm4  ;;  %v804_v21 = vsel %vm708_vm13, %v228_v46, 0 }
 0x24a   :  { %v3085_v14 = vpop.f32.mrf.mxu0  ;;  %v802_v25 = vsel %vm706_vm11, %v226_v23, 0  ;;  %v805_v56 = vsel %vm709_vm15, %v229_v43, 0  ;;  %v2589_v49 = vunpack.c.l.b16 %v804_v21  ;;  %v6541_v23 = vld [vmem:[#allocation15_spill] sm:$0xff] }
 0x24b   :  { %v2955_v26 = vadd.f32 %v2954_v9, %v2298_v57  ;;  %v1745_v55 = vpack.c.b16 %v1670_v50, %v1667_v1  ;;  %v1673_v57 = vunpack.c.l.b16 %v1283_v7  ;;  %v2588_v1 = vunpack.c.l.b16 %v803_v11 }
 0x24c   :  { %v3214_v52 = vpop.f32.mrf.mxu1  ;;  %v2591_v34 = vunpack.c.l.b16 %v805_v56 }
 0x24d   :  { %v3084_v0 = vadd.f32 %v3083_v8, %v2955_v26  ;;  %v2586_v26 = vunpack.c.l.b16 %v802_v25  ;;  %v1748_v39 = vpack.c.b16 %v1676_v13, %v1673_v57 }
 0x24f   :  { %v3213_v47 = vadd.f32 %v3212_v36, %v3084_v0  ;;  %v2661_v3 = vpack.c.b16 %v2589_v49, %v2586_v26  ;;  %v2663_v0 = vpack.c.b16 %v2591_v34, %v2588_v1 }
 0x250   :  { %v2299_v59 = vpop.f32.mrf.mxu2 }
 0x251   :  { %v2956_v27 = vpop.f32.mrf.mxu3  ;;  %v2300_v37 = vadd.f32 %v2299_v59, %v4339_v19  ;;  %3341 = vst [vmem:[#allocation10 + $0xd0] sm:$0xff] %v3213_v47 }
 0x252   :  { %v3088_v62 = vpop.f32.mrf.mxu0 }
 0x253   :  { %v2957_v38 = vadd.f32 %v2956_v27, %v2300_v37 }
 0x254   :  { %v3217_v10 = vpop.f32.mrf.mxu1 }
 0x255   :  { %v3086_v15 = vadd.f32 %v3085_v14, %v2957_v38  ;;  %2341 = vmatmul.bf16.gmra.mxu2 %v1745_v55  ;;  %3127 = vmatmul.bf16.gmra.mxu0 %v2659_v5  ;;  %v2587_v14 = vunpack.c.h.b16 %v802_v25  ;;  %v6544_v38 = vld [vmem:[#allocation18_spill] sm:$0xff] }
 0x256   :  { %2998 = vmatmul.bf16.gmra.mxu3 %v2658_v28 }
 0x257   :  { %3256 = vmatmul.bf16.gmra.mxu1 %v2660_v33  ;;  %v3215_v8 = vadd.f32 %v3214_v52, %v3086_v15  ;;  %v2590_v52 = vunpack.c.h.b16 %v804_v21 }
 0x258   :  { %v2302_v36 = vpop.f32.mrf.mxu2 }
 0x259   :  { %v2959_v30 = vpop.f32.mrf.mxu3  ;;  %v2303_v61 = vadd.f32 %v2302_v36, %v4391_v40  ;;  %3342 = vst [vmem:[#allocation10 + $0xd8] sm:$0xff] %v3215_v8  ;;  %v2662_v46 = vpack.c.b16 %v2590_v52, %v2587_v14  ;;  %v6545_v36 = vld [vmem:[#allocation19_spill] sm:$0xff]  ;;  %v6547_v52 = vld [vmem:[#allocation21_spill] sm:$0xff] }
 0x25a   :  { %v3090_v9 = vpop.f32.mrf.mxu0 }
 0x25b   :  { %v2960_v24 = vadd.f32 %v2959_v30, %v2303_v61 }
 0x25c   :  { %v3219_v40 = vpop.f32.mrf.mxu1 }
 0x25d   :  { %v3089_v54 = vadd.f32 %v3088_v62, %v2960_v24 }
 0x25f   :  { %v3218_v22 = vadd.f32 %v3217_v10, %v3089_v54 }
 0x260   :  { %v2304_v50 = vpop.f32.mrf.mxu2 }
 0x261   :  { %v2961_v18 = vpop.f32.mrf.mxu3  ;;  %v2305_v35 = vadd.f32 %v2304_v50, %v6541_v23  ;;  %3343 = vst [vmem:[#allocation10 + $0xe0] sm:$0xff] %v3218_v22 }
 0x262   :  { %v3093_v53 = vpop.f32.mrf.mxu0 }
 0x263   :  { %v2962_v44 = vadd.f32 %v2961_v18, %v2305_v35 }
 0x264   :  { %v3222_v63 = vpop.f32.mrf.mxu1 }
 0x265   :  { %v3091_v6 = vadd.f32 %v3090_v9, %v2962_v44  ;;  %2346 = vmatmul.bf16.gmra.mxu2 %v1748_v39  ;;  %3132 = vmatmul.bf16.gmra.mxu0 %v2662_v46 }
 0x266   :  { %3003 = vmatmul.bf16.gmra.mxu3 %v2661_v3  ;;  %v6548_v3 = vld [vmem:[#allocation22_spill] sm:$0xff] }
 0x267   :  { %3261 = vmatmul.bf16.gmra.mxu1 %v2663_v0  ;;  %v3220_v12 = vadd.f32 %v3219_v40, %v3091_v6  ;;  %v6546_v40 = vld [vmem:[#allocation20_spill] sm:$0xff] }
 0x268   :  { %v2307_v20 = vpop.f32.mrf.mxu2 }
 0x269   :  { %v2964_v2 = vpop.f32.mrf.mxu3  ;;  %v2308_v43 = vadd.f32 %v2307_v20, %v6542_v45  ;;  %3344 = vst [vmem:[#allocation10 + $0xe8] sm:$0xff] %v3220_v12 }
 0x26a   :  { %v3095_v29 = vpop.f32.mrf.mxu0 }
 0x26b   :  { %v2965_v47 = vadd.f32 %v2964_v2, %v2308_v43  ;;  %v6549_v2 = vld [vmem:[#allocation23_spill] sm:$0xff] }
 0x26c   :  { %v3224_v42 = vpop.f32.mrf.mxu1 }
 0x26d   :  { %v3094_v59 = vadd.f32 %v3093_v53, %v2965_v47 }
 0x26f   :  { %v3223_v27 = vadd.f32 %v3222_v63, %v3094_v59 }
 0x270   :  { %v2309_v55 = vpop.f32.mrf.mxu2 }
 0x271   :  { %v2966_v28 = vpop.f32.mrf.mxu3  ;;  %v2310_v60 = vadd.f32 %v2309_v55, %v6543_v58  ;;  %3345 = vst [vmem:[#allocation10 + $0xf0] sm:$0xff] %v3223_v27 }
 0x272   :  { %v3098_v4 = vpop.f32.mrf.mxu0 }
 0x273   :  { %v2967_v37 = vadd.f32 %v2966_v28, %v2310_v60  ;;  %v6550_v28 = vld [vmem:[#allocation24_spill] sm:$0xff] }
 0x274   :  { %v3227_v16 = vpop.f32.mrf.mxu1 }
 0x275   :  { %v3096_v5 = vadd.f32 %v3095_v29, %v2967_v37 }
 0x277   :  { %v3225_v33 = vadd.f32 %v3224_v42, %v3096_v5 }
 0x278   :  { %v2312_v17 = vpop.f32.mrf.mxu2 }
 0x279   :  { %v2969_v41 = vpop.f32.mrf.mxu3  ;;  %v2313_v62 = vadd.f32 %v2312_v17, %v6544_v38  ;;  %3346 = vst [vmem:[#allocation10 + $0xf8] sm:$0xff] %v3225_v33 }
 0x27a   :  { %v3100_v19 = vpop.f32.mrf.mxu0 }
 0x27b   :  { %v2970_v10 = vadd.f32 %v2969_v41, %v2313_v62  ;;  %v6551_v41 = vld [vmem:[#allocation25_spill] sm:$0xff] }
 0x27c   :  { %v3229_v48 = vpop.f32.mrf.mxu1 }
 0x27d   :  { %v3099_v51 = vadd.f32 %v3098_v4, %v2970_v10 }
 0x27f   :  { %v3228_v15 = vadd.f32 %v3227_v16, %v3099_v51 }
 0x280   :  { %v2314_v32 = vpop.f32.mrf.mxu2 }
 0x281   :  { %v2971_v8 = vpop.f32.mrf.mxu3  ;;  %v2315_v30 = vadd.f32 %v2314_v32, %v6545_v36  ;;  %3347 = vst [vmem:[#allocation10 + $0x100] sm:$0xff] %v3228_v15 }
 0x282   :  { %v3103_v7 = vpop.f32.mrf.mxu0 }
 0x283   :  { %v2972_v61 = vadd.f32 %v2971_v8, %v2315_v30  ;;  %v6552_v8 = vld [vmem:[#allocation26_spill] sm:$0xff] }
 0x284   :  { %v3232_v31 = vpop.f32.mrf.mxu1 }
 0x285   :  { %v3101_v25 = vadd.f32 %v3100_v19, %v2972_v61 }
 0x287   :  { %v3230_v21 = vadd.f32 %v3229_v48, %v3101_v25 }
 0x288   :  { %v2317_v24 = vpop.f32.mrf.mxu2 }
 0x289   :  { %v2974_v9 = vpop.f32.mrf.mxu3  ;;  %v2318_v11 = vadd.f32 %v2317_v24, %v6546_v40  ;;  %3348 = vst [vmem:[#allocation10 + $0x108] sm:$0xff] %v3230_v21 }
 0x28a   :  { %v3105_v57 = vpop.f32.mrf.mxu0 }
 0x28b   :  { %v2975_v56 = vadd.f32 %v2974_v9, %v2318_v11  ;;  %v6553_v9 = vld [vmem:[#allocation27_spill] sm:$0xff] }
 0x28c   :  { %v3234_v54 = vpop.f32.mrf.mxu1 }
 0x28d   :  { %v3104_v13 = vadd.f32 %v3103_v7, %v2975_v56 }
 0x28f   :  { %v3233_v26 = vadd.f32 %v3232_v31, %v3104_v13 }
 0x290   :  { %v2319_v49 = vpop.f32.mrf.mxu2 }
 0x291   :  { %v2976_v14 = vpop.f32.mrf.mxu3  ;;  %v2320_v1 = vadd.f32 %v2319_v49, %v6547_v52  ;;  %3349 = vst [vmem:[#allocation10 + $0x110] sm:$0xff] %v3233_v26 }
 0x292   :  { %v3108_v22 = vpop.f32.mrf.mxu0 }
 0x293   :  { %v2977_v34 = vadd.f32 %v2976_v14, %v2320_v1  ;;  %v6554_v14 = vld [vmem:[#allocation28_spill] sm:$0xff] }
 0x294   :  { %v3237_v50 = vpop.f32.mrf.mxu1 }
 0x295   :  { %v3106_v18 = vadd.f32 %v3105_v57, %v2977_v34 }
 0x297   :  { %v3235_v23 = vadd.f32 %v3234_v54, %v3106_v18 }
 0x298   :  { %v2322_v35 = vpop.f32.mrf.mxu2 }
 0x299   :  { %v2979_v39 = vpop.f32.mrf.mxu3  ;;  %v2323_v46 = vadd.f32 %v2322_v35, %v6548_v3  ;;  %3350 = vst [vmem:[#allocation10 + $0x118] sm:$0xff] %v3235_v23 }
 0x29a   :  { %v3110_v44 = vpop.f32.mrf.mxu0 }
 0x29b   :  { %v2980_v0 = vadd.f32 %v2979_v39, %v2323_v46  ;;  %v6555_v39 = vld [vmem:[#allocation29_spill] sm:$0xff] }
 0x29c   :  { %v3239_v53 = vpop.f32.mrf.mxu1 }
 0x29d   :  { %v3109_v63 = vadd.f32 %v3108_v22, %v2980_v0 }
 0x29f   :  { %v3238_v6 = vadd.f32 %v3237_v50, %v3109_v63 }
 0x2a0   :  { %v2324_v12 = vpop.f32.mrf.mxu2 }
 0x2a1   :  { %v2981_v20 = vpop.f32.mrf.mxu3  ;;  %v2325_v45 = vadd.f32 %v2324_v12, %v6549_v2  ;;  %3351 = vst [vmem:[#allocation10 + $0x120] sm:$0xff] %v3238_v6 }
 0x2a2   :  { %v3113_v47 = vpop.f32.mrf.mxu0 }
 0x2a3   :  { %v2982_v43 = vadd.f32 %v2981_v20, %v2325_v45  ;;  %v6556_v20 = vld [vmem:[#allocation30_spill] sm:$0xff] }
 0x2a4   :  { %v3242_v29 = vpop.f32.mrf.mxu1 }
 0x2a5   :  { %v3111_v42 = vadd.f32 %v3110_v44, %v2982_v43 }
 0x2a7   :  { %v3240_v59 = vadd.f32 %v3239_v53, %v3111_v42 }
 0x2a8   :  { %v2327_v27 = vpop.f32.mrf.mxu2 }
 0x2a9   :  { %v2984_v55 = vpop.f32.mrf.mxu3  ;;  %v2328_v58 = vadd.f32 %v2327_v27, %v6550_v28  ;;  %3352 = vst [vmem:[#allocation10 + $0x128] sm:$0xff] %v3240_v59  ;;  %v6557_v27 = vld [vmem:[#allocation31_spill] sm:$0xff] }
 0x2aa   :  { %v3115_v37 = vpop.f32.mrf.mxu0 }
 0x2ab   :  { %v2985_v60 = vadd.f32 %v2984_v55, %v2328_v58 }
 0x2ac   :  { %v3244_v4 = vpop.f32.mrf.mxu1 }
 0x2ad   :  { %v3114_v16 = vadd.f32 %v3113_v47, %v2985_v60 }
 0x2af   :  { %v3243_v5 = vadd.f32 %v3242_v29, %v3114_v16 }
 0x2b0   :  { %v2329_v33 = vpop.f32.mrf.mxu2 }
 0x2b1   :  { %v2986_v17 = vpop.f32.mrf.mxu3  ;;  %v2330_v38 = vadd.f32 %v2329_v33, %v6551_v41  ;;  %3353 = vst [vmem:[#allocation10 + $0x130] sm:$0xff] %v3243_v5  ;;  %v6558_v5 = vld [vmem:[#allocation32_spill] sm:$0xff] }
 0x2b2   :  { %v3118_v10 = vpop.f32.mrf.mxu0 }
 0x2b3   :  { %v2987_v62 = vadd.f32 %v2986_v17, %v2330_v38 }
 0x2b4   :  { %v3247_v19 = vpop.f32.mrf.mxu1 }
 0x2b5   :  { %v3116_v48 = vadd.f32 %v3115_v37, %v2987_v62 }
 0x2b7   :  { %v3245_v51 = vadd.f32 %v3244_v4, %v3116_v48  ;;  %v6559_v48 = vld [vmem:[#allocation33_spill] sm:$0xff] }
 0x2b8   :  { %v2332_v15 = vpop.f32.mrf.mxu2 }
 0x2b9   :  { %v2989_v32 = vpop.f32.mrf.mxu3  ;;  %v2333_v36 = vadd.f32 %v2332_v15, %v6552_v8  ;;  %3354 = vst [vmem:[#allocation10 + $0x138] sm:$0xff] %v3245_v51 }
 0x2ba   :  { %v3120_v61 = vpop.f32.mrf.mxu0 }
 0x2bb   :  { %v2990_v30 = vadd.f32 %v2989_v32, %v2333_v36 }
 0x2bc   :  { %v3249_v7 = vpop.f32.mrf.mxu1 }
 0x2bd   :  { %v3119_v31 = vadd.f32 %v3118_v10, %v2990_v30 }
 0x2bf   :  { %v3248_v25 = vadd.f32 %v3247_v19, %v3119_v31 }
 0x2c0   :  { %v2334_v21 = vpop.f32.mrf.mxu2 }
 0x2c1   :  { %v2991_v24 = vpop.f32.mrf.mxu3  ;;  %v2335_v40 = vadd.f32 %v2334_v21, %v6553_v9  ;;  %3355 = vst [vmem:[#allocation10 + $0x140] sm:$0xff] %v3248_v25 }
 0x2c2   :  { %v3123_v56 = vpop.f32.mrf.mxu0 }
 0x2c3   :  { %v2992_v11 = vadd.f32 %v2991_v24, %v2335_v40 }
 0x2c4   :  { %v3252_v57 = vpop.f32.mrf.mxu1 }
 0x2c5   :  { %v3121_v54 = vadd.f32 %v3120_v61, %v2992_v11 }
 0x2c7   :  { %v3250_v13 = vadd.f32 %v3249_v7, %v3121_v54 }
 0x2c8   :  { %v2337_v26 = vpop.f32.mrf.mxu2 }
 0x2c9   :  { %v2994_v49 = vpop.f32.mrf.mxu3  ;;  %v2338_v52 = vadd.f32 %v2337_v26, %v6554_v14  ;;  %3356 = vst [vmem:[#allocation10 + $0x148] sm:$0xff] %v3250_v13 }
 0x2ca   :  { %v3125_v34 = vpop.f32.mrf.mxu0 }
 0x2cb   :  { %v2995_v1 = vadd.f32 %v2994_v49, %v2338_v52 }
 0x2cc   :  { %v3254_v50 = vpop.f32.mrf.mxu1 }
 0x2cd   :  { %v3124_v22 = vadd.f32 %v3123_v56, %v2995_v1 }
 0x2cf   :  { %v3253_v18 = vadd.f32 %v3252_v57, %v3124_v22 }
 0x2d0   :  { %v2339_v23 = vpop.f32.mrf.mxu2 }
 0x2d1   :  { %v2996_v35 = vpop.f32.mrf.mxu3  ;;  %v2340_v3 = vadd.f32 %v2339_v23, %v6555_v39  ;;  %3357 = vst [vmem:[#allocation10 + $0x150] sm:$0xff] %v3253_v18 }
 0x2d2   :  { %v3128_v44 = vpop.f32.mrf.mxu0 }
 0x2d3   :  { %v2997_v46 = vadd.f32 %v2996_v35, %v2340_v3 }
 0x2d4   :  { %v3257_v63 = vpop.f32.mrf.mxu1 }
 0x2d5   :  { %v3126_v0 = vadd.f32 %v3125_v34, %v2997_v46 }
 0x2d7   :  { %v3255_v53 = vadd.f32 %v3254_v50, %v3126_v0 }
 0x2d8   :  { %v2342_v6 = vpop.f32.mrf.mxu2 }
 0x2d9   :  { %v2999_v12 = vpop.f32.mrf.mxu3  ;;  %v2343_v2 = vadd.f32 %v2342_v6, %v6556_v20  ;;  %3358 = vst [vmem:[#allocation10 + $0x158] sm:$0xff] %v3255_v53 }
 0x2da   :  { %v3130_v29 = vpop.f32.mrf.mxu0 }
 0x2db   :  { %v3000_v45 = vadd.f32 %v2999_v12, %v2343_v2 }
 0x2dc   :  { %v3259_v28 = vpop.f32.mrf.mxu1 }
 0x2dd   :  { %v3129_v43 = vadd.f32 %v3128_v44, %v3000_v45 }
 0x2df   :  { %v3258_v47 = vadd.f32 %v3257_v63, %v3129_v43 }
 0x2e0   :  { %v2344_v42 = vpop.f32.mrf.mxu2 }
 0x2e1   :  { %v3001_v59 = vpop.f32.mrf.mxu3  ;;  %v2345_v55 = vadd.f32 %v2344_v42, %v6557_v27  ;;  %3359 = vst [vmem:[#allocation10 + $0x160] sm:$0xff] %v3258_v47 }
 0x2e2   :  { %v3133_v17 = vpop.f32.mrf.mxu0 }
 0x2e3   :  { %v3002_v58 = vadd.f32 %v3001_v59, %v2345_v55 }
 0x2e4   :  { %v3262_v38 = vpop.f32.mrf.mxu1 }
 0x2e5   :  { %v3131_v60 = vadd.f32 %v3130_v29, %v3002_v58 }
 0x2e7   :  { %v3260_v37 = vadd.f32 %v3259_v28, %v3131_v60 }
 0x2e8   :  { %v2347_v4 = vpop.f32.mrf.mxu2 }
 0x2e9   :  { %v3004_v16 = vpop.f32.mrf.mxu3  ;;  %v2348_v33 = vadd.f32 %v2347_v4, %v6558_v5  ;;  %3360 = vst [vmem:[#allocation10 + $0x168] sm:$0xff] %v3260_v37 }
 0x2ea   :  { %v3135_v8 = vpop.f32.mrf.mxu0 }
 0x2eb   :  { %v3005_v41 = vadd.f32 %v3004_v16, %v2348_v33 }
 0x2ec   :  { %v3264_v30 = vpop.f32.mrf.mxu1 }
 0x2ed   :  { %v3134_v62 = vadd.f32 %v3133_v17, %v3005_v41 }
 0x2ef   :  { %v3263_v10 = vadd.f32 %v3262_v38, %v3134_v62 }
 0x2f0   :  { %v2349_v19 = vpop.f32.mrf.mxu2 }
 0x2f1   :  { %v2350_v51 = vadd.f32 %v2349_v19, %v6559_v48  ;;  %v3006_v15 = vpop.f32.mrf.mxu3  ;;  %3361 = vst [vmem:[#allocation10 + $0x170] sm:$0xff] %v3263_v10 }
 0x2f3   :  { %v3007_v32 = vadd.f32 %v3006_v15, %v2350_v51 }
 0x2f5   :  { %v3136_v36 = vadd.f32 %v3135_v8, %v3007_v32 }
 0x2f7   :  { %v3265_v61 = vadd.f32 %v3264_v30, %v3136_v36 }
 0x2f9   :  { %3362 = vst [vmem:[#allocation10 + $0x178] sm:$0xff] %v3265_v61 }
 0x2fa   :  { %3375 = dma.vmem_to_hbm [thread:$0]  %s3368_s3, 6144, %s3370_s13, [#allocation4], %s3793_s14, %s3793_s14, %s3794_s15  }
 0x2fb   :  { %3782 = dma.done.wait [#allocation4], 6144  }
 0x2fc   :  { %3783 = vsyncadd [#allocation4], 4294961152 }
 0x2fd   :  { %3380 = vsyncpa [#allocation3], 1 }
 0x2fe   :  { %3381 = vsyncpa [#allocation6], 1 }
 0x2ff   :  { %3382 = vsyncpa [#allocation9], 1 }
 0x300   :  { %3383 = vsyncpa [#allocation4], 1 }

</bundles_post_ra>
